<compile_context>
chip_gen: v7x
topology: tpu7x:2x2x1
jax: 0.10.0
libtpu: 0.0.40
codegen_flags: <defaults>
</compile_context>

<pallas_src>
import inspect

import jax
import jax.numpy as jnp
from jax.experimental import pallas as pl
from jax.experimental.pallas import tpu as pltpu

NOISE_DIM = 96
K_PAD = 128            # layer-1 contraction dim padded 96 -> 128
HIDDEN = 1024
OUT_DIM = 784
OUT_PAD = 896          # 7 * 128 -> lane-dense output stores / w3 columns

_SINGLE_STEP_MAX_B = 255   # B < 256 -> one grid step; B >= 256 -> >= 2 steps (v7x megacore)
_MAX_BATCH_TILE = 512      # 512-row tiles for big batches (v6e/v7x); VMEM stays well < 32 MiB


def _round_up(v, m):
    return -(-v // m) * m


def _supports_pipeline_mode():
    """Does this jax version support per-BlockSpec buffer counts (pl.Buffered)?"""
    if not hasattr(pl, "Buffered"):
        return False
    fields = getattr(pl.BlockSpec, "__dataclass_fields__", None)
    if fields is not None and "pipeline_mode" in fields:
        return True
    try:
        return "pipeline_mode" in inspect.signature(pl.BlockSpec).parameters
    except (TypeError, ValueError):
        return False


_HAS_BUFFERED = _supports_pipeline_mode()


def generator_kernel(x_ref, w1_ref, b1_ref, w2_ref, b2_ref, w3_ref, b3_ref, o_ref):
    """Fused Linear->ReLU->Linear->ReLU->Linear->Tanh on one VMEM batch tile.

    bf16 MXU inputs, f32 accumulation (preferred_element_type); element-wise
    math (bias add / ReLU / tanh) stays f32 (v5e has no bf16 VPU).  Activations
    are re-cast to bf16 between layers -- keep them f32 if bit-fidelity to the
    pure-f32 reference matters (the kernel is not VALU-bound).
    """
    x = x_ref[...]                                                     # bf16 (tile, 128)

    h1 = jnp.dot(x, w1_ref[...], preferred_element_type=jnp.float32) + b1_ref[...]
    h1 = jnp.maximum(h1, 0.0).astype(jnp.bfloat16)                     # ReLU

    h2 = jnp.dot(h1, w2_ref[...], preferred_element_type=jnp.float32) + b2_ref[...]
    h2 = jnp.maximum(h2, 0.0).astype(jnp.bfloat16)                     # ReLU

    h3 = jnp.dot(h2, w3_ref[...], preferred_element_type=jnp.float32) + b3_ref[...]
    o_ref[...] = jnp.tanh(h3).astype(o_ref.dtype)                      # Tanh


def stage_params(params):
    """One-time weight staging.  Call ONCE and reuse the result across calls.

    * weights cast to bf16 (native MXU input), stored (in_features, out_features)
    * w1 rows zero-padded 96 -> 128 (matches the K-padded x)
    * w3 / b3 columns zero-padded 784 -> 896 (lane-dense output)
    * biases stay f32 (added to the f32 accumulator)
    """
    w1 = jnp.zeros((K_PAD, HIDDEN), jnp.bfloat16)
    w1 = w1.at[:NOISE_DIM, :].set(params["w1"].astype(jnp.bfloat16))
    w2 = params["w2"].astype(jnp.bfloat16)
    w3 = jnp.zeros((HIDDEN, OUT_PAD), jnp.bfloat16)
    w3 = w3.at[:, :OUT_DIM].set(params["w3"].astype(jnp.bfloat16))
    b1 = params["b1"].reshape(1, HIDDEN).astype(jnp.float32)
    b2 = params["b2"].reshape(1, HIDDEN).astype(jnp.float32)
    b3 = jnp.zeros((1, OUT_PAD), jnp.float32)
    b3 = b3.at[:, :OUT_DIM].set(params["b3"].reshape(1, OUT_DIM).astype(jnp.float32))
    return (w1, b1, w2, b2, w3, b3)


def _pallas_forward(x_pad, staged, batch_tile, num_steps):
    w1, b1, w2, b2, w3, b3 = staged

    def weight_spec(shape):
        # Grid-invariant block (index_map always (0, 0)): one VMEM buffer is
        # enough; saves ~4 MiB of duplicated bf16 weight double-buffers.
        if _HAS_BUFFERED:
            return pl.BlockSpec(shape, lambda i: (0, 0), pipeline_mode=pl.Buffered(1))
        return pl.BlockSpec(shape, lambda i: (0, 0))

    return pl.pallas_call(
        generator_kernel,
        out_shape=jax.ShapeDtypeStruct((x_pad.shape[0], OUT_PAD), jnp.float32),
        grid_spec=pltpu.PrefetchScalarGridSpec(
            num_scalar_prefetch=0,
            grid=(num_steps,),
            in_specs=[
                pl.BlockSpec((batch_tile, K_PAD), lambda i: (i, 0)),   # x tile
                weight_spec((K_PAD, HIDDEN)),                          # w1 (K-padded)
                weight_spec((1, HIDDEN)),                              # b1
                weight_spec((HIDDEN, HIDDEN)),                         # w2
                weight_spec((1, HIDDEN)),                              # b2
                weight_spec((HIDDEN, OUT_PAD)),                        # w3 (N-padded)
                weight_spec((1, OUT_PAD)),                             # b3 (N-padded)
            ],
            out_specs=pl.BlockSpec((batch_tile, OUT_PAD), lambda i: (i, 0)),
        ),
        compiler_params=pltpu.CompilerParams(
            # Independent batch tiles -> shard the grid across v7x's two TensorCores.
            dimension_semantics=("parallel",),
            # Needed on v5e (16 MiB default scoped VMEM); leaves headroom on v7x (64 MiB).
            vmem_limit_bytes=32 << 20,
        ),
    )(x_pad, w1, b1, w2, b2, w3, b3)


def generator_forward(x, params, *, batch_tile=None):
    """x: (B, NOISE_DIM) float.  params: staged tuple from stage_params()
    (preferred -- stage once, reuse) or a raw dict of w1..b3 in (in, out) layout.
    Returns (B, OUT_DIM) float32, matching Generator.forward."""
    staged = stage_params(params) if isinstance(params, dict) else params
    B = x.shape[0]

    if batch_tile is None:
        if B <= _SINGLE_STEP_MAX_B:
            # Whole (small) batch in one grid step: everything VMEM-resident.
            batch_tile = _round_up(max(B, 16), 16)
        else:
            # >= 2 grid steps so both v7x TensorCores get work; 512-row tiles
            # for big batches amortize the ~0.35 us per-step overhead.
            batch_tile = min(_MAX_BATCH_TILE, _round_up(-(-B // 2), 128))
    else:
        # bf16 packs 16 rows per vreg -> keep tiles a multiple of 16.
        batch_tile = _round_up(max(batch_tile, 16), 16)

    b_pad = _round_up(B, batch_tile)
    num_steps = b_pad // batch_tile

    # Zero-pad batch rows to a tile multiple and noise columns 96 -> 128
    # (zeros in the padded K columns do not change the matmul result).
    x_pad = jnp.zeros((b_pad, K_PAD), jnp.bfloat16)
    x_pad = x_pad.at[:B, :NOISE_DIM].set(x.astype(jnp.bfloat16))

    out = _pallas_forward(x_pad, staged, batch_tile, num_steps)
    return out[:B, :OUT_DIM]


def init_params(key):
    """Deterministic init mimicking nn.Linear default: U(-1/sqrt(fan_in), 1/sqrt(fan_in)).
    Weights are stored (in_features, out_features) for x @ W."""
    ks = jax.random.split(key, 6)

    def linear(kw, kb, fan_in, fan_out):
        bound = 1.0 / jnp.sqrt(jnp.float32(fan_in))
        w = jax.random.uniform(kw, (fan_in, fan_out), jnp.float32, -bound, bound)
        b = jax.random.uniform(kb, (1, fan_out), jnp.float32, -bound, bound)
        return w, b

    w1, b1 = linear(ks[0], ks[1], NOISE_DIM, HIDDEN)
    w2, b2 = linear(ks[2], ks[3], HIDDEN, HIDDEN)
    w3, b3 = linear(ks[4], ks[5], HIDDEN, OUT_DIM)
    return {"w1": w1, "b1": b1, "w2": w2, "b2": b2, "w3": w3, "b3": b3}


def reference_forward(x, p):
    """Pure f32 reference matching the PyTorch module."""
    h1 = jnp.maximum(x @ p["w1"] + p["b1"], 0.0)
    h2 = jnp.maximum(h1 @ p["w2"] + p["b2"], 0.0)
    return jnp.tanh(h2 @ p["w3"] + p["b3"])


if __name__ == "__main__":
    key = jax.random.PRNGKey(0)
    k_params, k_x1, k_x2 = jax.random.split(key, 3)

    params = init_params(k_params)
    staged = stage_params(params)   # stage weights ONCE, reuse across calls

    # Path 1: small batch -> single grid step, everything VMEM-resident.
    B_small = 16
    x_small = jax.random.normal(k_x1, (B_small, NOISE_DIM), jnp.float32)
    out_small = jax.block_until_ready(generator_forward(x_small, staged))
    ref_small = reference_forward(x_small, params)
    assert out_small.shape == (B_small, OUT_DIM)
    # bf16 weights + bf16 inter-layer activations vs pure-f32 reference.
    assert jnp.allclose(out_small, ref_small, atol=4e-2, rtol=0.0), "small-batch mismatch"

    # Path 2: B >= 256 -> >= 2 grid steps (exercises megacore tiling + batch padding).
    B_big = 384
    x_big = jax.random.normal(k_x2, (B_big, NOISE_DIM), jnp.float32)
    out_big = jax.block_until_ready(generator_forward(x_big, staged))
    ref_big = reference_forward(x_big, params)
    assert out_big.shape == (B_big, OUT_DIM)
    assert jnp.allclose(out_big, ref_big, atol=4e-2, rtol=0.0), "large-batch mismatch"

    print("KERNEL_OK")
</pallas_src>

<mosaic_0001>
module attributes {stable_mosaic.version = 11 : i64} {
  func.func @generator_kernel(%arg0: i32, %arg1: memref<16x128xbf16, #tpu.memory_space<vmem>>, %arg2: memref<128x1024xbf16, #tpu.memory_space<vmem>>, %arg3: memref<1x1024xf32, #tpu.memory_space<vmem>>, %arg4: memref<1024x1024xbf16, #tpu.memory_space<vmem>>, %arg5: memref<1x1024xf32, #tpu.memory_space<vmem>>, %arg6: memref<1024x896xbf16, #tpu.memory_space<vmem>>, %arg7: memref<1x896xf32, #tpu.memory_space<vmem>>, %arg8: memref<16x896xf32, #tpu.memory_space<vmem>>) attributes {dimension_semantics = [#tpu.dimension_semantics<parallel>], iteration_bounds = array<i64: 1>, scalar_prefetch = 0 : i64, scratch_operands = 0 : i64, tpu.core_type = #tpu.core_type<tc>, window_params = [{transform_indices = @transform_0, window_bounds = array<i64: 16, 128>}, {pipeline_mode = #tpu.pipeline_mode<synchronous>, transform_indices = @transform_1, window_bounds = array<i64: 128, 1024>}, {pipeline_mode = #tpu.pipeline_mode<synchronous>, transform_indices = @transform_2, window_bounds = array<i64: 1, 1024>}, {pipeline_mode = #tpu.pipeline_mode<synchronous>, transform_indices = @transform_3, window_bounds = array<i64: 1024, 1024>}, {pipeline_mode = #tpu.pipeline_mode<synchronous>, transform_indices = @transform_4, window_bounds = array<i64: 1, 1024>}, {pipeline_mode = #tpu.pipeline_mode<synchronous>, transform_indices = @transform_5, window_bounds = array<i64: 1024, 896>}, {pipeline_mode = #tpu.pipeline_mode<synchronous>, transform_indices = @transform_6, window_bounds = array<i64: 1, 896>}, {transform_indices = @transform_7, window_bounds = array<i64: 16, 896>}]} {
    %c0 = arith.constant 0 : index
    %c0_0 = arith.constant 0 : index
    %0 = vector.load %arg1[%c0, %c0_0] : memref<16x128xbf16, #tpu.memory_space<vmem>>, vector<16x128xbf16>
    %c0_1 = arith.constant 0 : index
    %c0_2 = arith.constant 0 : index
    %1 = vector.load %arg2[%c0_1, %c0_2] : memref<128x1024xbf16, #tpu.memory_space<vmem>>, vector<128x1024xbf16>
    %cst = arith.constant dense<0.000000e+00> : vector<16x1024xf32>
    %2 = tpu.matmul %0, %1, %cst {dimension_numbers = #tpu.dot_dimension_numbers<[1], [0], [0], [1], [0, 0, 1, 1], [], []>} : vector<16x128xbf16>, vector<128x1024xbf16>, vector<16x1024xf32> -> vector<16x1024xf32>
    %c0_3 = arith.constant 0 : index
    %c0_4 = arith.constant 0 : index
    %3 = vector.load %arg3[%c0_3, %c0_4] : memref<1x1024xf32, #tpu.memory_space<vmem>>, vector<1x1024xf32>
    %4 = vector.broadcast %3 : vector<1x1024xf32> to vector<16x1024xf32>
    %5 = arith.addf %2, %4 : vector<16x1024xf32>
    %cst_5 = arith.constant 0.000000e+00 : f32
    %6 = vector.broadcast %cst_5 : f32 to vector<16x1024xf32>
    %7 = arith.maximumf %5, %6 : vector<16x1024xf32>
    %8 = arith.truncf %7 : vector<16x1024xf32> to vector<16x1024xbf16>
    %c0_6 = arith.constant 0 : index
    %c0_7 = arith.constant 0 : index
    %9 = vector.load %arg4[%c0_6, %c0_7] : memref<1024x1024xbf16, #tpu.memory_space<vmem>>, vector<1024x1024xbf16>
    %cst_8 = arith.constant dense<0.000000e+00> : vector<16x1024xf32>
    %10 = tpu.matmul %8, %9, %cst_8 {dimension_numbers = #tpu.dot_dimension_numbers<[1], [0], [0], [1], [0, 0, 1, 1], [], []>} : vector<16x1024xbf16>, vector<1024x1024xbf16>, vector<16x1024xf32> -> vector<16x1024xf32>
    %c0_9 = arith.constant 0 : index
    %c0_10 = arith.constant 0 : index
    %11 = vector.load %arg5[%c0_9, %c0_10] : memref<1x1024xf32, #tpu.memory_space<vmem>>, vector<1x1024xf32>
    %12 = vector.broadcast %11 : vector<1x1024xf32> to vector<16x1024xf32>
    %13 = arith.addf %10, %12 : vector<16x1024xf32>
    %cst_11 = arith.constant 0.000000e+00 : f32
    %14 = vector.broadcast %cst_11 : f32 to vector<16x1024xf32>
    %15 = arith.maximumf %13, %14 : vector<16x1024xf32>
    %16 = arith.truncf %15 : vector<16x1024xf32> to vector<16x1024xbf16>
    %c0_12 = arith.constant 0 : index
    %c0_13 = arith.constant 0 : index
    %17 = vector.load %arg6[%c0_12, %c0_13] : memref<1024x896xbf16, #tpu.memory_space<vmem>>, vector<1024x896xbf16>
    %cst_14 = arith.constant dense<0.000000e+00> : vector<16x896xf32>
    %18 = tpu.matmul %16, %17, %cst_14 {dimension_numbers = #tpu.dot_dimension_numbers<[1], [0], [0], [1], [0, 0, 1, 1], [], []>} : vector<16x1024xbf16>, vector<1024x896xbf16>, vector<16x896xf32> -> vector<16x896xf32>
    %c0_15 = arith.constant 0 : index
    %c0_16 = arith.constant 0 : index
    %19 = vector.load %arg7[%c0_15, %c0_16] : memref<1x896xf32, #tpu.memory_space<vmem>>, vector<1x896xf32>
    %20 = vector.broadcast %19 : vector<1x896xf32> to vector<16x896xf32>
    %21 = arith.addf %18, %20 : vector<16x896xf32>
    %22 = math.tanh %21 : vector<16x896xf32>
    %c0_17 = arith.constant 0 : index
    %c0_18 = arith.constant 0 : index
    %23 = vector.load %arg8[%c0_17, %c0_18] : memref<16x896xf32, #tpu.memory_space<vmem>>, vector<16x896xf32>
    tpu.vector_store %arg8[%c0_17, %c0_18], %22 {strides = array<i32>} : memref<16x896xf32, #tpu.memory_space<vmem>>, vector<16x896xf32>,
    return
  }
  func.func @transform_0(%arg0: i32) -> (i32, i32) {
    %c0_i32 = arith.constant 0 : i32
    %c0_i32_0 = arith.constant 0 : i32
    return %arg0, %c0_i32 : i32, i32
  }
  func.func @transform_1(%arg0: i32) -> (i32, i32) {
    %c0_i32 = arith.constant 0 : i32
    %c0_i32_0 = arith.constant 0 : i32
    %c0_i32_1 = arith.constant 0 : i32
    return %c0_i32, %c0_i32_0 : i32, i32
  }
  func.func @transform_2(%arg0: i32) -> (i32, i32) {
    %c0_i32 = arith.constant 0 : i32
    %c0_i32_0 = arith.constant 0 : i32
    %c0_i32_1 = arith.constant 0 : i32
    return %c0_i32, %c0_i32_0 : i32, i32
  }
  func.func @transform_3(%arg0: i32) -> (i32, i32) {
    %c0_i32 = arith.constant 0 : i32
    %c0_i32_0 = arith.constant 0 : i32
    %c0_i32_1 = arith.constant 0 : i32
    return %c0_i32, %c0_i32_0 : i32, i32
  }
  func.func @transform_4(%arg0: i32) -> (i32, i32) {
    %c0_i32 = arith.constant 0 : i32
    %c0_i32_0 = arith.constant 0 : i32
    %c0_i32_1 = arith.constant 0 : i32
    return %c0_i32, %c0_i32_0 : i32, i32
  }
  func.func @transform_5(%arg0: i32) -> (i32, i32) {
    %c0_i32 = arith.constant 0 : i32
    %c0_i32_0 = arith.constant 0 : i32
    %c0_i32_1 = arith.constant 0 : i32
    return %c0_i32, %c0_i32_0 : i32, i32
  }
  func.func @transform_6(%arg0: i32) -> (i32, i32) {
    %c0_i32 = arith.constant 0 : i32
    %c0_i32_0 = arith.constant 0 : i32
    %c0_i32_1 = arith.constant 0 : i32
    return %c0_i32, %c0_i32_0 : i32, i32
  }
  func.func @transform_7(%arg0: i32) -> (i32, i32) {
    %c0_i32 = arith.constant 0 : i32
    %c0_i32_0 = arith.constant 0 : i32
    return %arg0, %c0_i32 : i32, i32
  }
}

</mosaic_0001>

<bundles_post_ra>
// kernel: tpu_custom_call.1
= control target key start
LH: loop header
LB: loop body
LE: loop exit
PB: predicated region body
PF: predicated region fallthrough
CT: control target
= control target key end

     0   :  { %12 = vsyncpa [#allocation3], 0  ;;  %s10615_s0 = inlined_call_operand.hbm [shape: bf16[16,128], index: 0, kind: input, shape index: {}]   ;;  %s10616_s1 = inlined_call_operand.hbm [shape: bf16[128,1024], index: 1, kind: input, shape index: {}]   ;;  %s10617_s2 = inlined_call_operand.hbm [shape: f32[1,1024], index: 2, kind: input, shape index: {}]   ;;  %s10618_s3 = inlined_call_operand.hbm [shape: bf16[1024,1024], index: 3, kind: input, shape index: {}]   ;;  %s10619_s4 = inlined_call_operand.hbm [shape: f32[1,1024], index: 4, kind: input, shape index: {}]   ;;  %s10620_s5 = inlined_call_operand.hbm [shape: bf16[1024,896], index: 5, kind: input, shape index: {}]   ;;  %s10621_s6 = inlined_call_operand.hbm [shape: f32[1,896], index: 6, kind: input, shape index: {}]   ;;  %s10622_s7 = inlined_call_operand.hbm [shape: f32[16,896], index: 7, kind: output, shape index: {}]  }
   0x1   :  { %13 = vsyncpa [#allocation6], 0 }
   0x2   :  { %14 = vsyncpa [#allocation9], 0 }
   0x3   :  { %15 = vsyncpa [#allocation12], 0 }
   0x4   :  { %16 = vsyncpa [#allocation4], 0  ;;  %s10252_s24 = smov [#allocation5]   ;;  %s10066_s28 = scalar_lea.hbm %s10616_s1, 8192 }
   0x5   :  { %s34_s25 = sshll.u32 %s10252_s24, 4  ;;  %p10067_p0 = scmp.ne.s32.totalorder %s10616_s1, %s10066_s28  ;;  %s35_s25 = int_to_ptr.vmem [resolvable:$true] %s34_s25 }
   0x6   :  { %p10070_p1 = scmp.lt.u32.totalorder %s10066_s28, %s10616_s1 }
   0x8   :  { %p10072_p2 = pnand %p10070_p1, %p10067_p0 }
   0xa   :  { %10075 = shalt.err (!%p10072_p2)
}
   0xb   :  { %s10076_s10 = scalar_lea.vmem %s35_s25, 8192  ;;  %p10081_p4 = scmp.lt.s32.totalorder %s35_s25, %s35_s25 }
   0xc   :  { %p10077_p3 = scmp.ne.s32.totalorder %s35_s25, %s10076_s10  ;;  %p10082_p5 = scmp.lt.s32.totalorder %s10076_s10, %s10076_s10 }
   0xe   :  { %p10083_p6 = por %p10082_p5, %p10081_p4 }
  0x10   :  { %p10084_p7 = pnand %p10083_p6, %p10077_p3 }
  0x12   :  { %10087 = shalt.err (!%p10084_p7)
}
  0x13   :  { %s10253_s11 = smov 512   ;;  %s10254_s12 = smov 32  }
  0x14   :  { %40 = dma.hbm_to_vmem [thread:$0]  %s10616_s1, 8192, %s35_s25, [#allocation6], %s10253_s11, %s10253_s11, %s10254_s12  }
  0x15   :  { %s10255_s15 = smov [#allocation8]   ;;  %s10256_s17 = smov [#allocation11]  }
  0x16   :  { %s56_s16 = sshll.u32 %s10255_s15, 4  ;;  %s78_s18 = sshll.u32 %s10256_s17, 4  ;;  %s57_s16 = int_to_ptr.vmem [resolvable:$true] %s56_s16  ;;  %s79_s18 = int_to_ptr.vmem [resolvable:$true] %s78_s18 }
  0x17   :  { %s10088_s21 = scalar_lea.hbm %s10618_s3, 65536 }
  0x18   :  { %p10089_p8 = scmp.ne.s32.totalorder %s10618_s3, %s10088_s21  ;;  %p10092_p9 = scmp.lt.u32.totalorder %s10088_s21, %s10618_s3 }
  0x1a   :  { %p10094_p10 = pnand %p10092_p9, %p10089_p8 }
  0x1c   :  { %10097 = shalt.err (!%p10094_p10)
}
  0x1d   :  { %s10098_s1 = scalar_lea.vmem %s57_s16, 65536  ;;  %p10103_p12 = scmp.lt.s32.totalorder %s57_s16, %s57_s16 }
  0x1e   :  { %p10099_p11 = scmp.ne.s32.totalorder %s57_s16, %s10098_s1  ;;  %p10104_p13 = scmp.lt.s32.totalorder %s10098_s1, %s10098_s1 }
  0x20   :  { %p10105_p0 = por %p10104_p13, %p10103_p12 }
  0x22   :  { %p10106_p1 = pnand %p10105_p0, %p10099_p11 }
  0x24   :  { %10109 = shalt.err (!%p10106_p1)
}
  0x25   :  { %62 = dma.hbm_to_vmem [thread:$0]  %s10618_s3, 65536, %s57_s16, [#allocation9], %s10253_s11, %s10253_s11, %s10254_s12  }
  0x26   :  { %s10110_s30 = scalar_lea.hbm %s10620_s5, 57344 }
  0x27   :  { %p10111_p2 = scmp.ne.s32.totalorder %s10620_s5, %s10110_s30  ;;  %p10114_p3 = scmp.lt.u32.totalorder %s10110_s30, %s10620_s5 }
  0x29   :  { %p10116_p4 = pnand %p10114_p3, %p10111_p2 }
  0x2b   :  { %10119 = shalt.err (!%p10116_p4)
}
  0x2c   :  { %s10120_s14 = scalar_lea.vmem %s79_s18, 57344  ;;  %p10125_p6 = scmp.lt.s32.totalorder %s79_s18, %s79_s18 }
  0x2d   :  { %p10121_p5 = scmp.ne.s32.totalorder %s79_s18, %s10120_s14  ;;  %p10126_p7 = scmp.lt.s32.totalorder %s10120_s14, %s10120_s14 }
  0x2f   :  { %p10127_p8 = por %p10126_p7, %p10125_p6 }
  0x31   :  { %p10128_p9 = pnand %p10127_p8, %p10121_p5 }
  0x33   :  { %10131 = shalt.err (!%p10128_p9)
}
  0x34   :  { %s10257_s3 = smov 448   ;;  %s10258_s11 = smov 28  }
  0x35   :  { %84 = dma.hbm_to_vmem [thread:$0]  %s10620_s5, 57344, %s79_s18, [#allocation12], %s10257_s3, %s10257_s3, %s10258_s11  }
  0x36   :  { %s10259_s16 = smov [#allocation2]   ;;  %s10132_s21 = scalar_lea.hbm %s10615_s0, 128 }
  0x37   :  { %s22_s17 = sshll.u32 %s10259_s16, 4  ;;  %p10133_p10 = scmp.ne.s32.totalorder %s10615_s0, %s10132_s21  ;;  %s23_s17 = int_to_ptr.vmem [resolvable:$true] %s22_s17 }
  0x38   :  { %p10136_p11 = scmp.lt.u32.totalorder %s10132_s21, %s10615_s0 }
  0x3a   :  { %p10138_p12 = pnand %p10136_p11, %p10133_p10 }
  0x3c   :  { %10141 = shalt.err (!%p10138_p12)
}
  0x3d   :  { %s10142_s1 = scalar_lea.vmem %s23_s17, 128  ;;  %p10147_p0 = scmp.lt.s32.totalorder %s23_s17, %s23_s17 }
  0x3e   :  { %p10143_p13 = scmp.ne.s32.totalorder %s23_s17, %s10142_s1  ;;  %p10148_p1 = scmp.lt.s32.totalorder %s10142_s1, %s10142_s1 }
  0x40   :  { %p10149_p2 = por %p10148_p1, %p10147_p0 }
  0x42   :  { %p10150_p3 = pnand %p10149_p2, %p10143_p13 }
  0x44   :  { %10153 = shalt.err (!%p10150_p3)
}
  0x45   :  { %s10260_s5 = smov 64   ;;  %s10261_s18 = smov 4  }
  0x46   :  { %28 = dma.hbm_to_vmem [thread:$0]  %s10615_s0, 128, %s23_s17, [#allocation3], %s10260_s5, %s10260_s5, %s10261_s18  }
  0x47   :  { %s10262_s28 = smov [#allocation7]   ;;  %s10263_s30 = smov [#allocation10]  }
  0x48   :  { %s47_s29 = sshll.u32 %s10262_s28, 4  ;;  %s69_s8 = sshll.u32 %s10263_s30, 4  ;;  %s48_s29 = int_to_ptr.vmem [resolvable:$true] %s47_s29  ;;  %s70_s8 = int_to_ptr.vmem [resolvable:$true] %s69_s8 }
  0x49   :  { %s10154_s13 = scalar_lea.hbm %s10617_s2, 128 }
  0x4a   :  { %p10155_p4 = scmp.ne.s32.totalorder %s10617_s2, %s10154_s13  ;;  %p10158_p5 = scmp.lt.u32.totalorder %s10154_s13, %s10617_s2 }
  0x4c   :  { %p10160_p6 = pnand %p10158_p5, %p10155_p4 }
  0x4e   :  { %10163 = shalt.err (!%p10160_p6)
}
  0x4f   :  { %s10164_s0 = scalar_lea.vmem %s48_s29, 128  ;;  %p10169_p8 = scmp.lt.s32.totalorder %s48_s29, %s48_s29 }
  0x50   :  { %p10165_p7 = scmp.ne.s32.totalorder %s48_s29, %s10164_s0  ;;  %p10170_p9 = scmp.lt.s32.totalorder %s10164_s0, %s10164_s0 }
  0x52   :  { %p10171_p10 = por %p10170_p9, %p10169_p8 }
  0x54   :  { %p10172_p11 = pnand %p10171_p10, %p10165_p7 }
  0x56   :  { %10175 = shalt.err (!%p10172_p11)
}
  0x57   :  { %50 = dma.hbm_to_vmem [thread:$0]  %s10617_s2, 128, %s48_s29, [#allocation6]  }
  0x58   :  { %s10176_s20 = scalar_lea.hbm %s10619_s4, 128 }
  0x59   :  { %p10177_p12 = scmp.ne.s32.totalorder %s10619_s4, %s10176_s20  ;;  %p10180_p13 = scmp.lt.u32.totalorder %s10176_s20, %s10619_s4 }
  0x5b   :  { %p10182_p0 = pnand %p10180_p13, %p10177_p12 }
  0x5d   :  { %10185 = shalt.err (!%p10182_p0)
}
  0x5e   :  { %s10186_s26 = scalar_lea.vmem %s70_s8, 128  ;;  %p10191_p2 = scmp.lt.s32.totalorder %s70_s8, %s70_s8 }
  0x5f   :  { %p10187_p1 = scmp.ne.s32.totalorder %s70_s8, %s10186_s26  ;;  %p10192_p3 = scmp.lt.s32.totalorder %s10186_s26, %s10186_s26 }
  0x61   :  { %p10193_p4 = por %p10192_p3, %p10191_p2 }
  0x63   :  { %p10194_p5 = pnand %p10193_p4, %p10187_p1 }
  0x65   :  { %10197 = shalt.err (!%p10194_p5)
}
  0x66   :  { %72 = dma.hbm_to_vmem [thread:$0]  %s10619_s4, 128, %s70_s8, [#allocation9]  }
  0x67   :  { %s10264_s5 = smov [#allocation13]   ;;  %s10198_s28 = scalar_lea.hbm %s10621_s6, 112 }
  0x68   :  { %s91_s18 = sshll.u32 %s10264_s5, 4  ;;  %p10199_p6 = scmp.ne.s32.totalorder %s10621_s6, %s10198_s28  ;;  %s92_s18 = int_to_ptr.vmem [resolvable:$true] %s91_s18 }
  0x69   :  { %p10202_p7 = scmp.lt.u32.totalorder %s10198_s28, %s10621_s6 }
  0x6b   :  { %p10204_p8 = pnand %p10202_p7, %p10199_p6 }
  0x6d   :  { %10207 = shalt.err (!%p10204_p8)
}
  0x6e   :  { %s10208_s13 = scalar_lea.vmem %s92_s18, 112  ;;  %s10212_s4 = scalar_lea.vmem %s92_s18, 128 }
  0x6f   :  { %p10209_p9 = scmp.ne.s32.totalorder %s92_s18, %s10208_s13  ;;  %p10213_p10 = scmp.lt.s32.totalorder %s92_s18, %s92_s18 }
  0x70   :  { %p10214_p11 = scmp.lt.s32.totalorder %s10212_s4, %s10208_s13 }
  0x72   :  { %p10215_p12 = por %p10214_p11, %p10213_p10 }
  0x74   :  { %p10216_p13 = pnand %p10215_p12, %p10209_p9 }
  0x76   :  { %10219 = shalt.err (!%p10216_p13)
}
  0x77   :  { %94 = dma.hbm_to_vmem [thread:$0]  %s10621_s6, 112, %s92_s18, [#allocation12]  }
  0x78   :  { %10242 = dma.done.wait [#allocation3], 128  }
  0x79   :  { %10243 = vsyncadd [#allocation3], 4294967168 }
  0x7a   :  { %10244 = dma.done.wait [#allocation6], 8320  }
  0x7b   :  { %10245 = vsyncadd [#allocation6], 4294958976 }
  0x7c   :  { %10246 = dma.done.wait [#allocation9], 65664  }
  0x7d   :  { %10247 = vsyncadd [#allocation9], 4294901632 }
  0x7e   :  { %10248 = dma.done.wait [#allocation12], 57456  }
  0x7f   :  { %10249 = vsyncadd [#allocation12], 4294909840  ;;  %v10265_v0 = vmov 0   ;;  %v119_v1 = vld [vmem:[#allocation5] sm:$0xff]  ;;  %v120_v3 = vld [vmem:[#allocation5 + $0x8] sm:$0xff]  ;;  %s10266_s6 = smov [#allocation14]  }
  0x80   :  { %583 = vmatprep.mubr.bf16.mxu0 %v10265_v0  ;;  %626 = vmatprep.mubr.bf16.mxu1 %v10265_v0  ;;  %v123_v2 = vld [vmem:[#allocation5 + $0x20] sm:$0xff]  ;;  %v124_v5 = vld [vmem:[#allocation5 + $0x28] sm:$0xff]  ;;  %v121_v63 = vld [vmem:[#allocation5 + $0x10] sm:$0xff]  ;;  %s8139_s3 = sshll.u32 %s10266_s6, 4  ;;  %s8140_s3 = int_to_ptr.vmem [resolvable:$true] %s8139_s3 }
  0x81   :  { %v8156_v4 = vcombine.high %v119_v1, %v123_v2  ;;  %v8155_v6 = vcombine.low %v119_v1, %v123_v2  ;;  %v127_v7 = vld [vmem:[#allocation5 + $0x40] sm:$0xff]  ;;  %v8158_v9 = vcombine.high %v120_v3, %v124_v5  ;;  %v8157_v10 = vcombine.low %v120_v3, %v124_v5  ;;  %v128_v12 = vld [vmem:[#allocation5 + $0x48] sm:$0xff]  ;;  %v125_v1 = vld [vmem:[#allocation5 + $0x30] sm:$0xff]  ;;  %s10220_s11 = scalar_lea.vmem %s8140_s3, 1792  ;;  %p10225_p1 = scmp.lt.s32.totalorder %s8140_s3, %s8140_s3 }
  0x82   :  { %v131_v8 = vld [vmem:[#allocation5 + $0x60] sm:$0xff]  ;;  %v132_v13 = vld [vmem:[#allocation5 + $0x68] sm:$0xff]  ;;  %v122_v2 = vld [vmem:[#allocation5 + $0x18] sm:$0xff]  ;;  %p10221_p0 = scmp.ne.s32.totalorder %s8140_s3, %s10220_s11  ;;  %p10226_p2 = scmp.lt.s32.totalorder %s10220_s11, %s10220_s11 }
  0x83   :  { %v8164_v11 = vcombine.high %v127_v7, %v131_v8  ;;  %v135_v14 = vld [vmem:[#allocation5 + $0x80] sm:$0xff]  ;;  %551 = vmatprep.subr.bf16.mxu0 %v8156_v4  ;;  %v8166_v15 = vcombine.high %v128_v12, %v132_v13  ;;  %v136_v17 = vld [vmem:[#allocation5 + $0x88] sm:$0xff]  ;;  %594 = vmatprep.subr.bf16.mxu1 %v8158_v9  ;;  %v8163_v19 = vcombine.low %v127_v7, %v131_v8  ;;  %v126_v3 = vld [vmem:[#allocation5 + $0x38] sm:$0xff] }
  0x84   :  { %v139_v16 = vld [vmem:[#allocation5 + $0xa0] sm:$0xff]  ;;  %v140_v18 = vld [vmem:[#allocation5 + $0xa8] sm:$0xff]  ;;  %552 = vmatpush1.bf16.msra.mxu0 %v8155_v6  ;;  %595 = vmatpush1.bf16.msra.mxu1 %v8157_v10  ;;  %v8165_v20 = vcombine.low %v128_v12, %v132_v13  ;;  %v8160_v6 = vcombine.high %v121_v63, %v125_v1  ;;  %v129_v7 = vld [vmem:[#allocation5 + $0x50] sm:$0xff]  ;;  %v8162_v9 = vcombine.high %v122_v2, %v126_v3  ;;  %p10227_p3 = por %p10226_p2, %p10225_p1 }
  0x85   :  { %553 = vmatprep.subr.bf16.mxu0 %v8164_v11  ;;  %v8172_v21 = vcombine.high %v135_v14, %v139_v16  ;;  %596 = vmatprep.subr.bf16.mxu1 %v8166_v15  ;;  %v8174_v22 = vcombine.high %v136_v17, %v140_v18  ;;  %v143_v23 = vld [vmem:[#allocation5 + $0xc0] sm:$0xff]  ;;  %v144_v25 = vld [vmem:[#allocation5 + $0xc8] sm:$0xff]  ;;  %v8171_v27 = vcombine.low %v135_v14, %v139_v16  ;;  %v133_v8 = vld [vmem:[#allocation5 + $0x70] sm:$0xff] }
  0x86   :  { %v147_v24 = vld [vmem:[#allocation5 + $0xe0] sm:$0xff]  ;;  %v148_v26 = vld [vmem:[#allocation5 + $0xe8] sm:$0xff]  ;;  %v8173_v28 = vcombine.low %v136_v17, %v140_v18  ;;  %v10395_v10 = vld [vmem:[#allocation2] sm:$0xff]   ;;  %v8159_v11 = vcombine.low %v121_v63, %v125_v1  ;;  %v8168_v14 = vcombine.high %v129_v7, %v133_v8  ;;  %v8161_v17 = vcombine.low %v122_v2, %v126_v3  ;;  %p10228_p4 = pnand %p10227_p3, %p10221_p0 }
  0x87   :  { %v8180_v29 = vcombine.high %v143_v23, %v147_v24  ;;  %v8182_v30 = vcombine.high %v144_v25, %v148_v26  ;;  %v151_v31 = vld [vmem:[#allocation5 + $0x100] sm:$0xff]  ;;  %v152_v33 = vld [vmem:[#allocation5 + $0x108] sm:$0xff]  ;;  %v8179_v35 = vcombine.low %v143_v23, %v147_v24  ;;  %v8181_v36 = vcombine.low %v144_v25, %v148_v26  ;;  %v130_v12 = vld [vmem:[#allocation5 + $0x58] sm:$0xff] }
  0x88   :  { %554 = vmatpush1.bf16.msra.mxu0 %v8163_v19  ;;  %597 = vmatpush1.bf16.msra.mxu1 %v8165_v20  ;;  %v155_v32 = vld [vmem:[#allocation5 + $0x120] sm:$0xff]  ;;  %v156_v34 = vld [vmem:[#allocation5 + $0x128] sm:$0xff]  ;;  %v134_v13 = vld [vmem:[#allocation5 + $0x78] sm:$0xff]  ;;  %v8167_v19 = vcombine.low %v129_v7, %v133_v8 }
  0x89   :  { %555 = vmatprep.subr.bf16.mxu0 %v8172_v21  ;;  %598 = vmatprep.subr.bf16.mxu1 %v8174_v22  ;;  %v8188_v37 = vcombine.high %v151_v31, %v155_v32  ;;  %v8190_v38 = vcombine.high %v152_v33, %v156_v34  ;;  %v159_v39 = vld [vmem:[#allocation5 + $0x140] sm:$0xff]  ;;  %v160_v41 = vld [vmem:[#allocation5 + $0x148] sm:$0xff]  ;;  %v8187_v43 = vcombine.low %v151_v31, %v155_v32  ;;  %v137_v15 = vld [vmem:[#allocation5 + $0x90] sm:$0xff] }
  0x8a   :  { %v163_v40 = vld [vmem:[#allocation5 + $0x160] sm:$0xff]  ;;  %v164_v42 = vld [vmem:[#allocation5 + $0x168] sm:$0xff]  ;;  %v8189_v44 = vcombine.low %v152_v33, %v156_v34  ;;  %v141_v16 = vld [vmem:[#allocation5 + $0xb0] sm:$0xff]  ;;  %v8170_v18 = vcombine.high %v130_v12, %v134_v13  ;;  %v8169_v25 = vcombine.low %v130_v12, %v134_v13 }
  0x8b   :  { %v8196_v45 = vcombine.high %v159_v39, %v163_v40  ;;  %v8198_v46 = vcombine.high %v160_v41, %v164_v42  ;;  %v167_v47 = vld [vmem:[#allocation5 + $0x180] sm:$0xff]  ;;  %v168_v49 = vld [vmem:[#allocation5 + $0x188] sm:$0xff]  ;;  %v8195_v51 = vcombine.low %v159_v39, %v163_v40  ;;  %v8197_v52 = vcombine.low %v160_v41, %v164_v42  ;;  %v138_v20 = vld [vmem:[#allocation5 + $0x98] sm:$0xff] }
  0x8c   :  { %556 = vmatpush1.bf16.msra.mxu0 %v8171_v27  ;;  %599 = vmatpush1.bf16.msra.mxu1 %v8173_v28  ;;  %v171_v48 = vld [vmem:[#allocation5 + $0x1a0] sm:$0xff]  ;;  %v172_v50 = vld [vmem:[#allocation5 + $0x1a8] sm:$0xff]  ;;  %v142_v21 = vld [vmem:[#allocation5 + $0xb8] sm:$0xff]  ;;  %v8176_v22 = vcombine.high %v137_v15, %v141_v16  ;;  %v8175_v27 = vcombine.low %v137_v15, %v141_v16 }
  0x8d   :  { %557 = vmatprep.subr.bf16.mxu0 %v8180_v29  ;;  %600 = vmatprep.subr.bf16.mxu1 %v8182_v30  ;;  %v8204_v53 = vcombine.high %v167_v47, %v171_v48  ;;  %v8206_v54 = vcombine.high %v168_v49, %v172_v50  ;;  %v175_v55 = vld [vmem:[#allocation5 + $0x1c0] sm:$0xff]  ;;  %v176_v57 = vld [vmem:[#allocation5 + $0x1c8] sm:$0xff]  ;;  %v8203_v59 = vcombine.low %v167_v47, %v171_v48  ;;  %v145_v23 = vld [vmem:[#allocation5 + $0xd0] sm:$0xff] }
  0x8e   :  { %v179_v56 = vld [vmem:[#allocation5 + $0x1e0] sm:$0xff]  ;;  %v180_v58 = vld [vmem:[#allocation5 + $0x1e8] sm:$0xff]  ;;  %v8205_v60 = vcombine.low %v168_v49, %v172_v50  ;;  %v149_v24 = vld [vmem:[#allocation5 + $0xf0] sm:$0xff]  ;;  %v8178_v26 = vcombine.high %v138_v20, %v142_v21  ;;  %v8177_v33 = vcombine.low %v138_v20, %v142_v21 }
  0x8f   :  { %v8212_v61 = vcombine.high %v175_v55, %v179_v56  ;;  %v8214_v62 = vcombine.high %v176_v57, %v180_v58  ;;  %v8211_v4 = vcombine.low %v175_v55, %v179_v56  ;;  %v8213_v5 = vcombine.low %v176_v57, %v180_v58  ;;  %v153_v28 = vld [vmem:[#allocation5 + $0x110] sm:$0xff]  ;;  %v146_v29 = vld [vmem:[#allocation5 + $0xd8] sm:$0xff]  ;;  %v747_v2 = vld [vmem:[#allocation8] sm:$0xff] }
  0x90   :  { %558 = vmatpush1.bf16.msra.mxu0 %v8179_v35  ;;  %601 = vmatpush1.bf16.msra.mxu1 %v8181_v36  ;;  %v150_v30 = vld [vmem:[#allocation5 + $0xf8] sm:$0xff]  ;;  %v8184_v31 = vcombine.high %v145_v23, %v149_v24  ;;  %v157_v32 = vld [vmem:[#allocation5 + $0x130] sm:$0xff]  ;;  %v751_v3 = vld [vmem:[#allocation8 + $0x20] sm:$0xff] }
  0x91   :  { %559 = vmatprep.subr.bf16.mxu0 %v8188_v37  ;;  %602 = vmatprep.subr.bf16.mxu1 %v8190_v38  ;;  %v154_v34 = vld [vmem:[#allocation5 + $0x118] sm:$0xff]  ;;  %v8186_v36 = vcombine.high %v146_v29, %v150_v30  ;;  %v8183_v37 = vcombine.low %v145_v23, %v149_v24  ;;  %v161_v38 = vld [vmem:[#allocation5 + $0x150] sm:$0xff]  ;;  %v8192_v39 = vcombine.high %v153_v28, %v157_v32  ;;  %v887_v7 = vld [vmem:[#allocation8 + $0x460] sm:$0xff] }
  0x92   :  { %v158_v35 = vld [vmem:[#allocation5 + $0x138] sm:$0xff]  ;;  %v8185_v40 = vcombine.low %v146_v29, %v150_v30  ;;  %v759_v12 = vld [vmem:[#allocation8 + $0x60] sm:$0xff]  ;;  %v8220_v13 = vcombine.high %v747_v2, %v751_v3 }
  0x93   :  { %v162_v41 = vld [vmem:[#allocation5 + $0x158] sm:$0xff]  ;;  %v8193_v48 = vcombine.low %v154_v34, %v158_v35  ;;  %v891_v15 = vld [vmem:[#allocation8 + $0x480] sm:$0xff] }
  0x94   :  { %560 = vmatpush1.bf16.msra.mxu0 %v8187_v43  ;;  %603 = vmatpush1.bf16.msra.mxu1 %v8189_v44  ;;  %v166_v42 = vld [vmem:[#allocation5 + $0x178] sm:$0xff]  ;;  %v8194_v43 = vcombine.high %v154_v34, %v158_v35  ;;  %v8191_v44 = vcombine.low %v153_v28, %v157_v32  ;;  %v895_v16 = vld [vmem:[#allocation8 + $0x4a0] sm:$0xff] }
  0x95   :  { %561 = vmatprep.subr.bf16.mxu0 %v8196_v45  ;;  %604 = vmatprep.subr.bf16.mxu1 %v8198_v46  ;;  %v169_v45 = vld [vmem:[#allocation5 + $0x190] sm:$0xff]  ;;  %v170_v49 = vld [vmem:[#allocation5 + $0x198] sm:$0xff]  ;;  %v8201_v56 = vcombine.low %v162_v41, %v166_v42  ;;  %v767_v20 = vld [vmem:[#allocation8 + $0xa0] sm:$0xff]  ;;  %v8363_v30 = vcombine.low %v891_v15, %v895_v16 }
  0x96   :  { %v173_v46 = vld [vmem:[#allocation5 + $0x1b0] sm:$0xff]  ;;  %v174_v50 = vld [vmem:[#allocation5 + $0x1b8] sm:$0xff]  ;;  %v899_v23 = vld [vmem:[#allocation8 + $0x4c0] sm:$0xff] }
  0x97   :  { %v8208_v55 = vcombine.high %v169_v45, %v173_v46  ;;  %v178_v57 = vld [vmem:[#allocation5 + $0x1d8] sm:$0xff]  ;;  %v8209_v1 = vcombine.low %v170_v49, %v174_v50  ;;  %v903_v24 = vld [vmem:[#allocation8 + $0x4e0] sm:$0xff] }
  0x98   :  { %562 = vmatpush1.bf16.msra.mxu0 %v8195_v51  ;;  %605 = vmatpush1.bf16.msra.mxu1 %v8197_v52  ;;  %v8202_v51 = vcombine.high %v162_v41, %v166_v42  ;;  %v182_v58 = vld [vmem:[#allocation5 + $0x1f8] sm:$0xff]  ;;  %v775_v28 = vld [vmem:[#allocation8 + $0xe0] sm:$0xff] }
  0x99   :  { %563 = vmatprep.subr.bf16.mxu0 %v8204_v53  ;;  %606 = vmatprep.subr.bf16.mxu1 %v8206_v54  ;;  %v177_v53 = vld [vmem:[#allocation5 + $0x1d0] sm:$0xff]  ;;  %v911_v32 = vld [vmem:[#allocation8 + $0x520] sm:$0xff] }
  0x9a   :  { %v181_v54 = vld [vmem:[#allocation5 + $0x1f0] sm:$0xff]  ;;  %v779_v35 = vld [vmem:[#allocation8 + $0x100] sm:$0xff] }
  0x9b   :  { %v8216_v63 = vcombine.high %v177_v53, %v181_v54  ;;  %v787_v41 = vld [vmem:[#allocation8 + $0x140] sm:$0xff] }
  0x9c   :  { %564 = vmatpush1.bf16.msra.mxu0 %v8203_v59  ;;  %607 = vmatpush1.bf16.msra.mxu1 %v8205_v60  ;;  %v8210_v59 = vcombine.high %v170_v49, %v174_v50  ;;  %v8207_v60 = vcombine.low %v169_v45, %v173_v46  ;;  %v791_v42 = vld [vmem:[#allocation8 + $0x160] sm:$0xff] }
  0x9d   :  { %565 = vmatprep.subr.bf16.mxu0 %v8212_v61  ;;  %608 = vmatprep.subr.bf16.mxu1 %v8214_v62  ;;  %v875_v61 = vld [vmem:[#allocation8 + $0x400] sm:$0xff] }
  0x9e   :  { %v879_v62 = vld [vmem:[#allocation8 + $0x420] sm:$0xff] }
  0x9f   :  { %v8348_v8 = vcombine.high %v875_v61, %v879_v62  ;;  %v923_v45 = vld [vmem:[#allocation8 + $0x580] sm:$0xff] }
  0xa0   :  { %566 = vmatpush1.bf16.msra.mxu0 %v8211_v4  ;;  %609 = vmatpush1.bf16.msra.mxu1 %v8213_v5  ;;  %v8218_v4 = vcombine.high %v178_v57, %v182_v58  ;;  %v8215_v5 = vcombine.low %v177_v53, %v181_v54  ;;  %v927_v46 = vld [vmem:[#allocation8 + $0x5a0] sm:$0xff] }
  0xa1   :  { %637 = vmatprep.subr.bf16.mxu0 %v8160_v6  ;;  %680 = vmatprep.subr.bf16.mxu1 %v8162_v9  ;;  %v883_v6 = vld [vmem:[#allocation8 + $0x440] sm:$0xff]  ;;  %v8217_v9 = vcombine.low %v178_v57, %v182_v58 }
  0xa2   :  { %v795_v49 = vld [vmem:[#allocation8 + $0x180] sm:$0xff] }
  0xa3   :  { %584 = vmatmul.mubr.bf16.vlgmr.msra.gmra.mrb[0].mxu0 %v10395_v10  ;;  %627 = vmatmul.mubr.bf16.vlgmr.msra.gmra.mrb[0].mxu1 %v10395_v10  ;;  %v799_v50 = vld [vmem:[#allocation8 + $0x1a0] sm:$0xff] }
  0xa4   :  { %638 = vmatpush1.bf16.msra.mxu0 %v8159_v11  ;;  %669 = vmatprep.mubr.bf16.mxu0 %v10265_v0  ;;  %v755_v11 = vld [vmem:[#allocation8 + $0x40] sm:$0xff] }
  0xa5   :  { %639 = vmatprep.subr.bf16.mxu0 %v8168_v14  ;;  %681 = vmatpush1.bf16.msra.mxu1 %v8161_v17  ;;  %v8347_v14 = vcombine.low %v875_v61, %v879_v62  ;;  %v8356_v17 = vcombine.high %v883_v6, %v887_v7  ;;  %v8228_v21 = vcombine.high %v755_v11, %v759_v12  ;;  %v931_v53 = vld [vmem:[#allocation8 + $0x5c0] sm:$0xff] }
  0xa6   :  { %712 = vmatprep.mubr.bf16.mxu1 %v10265_v0  ;;  %682 = vmatprep.subr.bf16.mxu1 %v8170_v18  ;;  %v165_v0 = vld [vmem:[#allocation5 + $0x170] sm:$0xff]  ;;  %v8219_v18 = vcombine.low %v747_v2, %v751_v3  ;;  %v935_v54 = vld [vmem:[#allocation8 + $0x5e0] sm:$0xff] }
  0xa7   :  { %v8200_v47 = vcombine.high %v161_v38, %v165_v0  ;;  %v8199_v52 = vcombine.low %v161_v38, %v165_v0  ;;  %v915_v38 = vld [vmem:[#allocation8 + $0x540] sm:$0xff] }
  0xa8   :  { %640 = vmatpush1.bf16.msra.mxu0 %v8167_v19  ;;  %v763_v19 = vld [vmem:[#allocation8 + $0x80] sm:$0xff] }
  0xa9   :  { %641 = vmatprep.subr.bf16.mxu0 %v8176_v22  ;;  %683 = vmatpush1.bf16.msra.mxu1 %v8169_v25  ;;  %v8355_v22 = vcombine.low %v883_v6, %v887_v7  ;;  %v8364_v25 = vcombine.high %v891_v15, %v895_v16  ;;  %v8236_v29 = vcombine.high %v763_v19, %v767_v20  ;;  %v919_v0 = vld [vmem:[#allocation8 + $0x560] sm:$0xff] }
  0xaa   :  { %684 = vmatprep.subr.bf16.mxu1 %v8178_v26  ;;  %v8227_v26 = vcombine.low %v755_v11, %v759_v12  ;;  %v8235_v34 = vcombine.low %v763_v19, %v767_v20  ;;  %v803_v57 = vld [vmem:[#allocation8 + $0x1c0] sm:$0xff] }
  0xab   :  { %v807_v58 = vld [vmem:[#allocation8 + $0x1e0] sm:$0xff] }
  0xac   :  { %642 = vmatpush1.bf16.msra.mxu0 %v8175_v27  ;;  %v771_v27 = vld [vmem:[#allocation8 + $0xc0] sm:$0xff] }
  0xad   :  { %643 = vmatprep.subr.bf16.mxu0 %v8184_v31  ;;  %685 = vmatpush1.bf16.msra.mxu1 %v8177_v33  ;;  %v907_v31 = vld [vmem:[#allocation8 + $0x500] sm:$0xff]  ;;  %v8372_v33 = vcombine.high %v899_v23, %v903_v24 }
  0xae   :  { %686 = vmatprep.subr.bf16.mxu1 %v8186_v36  ;;  %v783_v36 = vld [vmem:[#allocation8 + $0x120] sm:$0xff] }
  0xaf   :  { %v939_v61 = vld [vmem:[#allocation8 + $0x600] sm:$0xff] }
  0xb0   :  { %644 = vmatpush1.bf16.msra.mxu0 %v8183_v37  ;;  %v8371_v37 = vcombine.low %v899_v23, %v903_v24  ;;  %v943_v62 = vld [vmem:[#allocation8 + $0x620] sm:$0xff] }
  0xb1   :  { %645 = vmatprep.subr.bf16.mxu0 %v8192_v39  ;;  %687 = vmatpush1.bf16.msra.mxu1 %v8185_v40  ;;  %v8380_v39 = vcombine.high %v907_v31, %v911_v32  ;;  %v8243_v40 = vcombine.low %v771_v27, %v775_v28  ;;  %v811_v2 = vld [vmem:[#allocation8 + $0x200] sm:$0xff] }
  0xb2   :  { %688 = vmatprep.subr.bf16.mxu1 %v8194_v43  ;;  %v8252_v43 = vcombine.high %v779_v35, %v783_v36  ;;  %v815_v3 = vld [vmem:[#allocation8 + $0x220] sm:$0xff] }
  0xb3   :  { %v947_v6 = vld [vmem:[#allocation8 + $0x640] sm:$0xff] }
  0xb4   :  { %646 = vmatpush1.bf16.msra.mxu0 %v8191_v44  ;;  %v8379_v44 = vcombine.low %v907_v31, %v911_v32  ;;  %v951_v7 = vld [vmem:[#allocation8 + $0x660] sm:$0xff] }
  0xb5   :  { %647 = vmatprep.subr.bf16.mxu0 %v8200_v47  ;;  %689 = vmatpush1.bf16.msra.mxu1 %v8193_v48  ;;  %v8388_v47 = vcombine.high %v915_v38, %v919_v0  ;;  %v8251_v48 = vcombine.low %v779_v35, %v783_v36  ;;  %v819_v11 = vld [vmem:[#allocation8 + $0x240] sm:$0xff] }
  0xb6   :  { %690 = vmatprep.subr.bf16.mxu1 %v8202_v51  ;;  %v8260_v51 = vcombine.high %v787_v41, %v791_v42  ;;  %v823_v12 = vld [vmem:[#allocation8 + $0x260] sm:$0xff] }
  0xb7   :  { %v955_v15 = vld [vmem:[#allocation8 + $0x680] sm:$0xff] }
  0xb8   :  { %648 = vmatpush1.bf16.msra.mxu0 %v8199_v52  ;;  %v8387_v52 = vcombine.low %v915_v38, %v919_v0  ;;  %v959_v16 = vld [vmem:[#allocation8 + $0x6a0] sm:$0xff] }
  0xb9   :  { %649 = vmatprep.subr.bf16.mxu0 %v8208_v55  ;;  %691 = vmatpush1.bf16.msra.mxu1 %v8201_v56  ;;  %v8396_v55 = vcombine.high %v923_v45, %v927_v46  ;;  %v8259_v56 = vcombine.low %v787_v41, %v791_v42  ;;  %v827_v19 = vld [vmem:[#allocation8 + $0x280] sm:$0xff] }
  0xba   :  { %692 = vmatprep.subr.bf16.mxu1 %v8210_v59  ;;  %v8268_v59 = vcombine.high %v795_v49, %v799_v50  ;;  %v831_v20 = vld [vmem:[#allocation8 + $0x2a0] sm:$0xff] }
  0xbb   :  { %v963_v23 = vld [vmem:[#allocation8 + $0x6c0] sm:$0xff] }
  0xbc   :  { %650 = vmatpush1.bf16.msra.mxu0 %v8207_v60  ;;  %v8395_v60 = vcombine.low %v923_v45, %v927_v46  ;;  %v967_v24 = vld [vmem:[#allocation8 + $0x6e0] sm:$0xff] }
  0xbd   :  { %651 = vmatprep.subr.bf16.mxu0 %v8216_v63  ;;  %693 = vmatpush1.bf16.msra.mxu1 %v8209_v1  ;;  %v8404_v63 = vcombine.high %v931_v53, %v935_v54  ;;  %v8267_v1 = vcombine.low %v795_v49, %v799_v50  ;;  %v971_v31 = vld [vmem:[#allocation8 + $0x700] sm:$0xff] }
  0xbe   :  { %694 = vmatprep.subr.bf16.mxu1 %v8218_v4  ;;  %v8276_v4 = vcombine.high %v803_v57, %v807_v58  ;;  %v975_v32 = vld [vmem:[#allocation8 + $0x720] sm:$0xff] }
  0xbf   :  { %v843_v35 = vld [vmem:[#allocation8 + $0x300] sm:$0xff] }
  0xc0   :  { %652 = vmatpush1.bf16.msra.mxu0 %v8215_v5  ;;  %v8403_v5 = vcombine.low %v931_v53, %v935_v54  ;;  %v847_v36 = vld [vmem:[#allocation8 + $0x320] sm:$0xff] }
  0xc1   :  { %3904 = vmatprep.subr.bf16.mxu0 %v8348_v8  ;;  %695 = vmatpush1.bf16.msra.mxu1 %v8217_v9  ;;  %v8412_v8 = vcombine.high %v939_v61, %v943_v62  ;;  %v8275_v9 = vcombine.low %v803_v57, %v807_v58  ;;  %v979_v38 = vld [vmem:[#allocation8 + $0x740] sm:$0xff]  ;;  %v8315_v46 = vcombine.low %v843_v35, %v847_v36 }
  0xc2   :  { %3861 = vmatprep.subr.bf16.mxu1 %v8220_v13  ;;  %v8284_v13 = vcombine.high %v811_v2, %v815_v3  ;;  %v983_v0 = vld [vmem:[#allocation8 + $0x760] sm:$0xff] }
  0xc3   :  { %670 = vmatmul.mubr.bf16.vlgmr.msra.gmra.mrb[4].mxu0 %v10395_v10  ;;  %v851_v41 = vld [vmem:[#allocation8 + $0x340] sm:$0xff]  ;;  %v8452_v45 = vcombine.high %v979_v38, %v983_v0 }
  0xc4   :  { %3905 = vmatpush1.bf16.msra.mxu0 %v8347_v14  ;;  %713 = vmatmul.mubr.bf16.vlgmr.msra.gmra.mrb[4].mxu1 %v10395_v10  ;;  %v8244_v10 = vcombine.high %v771_v27, %v775_v28  ;;  %v8411_v14 = vcombine.low %v939_v61, %v943_v62  ;;  %v835_v27 = vld [vmem:[#allocation8 + $0x2c0] sm:$0xff] }
  0xc5   :  { %3906 = vmatprep.subr.bf16.mxu0 %v8356_v17  ;;  %3862 = vmatpush1.bf16.msra.mxu1 %v8219_v18  ;;  %v8420_v17 = vcombine.high %v947_v6, %v951_v7  ;;  %v8283_v18 = vcombine.low %v811_v2, %v815_v3  ;;  %v839_v28 = vld [vmem:[#allocation8 + $0x2e0] sm:$0xff] }
  0xc6   :  { %3863 = vmatprep.subr.bf16.mxu1 %v8228_v21  ;;  %v8292_v21 = vcombine.high %v819_v11, %v823_v12  ;;  %v855_v42 = vld [vmem:[#allocation8 + $0x360] sm:$0xff] }
  0xc7   :  { %v8323_v49 = vcombine.low %v851_v41, %v855_v42  ;;  %v859_v50 = vld [vmem:[#allocation8 + $0x380] sm:$0xff] }
  0xc8   :  { %3907 = vmatpush1.bf16.msra.mxu0 %v8355_v22  ;;  %v8419_v22 = vcombine.low %v947_v6, %v951_v7  ;;  %v991_v54 = vld [vmem:[#allocation8 + $0x7a0] sm:$0xff]  ;;  %v752_v7 = vld [vmem:[#allocation8 + $0x28] sm:$0xff] }
  0xc9   :  { %3908 = vmatprep.subr.bf16.mxu0 %v8364_v25  ;;  %3864 = vmatpush1.bf16.msra.mxu1 %v8227_v26  ;;  %v8428_v25 = vcombine.high %v955_v15, %v959_v16  ;;  %v8291_v26 = vcombine.low %v819_v11, %v823_v12  ;;  %v867_v58 = vld [vmem:[#allocation8 + $0x3c0] sm:$0xff]  ;;  %v185_v12 = vlaneseq }
  0xca   :  { %3865 = vmatprep.subr.bf16.mxu1 %v8236_v29  ;;  %v8300_v29 = vcombine.high %v827_v19, %v831_v20  ;;  %v999_v62 = vld [vmem:[#allocation8 + $0x7e0] sm:$0xff] }
  0xcb   :  { %v10403_v3 = vld [vmem:[#allocation8 + $0x800] sm:$0xff] }
  0xcc   :  { %3909 = vmatpush1.bf16.msra.mxu0 %v8363_v30  ;;  %v8427_v30 = vcombine.low %v955_v15, %v959_v16  ;;  %v10420_v15 = vld [vmem:[#allocation7] sm:$0xff] }
  0xcd   :  { %3910 = vmatprep.subr.bf16.mxu0 %v8372_v33  ;;  %3866 = vmatpush1.bf16.msra.mxu1 %v8235_v34  ;;  %v8436_v33 = vcombine.high %v963_v23, %v967_v24  ;;  %v8299_v34 = vcombine.low %v827_v19, %v831_v20 }
  0xce   :  { %3867 = vmatprep.subr.bf16.mxu1 %v8244_v10  ;;  %v8308_v10 = vcombine.high %v835_v27, %v839_v28 }
  0xd0   :  { %3911 = vmatpush1.bf16.msra.mxu0 %v8371_v37  ;;  %v8435_v37 = vcombine.low %v963_v23, %v967_v24 }
  0xd1   :  { %3912 = vmatprep.subr.bf16.mxu0 %v8380_v39  ;;  %3868 = vmatpush1.bf16.msra.mxu1 %v8243_v40  ;;  %v8444_v39 = vcombine.high %v971_v31, %v975_v32  ;;  %v8307_v40 = vcombine.low %v835_v27, %v839_v28 }
  0xd2   :  { %3869 = vmatprep.subr.bf16.mxu1 %v8252_v43  ;;  %v8316_v43 = vcombine.high %v843_v35, %v847_v36 }
  0xd4   :  { %3913 = vmatpush1.bf16.msra.mxu0 %v8379_v44  ;;  %v8443_v44 = vcombine.low %v971_v31, %v975_v32 }
  0xd5   :  { %3914 = vmatprep.subr.bf16.mxu0 %v8388_v47  ;;  %3870 = vmatpush1.bf16.msra.mxu1 %v8251_v48  ;;  %v8324_v47 = vcombine.high %v851_v41, %v855_v42  ;;  %v8451_v48 = vcombine.low %v979_v38, %v983_v0  ;;  %v1011_v41 = vld [vmem:[#allocation8 + $0x840] sm:$0xff] }
  0xd6   :  { %3871 = vmatprep.subr.bf16.mxu1 %v8260_v51  ;;  %v863_v51 = vld [vmem:[#allocation8 + $0x3a0] sm:$0xff] }
  0xd7   :  { %v8332_v53 = vcombine.high %v859_v50, %v863_v51  ;;  %v8331_v57 = vcombine.low %v859_v50, %v863_v51  ;;  %v1015_v42 = vld [vmem:[#allocation8 + $0x860] sm:$0xff] }
  0xd8   :  { %3915 = vmatpush1.bf16.msra.mxu0 %v8387_v52  ;;  %v987_v52 = vld [vmem:[#allocation8 + $0x780] sm:$0xff] }
  0xd9   :  { %3916 = vmatprep.subr.bf16.mxu0 %v8396_v55  ;;  %3872 = vmatpush1.bf16.msra.mxu1 %v8259_v56  ;;  %v8459_v55 = vcombine.low %v987_v52, %v991_v54  ;;  %v8460_v56 = vcombine.high %v987_v52, %v991_v54  ;;  %v1023_v54 = vld [vmem:[#allocation8 + $0x8a0] sm:$0xff] }
  0xda   :  { %3873 = vmatprep.subr.bf16.mxu1 %v8268_v59  ;;  %v871_v59 = vld [vmem:[#allocation8 + $0x3e0] sm:$0xff] }
  0xdb   :  { %v8340_v61 = vcombine.high %v867_v58, %v871_v59  ;;  %v8339_v2 = vcombine.low %v867_v58, %v871_v59  ;;  %v768_v58 = vld [vmem:[#allocation8 + $0xa8] sm:$0xff] }
  0xdc   :  { %3917 = vmatpush1.bf16.msra.mxu0 %v8395_v60  ;;  %v995_v60 = vld [vmem:[#allocation8 + $0x7c0] sm:$0xff] }
  0xdd   :  { %3918 = vmatprep.subr.bf16.mxu0 %v8404_v63  ;;  %3874 = vmatpush1.bf16.msra.mxu1 %v8267_v1  ;;  %v8467_v63 = vcombine.low %v995_v60, %v999_v62  ;;  %v8468_v1 = vcombine.high %v995_v60, %v999_v62  ;;  %v8483_v60 = vcombine.low %v1011_v41, %v1015_v42 }
  0xde   :  { %3875 = vmatprep.subr.bf16.mxu1 %v8276_v4  ;;  %v10405_v4 = vld [vmem:[#allocation8 + $0x820] sm:$0xff] }
  0xdf   :  { %v8476_v6 = vcombine.high %v10403_v3, %v10405_v4 }
  0xe0   :  { %3919 = vmatpush1.bf16.msra.mxu0 %v8403_v5  ;;  %v10407_v5 = vld [vmem:[#allocation8 + $0x8] sm:$0xff] }
  0xe1   :  { %3920 = vmatprep.subr.bf16.mxu0 %v8412_v8  ;;  %3876 = vmatpush1.bf16.msra.mxu1 %v8275_v9  ;;  %v8475_v8 = vcombine.low %v10403_v3, %v10405_v4  ;;  %v8221_v9 = vcombine.low %v10407_v5, %v752_v7  ;;  %v8222_v11 = vcombine.high %v10407_v5, %v752_v7  ;;  %v1031_v3 = vld [vmem:[#allocation8 + $0x8e0] sm:$0xff] }
  0xe2   :  { %3877 = vmatprep.subr.bf16.mxu1 %v8284_v13  ;;  %v10415_v13 = vshrl.u32 %v185_v12, 7  ;;  %v1039_v12 = vld [vmem:[#allocation8 + $0x920] sm:$0xff] }
  0xe4   :  { %3921 = vmatpush1.bf16.msra.mxu0 %v8411_v14  ;;  %v10418_v14 = vsub.s32 0, %v10415_v13  ;;  %v10423_v16 = vsub.s32 2, %v10415_v13 }
  0xe5   :  { %3922 = vmatprep.subr.bf16.mxu0 %v8420_v17  ;;  %3878 = vmatpush1.bf16.msra.mxu1 %v8283_v18  ;;  %v10426_v17 = vsub.s32 1, %v10415_v13  ;;  %v10429_v18 = vsub.s32 3, %v10415_v13 }
  0xe6   :  { %3879 = vmatprep.subr.bf16.mxu1 %v8292_v21  ;;  %v188_v19 = vrot.slane %v10420_v15, %v10418_v14  ;;  %v196_v20 = vrot.slane %v10420_v15, %v10423_v16 }
  0xe7   :  { %v192_v21 = vrot.slane %v10420_v15, %v10426_v17 }
  0xe8   :  { %3923 = vmatpush1.bf16.msra.mxu0 %v8419_v22  ;;  %v200_v22 = vrot.slane %v10420_v15, %v10429_v18 }
  0xe9   :  { %3924 = vmatprep.subr.bf16.mxu0 %v8428_v25  ;;  %3880 = vmatpush1.bf16.msra.mxu1 %v8291_v26 }
  0xea   :  { %3881 = vmatprep.subr.bf16.mxu1 %v8300_v29 }
  0xec   :  { %3925 = vmatpush1.bf16.msra.mxu0 %v8427_v30 }
  0xed   :  { %3926 = vmatprep.subr.bf16.mxu0 %v8436_v33  ;;  %3882 = vmatpush1.bf16.msra.mxu1 %v8299_v34 }
  0xee   :  { %3883 = vmatprep.subr.bf16.mxu1 %v8308_v10 }
  0xf0   :  { %3927 = vmatpush1.bf16.msra.mxu0 %v8435_v37 }
  0xf1   :  { %3928 = vmatprep.subr.bf16.mxu0 %v8444_v39  ;;  %3884 = vmatpush1.bf16.msra.mxu1 %v8307_v40 }
  0xf2   :  { %3885 = vmatprep.subr.bf16.mxu1 %v8316_v43  ;;  %v756_v43 = vld [vmem:[#allocation8 + $0x48] sm:$0xff] }
  0xf4   :  { %3929 = vmatpush1.bf16.msra.mxu0 %v8443_v44 }
  0xf5   :  { %3930 = vmatprep.subr.bf16.mxu0 %v8452_v45  ;;  %3886 = vmatpush1.bf16.msra.mxu1 %v8315_v46 }
  0xf6   :  { %3887 = vmatprep.subr.bf16.mxu1 %v8324_v47  ;;  %v760_v47 = vld [vmem:[#allocation8 + $0x68] sm:$0xff] }
  0xf7   :  { %v8229_v59 = vcombine.low %v756_v43, %v760_v47 }
  0xf8   :  { %3931 = vmatpush1.bf16.msra.mxu0 %v8451_v48 }
  0xf9   :  { %3888 = vmatpush1.bf16.msra.mxu1 %v8323_v49  ;;  %3932 = vmatprep.subr.bf16.mxu0 %v8460_v56  ;;  %v8484_v56 = vcombine.high %v1011_v41, %v1015_v42  ;;  %v804_v42 = vld [vmem:[#allocation8 + $0x1c8] sm:$0xff] }
  0xfa   :  { %3889 = vmatprep.subr.bf16.mxu1 %v8332_v53  ;;  %v1019_v53 = vld [vmem:[#allocation8 + $0x880] sm:$0xff] }
  0xfb   :  { %v8492_v62 = vcombine.high %v1019_v53, %v1023_v54  ;;  %v8491_v5 = vcombine.low %v1019_v53, %v1023_v54 }
  0xfc   :  { %3933 = vmatpush1.bf16.msra.mxu0 %v8459_v55  ;;  %v764_v55 = vld [vmem:[#allocation8 + $0x88] sm:$0xff] }
  0xfd   :  { %3890 = vmatpush1.bf16.msra.mxu1 %v8331_v57  ;;  %3934 = vmatprep.subr.bf16.mxu0 %v8468_v1  ;;  %v8230_v57 = vcombine.high %v756_v43, %v760_v47  ;;  %v776_v1 = vld [vmem:[#allocation8 + $0xe8] sm:$0xff]  ;;  %v8237_v4 = vcombine.low %v764_v55, %v768_v58 }
  0xfe   :  { %3891 = vmatprep.subr.bf16.mxu1 %v8340_v61  ;;  %v8238_v61 = vcombine.high %v764_v55, %v768_v58  ;;  %v808_v43 = vld [vmem:[#allocation8 + $0x1e8] sm:$0xff] }
 0x100   :  { %3935 = vmatpush1.bf16.msra.mxu0 %v8467_v63  ;;  %v772_v63 = vld [vmem:[#allocation8 + $0xc8] sm:$0xff] }
 0x101   :  { %3947 = vmatprep.subr.bf16.mxu0 %v8476_v6  ;;  %3892 = vmatpush1.bf16.msra.mxu1 %v8339_v2  ;;  %v1027_v2 = vld [vmem:[#allocation8 + $0x8c0] sm:$0xff]  ;;  %v8246_v6 = vcombine.high %v772_v63, %v776_v1 }
 0x102   :  { %4033 = vmatprep.subr.bf16.mxu1 %v8222_v11  ;;  %v8500_v7 = vcombine.high %v1027_v2, %v1031_v3  ;;  %v1035_v11 = vld [vmem:[#allocation8 + $0x900] sm:$0xff] }
 0x176   :  { %v585_v23 = vpop.f32.mrb[0].mxu0  ;;  %v628_v25 = vpop.f32.mrb[0].mxu1 }
 0x177   :  { %v586_v24 = vadd.f32 %v585_v23, %v188_v19  ;;  %v587_v26 = vpop.f32.mrb[1].mxu0  ;;  %v629_v27 = vadd.f32 %v628_v25, %v196_v20  ;;  %v630_v29 = vpop.f32.mrb[1].mxu1  ;;  %v788_v23 = vld [vmem:[#allocation8 + $0x148] sm:$0xff]  ;;  %v1043_v25 = vld [vmem:[#allocation8 + $0x940] sm:$0xff] }
 0x178   :  { %v588_v28 = vadd.f32 %v587_v26, %v192_v21  ;;  %v589_v30 = vpop.f32.mrb[2].mxu0  ;;  %v631_v31 = vadd.f32 %v630_v29, %v200_v22  ;;  %v632_v33 = vpop.f32.mrb[2].mxu1  ;;  %v1047_v26 = vld [vmem:[#allocation8 + $0x960] sm:$0xff] }
 0x179   :  { %v590_v32 = vadd.f32 %v589_v30, %v188_v19  ;;  %v591_v34 = vpop.f32.mrb[3].mxu0  ;;  %v725_v35 = vmax.f32 %v629_v27, 0.0  ;;  %v633_v36 = vadd.f32 %v632_v33, %v196_v20  ;;  %v634_v37 = vpop.f32.mrb[3].mxu1  ;;  %v723_v38 = vmax.f32 %v586_v24, 0.0  ;;  %v792_v24 = vld [vmem:[#allocation8 + $0x168] sm:$0xff] }
 0x17a   :  { %v592_v10 = vadd.f32 %v591_v34, %v192_v21  ;;  %v726_v0 = vmax.f32 %v631_v31, 0.0  ;;  %v635_v40 = vadd.f32 %v634_v37, %v200_v22  ;;  %v724_v44 = vmax.f32 %v588_v28, 0.0  ;;  %v800_v33 = vld [vmem:[#allocation8 + $0x1a8] sm:$0xff] }
 0x17b   :  { %v731_v39 = vmax.f32 %v590_v32, 0.0  ;;  %v733_v45 = vmax.f32 %v633_v36, 0.0  ;;  %v8245_v19 = vcombine.low %v772_v63, %v776_v1  ;;  %v8499_v20 = vcombine.low %v1027_v2, %v1031_v3  ;;  %v796_v32 = vld [vmem:[#allocation8 + $0x188] sm:$0xff]  ;;  %v1055_v36 = vld [vmem:[#allocation8 + $0x9a0] sm:$0xff] }
 0x17c   :  { %v732_v46 = vmax.f32 %v592_v10, 0.0  ;;  %v734_v49 = vmax.f32 %v635_v40, 0.0  ;;  %v8508_v22 = vcombine.high %v1035_v11, %v1039_v12  ;;  %v8507_v28 = vcombine.low %v1035_v11, %v1039_v12  ;;  %v1067_v3 = vld [vmem:[#allocation8 + $0xa00] sm:$0xff] }
 0x17d   :  { %v10439_v48 = vpack.c.bf16 %v731_v39, %v723_v38  ;;  %v10441_v50 = vpack.c.bf16 %v733_v45, %v725_v35  ;;  %v8262_v29 = vcombine.high %v788_v23, %v792_v24  ;;  %v10453_v30 = vsub.s32 4, %v10415_v13  ;;  %v1051_v35 = vld [vmem:[#allocation8 + $0x980] sm:$0xff] }
 0x17e   :  { %v10443_v51 = vpack.c.bf16 %v732_v46, %v724_v44  ;;  %v10445_v52 = vpack.c.bf16 %v734_v49, %v726_v0  ;;  %v8516_v31 = vcombine.high %v1043_v25, %v1047_v26  ;;  %v10456_v34 = vsub.s32 5, %v10415_v13  ;;  %v1059_v45 = vld [vmem:[#allocation8 + $0x9c0] sm:$0xff] }
 0x17f   :  { %v10459_v10 = vsub.s32 6, %v10415_v13  ;;  %v8261_v37 = vcombine.low %v788_v23, %v792_v24  ;;  %v215_v38 = vsub.s32 7, %v10415_v13  ;;  %v8515_v0 = vcombine.low %v1043_v25, %v1047_v26  ;;  %v1063_v46 = vld [vmem:[#allocation8 + $0x9e0] sm:$0xff] }
 0x180   :  { %3893 = vmatprep.mubr.bf16.mxu1 %v10443_v51  ;;  %3936 = vmatprep.mubr.bf16.mxu0 %v10445_v52  ;;  %v8270_v39 = vcombine.high %v796_v32, %v800_v33  ;;  %v204_v40 = vrot.slane %v10420_v15, %v10453_v30  ;;  %v8524_v41 = vcombine.high %v1051_v35, %v1055_v36 }
 0x181   :  { %3894 = vmatmul.mubr.bf16.vlgmr.msra.gmra.mrb[8].mxu1 %v10439_v48  ;;  %3937 = vmatmul.mubr.bf16.vlgmr.msra.gmra.mrb[8].mxu0 %v10441_v50  ;;  %v208_v44 = vrot.slane %v10420_v15, %v10456_v34  ;;  %v212_v47 = vrot.slane %v10420_v15, %v10459_v10  ;;  %v8269_v49 = vcombine.low %v796_v32, %v800_v33  ;;  %v1075_v33 = vld [vmem:[#allocation8 + $0xa40] sm:$0xff] }
 0x182   :  { %4034 = vmatpush1.bf16.msra.mxu1 %v8221_v9  ;;  %3948 = vmatpush1.bf16.msra.mxu0 %v8475_v8  ;;  %v780_v8 = vld [vmem:[#allocation8 + $0x108] sm:$0xff]  ;;  %v216_v54 = vrot.slane %v10420_v15, %v215_v38  ;;  %v8523_v55 = vcombine.low %v1051_v35, %v1055_v36  ;;  %v8531_v2 = vcombine.low %v1059_v45, %v1063_v46  ;;  %v1079_v35 = vld [vmem:[#allocation8 + $0xa60] sm:$0xff] }
 0x183   :  { %4065 = vmatprep.mubr.bf16.mxu1 %v10443_v51  ;;  %3949 = vmatprep.subr.bf16.mxu0 %v8484_v56  ;;  %v784_v9 = vld [vmem:[#allocation8 + $0x128] sm:$0xff]  ;;  %v8278_v56 = vcombine.high %v804_v42, %v808_v43 }
 0x184   :  { %4035 = vmatprep.subr.bf16.mxu1 %v8230_v57  ;;  %v8254_v21 = vcombine.high %v780_v8, %v784_v9  ;;  %v8253_v27 = vcombine.low %v780_v8, %v784_v9  ;;  %v8277_v9 = vcombine.low %v804_v42, %v808_v43 }
 0x186   :  { %4036 = vmatpush1.bf16.msra.mxu1 %v8229_v59  ;;  %3950 = vmatpush1.bf16.msra.mxu0 %v8483_v60  ;;  %v8532_v59 = vcombine.high %v1059_v45, %v1063_v46  ;;  %v812_v60 = vld [vmem:[#allocation8 + $0x208] sm:$0xff] }
 0x187   :  { %4037 = vmatprep.subr.bf16.mxu1 %v8238_v61  ;;  %3951 = vmatprep.subr.bf16.mxu0 %v8492_v62  ;;  %v816_v61 = vld [vmem:[#allocation8 + $0x228] sm:$0xff] }
 0x188   :  { %v828_v45 = vld [vmem:[#allocation8 + $0x288] sm:$0xff] }
 0x189   :  { %v832_v46 = vld [vmem:[#allocation8 + $0x2a8] sm:$0xff] }
 0x18a   :  { %4038 = vmatpush1.bf16.msra.mxu1 %v8237_v4  ;;  %3952 = vmatpush1.bf16.msra.mxu0 %v8491_v5  ;;  %v1071_v4 = vld [vmem:[#allocation8 + $0xa20] sm:$0xff] }
 0x18b   :  { %4039 = vmatprep.subr.bf16.mxu1 %v8246_v6  ;;  %3953 = vmatprep.subr.bf16.mxu0 %v8500_v7  ;;  %v8540_v26 = vcombine.high %v1067_v3, %v1071_v4 }
 0x18e   :  { %4040 = vmatpush1.bf16.msra.mxu1 %v8245_v19  ;;  %3954 = vmatpush1.bf16.msra.mxu0 %v8499_v20 }
 0x18f   :  { %4041 = vmatprep.subr.bf16.mxu1 %v8254_v21  ;;  %3955 = vmatprep.subr.bf16.mxu0 %v8508_v22  ;;  %v8286_v21 = vcombine.high %v812_v60, %v816_v61 }
 0x192   :  { %4042 = vmatpush1.bf16.msra.mxu1 %v8253_v27  ;;  %3956 = vmatpush1.bf16.msra.mxu0 %v8507_v28  ;;  %v820_v27 = vld [vmem:[#allocation8 + $0x248] sm:$0xff] }
 0x193   :  { %4043 = vmatprep.subr.bf16.mxu1 %v8262_v29  ;;  %3957 = vmatprep.subr.bf16.mxu0 %v8516_v31  ;;  %v824_v28 = vld [vmem:[#allocation8 + $0x268] sm:$0xff] }
 0x194   :  { %v8294_v42 = vcombine.high %v820_v27, %v824_v28 }
 0x196   :  { %4044 = vmatpush1.bf16.msra.mxu1 %v8261_v37  ;;  %v671_v53 = vpop.f32.mrb[4].mxu0  ;;  %3958 = vmatpush1.bf16.msra.mxu0 %v8515_v0  ;;  %v8285_v0 = vcombine.low %v812_v60, %v816_v61  ;;  %v1091_v60 = vld [vmem:[#allocation8 + $0xac0] sm:$0xff] }
 0x197   :  { %4045 = vmatprep.subr.bf16.mxu1 %v8270_v39  ;;  %v672_v57 = vadd.f32 %v671_v53, %v204_v40  ;;  %v673_v58 = vpop.f32.mrb[5].mxu0  ;;  %3959 = vmatprep.subr.bf16.mxu0 %v8524_v41  ;;  %v714_v1 = vpop.f32.mrb[4].mxu1  ;;  %v8539_v41 = vcombine.low %v1067_v3, %v1071_v4  ;;  %v1087_v53 = vld [vmem:[#allocation8 + $0xaa0] sm:$0xff]  ;;  %v844_v3 = vld [vmem:[#allocation8 + $0x308] sm:$0xff] }
 0x198   :  { %v674_v62 = vadd.f32 %v673_v58, %v208_v44  ;;  %v675_v63 = vpop.f32.mrb[6].mxu0  ;;  %v715_v15 = vadd.f32 %v714_v1, %v212_v47  ;;  %v716_v8 = vpop.f32.mrb[5].mxu1  ;;  %v836_v58 = vld [vmem:[#allocation8 + $0x2c8] sm:$0xff]  ;;  %v1095_v61 = vld [vmem:[#allocation8 + $0xae0] sm:$0xff] }
 0x199   :  { %v727_v5 = vmax.f32 %v672_v57, 0.0  ;;  %v676_v6 = vadd.f32 %v675_v63, %v204_v40  ;;  %v677_v7 = vpop.f32.mrb[7].mxu0  ;;  %v717_v19 = vadd.f32 %v716_v8, %v216_v54  ;;  %v718_v20 = vpop.f32.mrb[6].mxu1  ;;  %v848_v4 = vld [vmem:[#allocation8 + $0x328] sm:$0xff] }
 0x19a   :  { %4046 = vmatpush1.bf16.msra.mxu1 %v8269_v49  ;;  %v728_v11 = vmax.f32 %v674_v62, 0.0  ;;  %v678_v12 = vadd.f32 %v677_v7, %v208_v44  ;;  %3960 = vmatpush1.bf16.msra.mxu0 %v8523_v55  ;;  %v729_v23 = vmax.f32 %v715_v15, 0.0  ;;  %v719_v24 = vadd.f32 %v718_v20, %v212_v47  ;;  %v720_v25 = vpop.f32.mrb[7].mxu1  ;;  %v1083_v49 = vld [vmem:[#allocation8 + $0xa80] sm:$0xff] }
 0x19b   :  { %4047 = vmatprep.subr.bf16.mxu1 %v8278_v56  ;;  %v735_v22 = vmax.f32 %v676_v6, 0.0  ;;  %3961 = vmatprep.subr.bf16.mxu0 %v8532_v59  ;;  %v730_v31 = vmax.f32 %v717_v19, 0.0  ;;  %v721_v32 = vadd.f32 %v720_v25, %v216_v54  ;;  %v8548_v44 = vcombine.high %v1075_v33, %v1079_v35  ;;  %v840_v59 = vld [vmem:[#allocation8 + $0x2e8] sm:$0xff]  ;;  %v1103_v6 = vld [vmem:[#allocation8 + $0xb20] sm:$0xff] }
 0x19c   :  { %v736_v29 = vmax.f32 %v678_v12, 0.0  ;;  %v737_v37 = vmax.f32 %v719_v24, 0.0  ;;  %v8293_v54 = vcombine.low %v820_v27, %v824_v28  ;;  %v8547_v55 = vcombine.low %v1075_v33, %v1079_v35  ;;  %v856_v12 = vld [vmem:[#allocation8 + $0x368] sm:$0xff]  ;;  %v1107_v19 = vld [vmem:[#allocation8 + $0xb40] sm:$0xff] }
 0x19d   :  { %v10471_v36 = vpack.c.bf16 %v735_v22, %v727_v5  ;;  %v738_v40 = vmax.f32 %v721_v32, 0.0  ;;  %v8302_v56 = vcombine.high %v828_v45, %v832_v46  ;;  %v8556_v57 = vcombine.high %v1083_v49, %v1087_v53  ;;  %v1099_v5 = vld [vmem:[#allocation8 + $0xb00] sm:$0xff]  ;;  %v860_v25 = vld [vmem:[#allocation8 + $0x388] sm:$0xff] }
 0x19e   :  { %4048 = vmatpush1.bf16.msra.mxu1 %v8277_v9  ;;  %v10473_v39 = vpack.c.bf16 %v736_v29, %v728_v11  ;;  %3962 = vmatpush1.bf16.msra.mxu0 %v8531_v2  ;;  %v10475_v43 = vpack.c.bf16 %v737_v37, %v729_v23  ;;  %v8301_v62 = vcombine.low %v828_v45, %v832_v46  ;;  %v852_v11 = vld [vmem:[#allocation8 + $0x348] sm:$0xff]  ;;  %v1111_v20 = vld [vmem:[#allocation8 + $0xb60] sm:$0xff] }
 0x19f   :  { %4049 = vmatprep.subr.bf16.mxu1 %v8286_v21  ;;  %3963 = vmatprep.subr.bf16.mxu0 %v8540_v26  ;;  %v10478_v47 = vpack.c.bf16 %v738_v40, %v730_v31  ;;  %v8555_v63 = vcombine.low %v1083_v49, %v1087_v53  ;;  %v8310_v1 = vcombine.high %v836_v58, %v840_v59  ;;  %v864_v26 = vld [vmem:[#allocation8 + $0x3a8] sm:$0xff]  ;;  %v1115_v27 = vld [vmem:[#allocation8 + $0xb80] sm:$0xff] }
 0x1a0   :  { %3979 = vmatprep.mubr.bf16.mxu0 %v10473_v39  ;;  %v8564_v2 = vcombine.high %v1091_v60, %v1095_v61  ;;  %v8309_v7 = vcombine.low %v836_v58, %v840_v59  ;;  %v8563_v15 = vcombine.low %v1091_v60, %v1095_v61  ;;  %v8318_v8 = vcombine.high %v844_v3, %v848_v4  ;;  %v1119_v28 = vld [vmem:[#allocation8 + $0xba0] sm:$0xff]  ;;  %v868_v35 = vld [vmem:[#allocation8 + $0x3c8] sm:$0xff] }
 0x1a1   :  { %v8572_v9 = vcombine.high %v1099_v5, %v1103_v6  ;;  %v8317_v21 = vcombine.low %v844_v3, %v848_v4  ;;  %v8571_v22 = vcombine.low %v1099_v5, %v1103_v6  ;;  %v8326_v23 = vcombine.high %v852_v11, %v856_v12  ;;  %v872_v37 = vld [vmem:[#allocation8 + $0x3e8] sm:$0xff]  ;;  %v1127_v40 = vld [vmem:[#allocation8 + $0xbe0] sm:$0xff] }
 0x1a2   :  { %4050 = vmatpush1.bf16.msra.mxu1 %v8285_v0  ;;  %3964 = vmatpush1.bf16.msra.mxu0 %v8539_v41  ;;  %v8580_v24 = vcombine.high %v1107_v19, %v1111_v20  ;;  %v8325_v29 = vcombine.low %v852_v11, %v856_v12  ;;  %v8579_v31 = vcombine.low %v1107_v19, %v1111_v20  ;;  %v1123_v0 = vld [vmem:[#allocation8 + $0xbc0] sm:$0xff]  ;;  %v876_v46 = vld [vmem:[#allocation8 + $0x408] sm:$0xff] }
 0x1a3   :  { %4051 = vmatprep.subr.bf16.mxu1 %v8294_v42  ;;  %3965 = vmatprep.subr.bf16.mxu0 %v8548_v44  ;;  %v8334_v32 = vcombine.high %v860_v25, %v864_v26  ;;  %v8588_v33 = vcombine.high %v1115_v27, %v1119_v28  ;;  %v8333_v41 = vcombine.low %v860_v25, %v864_v26  ;;  %v880_v49 = vld [vmem:[#allocation8 + $0x428] sm:$0xff]  ;;  %v1131_v53 = vld [vmem:[#allocation8 + $0xc00] sm:$0xff] }
 0x1a4   :  { %v8587_v42 = vcombine.low %v1115_v27, %v1119_v28  ;;  %v8342_v44 = vcombine.high %v868_v35, %v872_v37  ;;  %v8596_v45 = vcombine.high %v1123_v0, %v1127_v40  ;;  %v1139_v59 = vld [vmem:[#allocation8 + $0xc40] sm:$0xff]  ;;  %v884_v61 = vld [vmem:[#allocation8 + $0x448] sm:$0xff] }
 0x1a5   :  { %v1143_v60 = vld [vmem:[#allocation8 + $0xc60] sm:$0xff]  ;;  %v892_v4 = vld [vmem:[#allocation8 + $0x488] sm:$0xff] }
 0x1a6   :  { %4052 = vmatpush1.bf16.msra.mxu1 %v8293_v54  ;;  %3966 = vmatpush1.bf16.msra.mxu0 %v8547_v55  ;;  %v1135_v54 = vld [vmem:[#allocation8 + $0xc20] sm:$0xff]  ;;  %v8341_v55 = vcombine.low %v868_v35, %v872_v37  ;;  %v896_v5 = vld [vmem:[#allocation8 + $0x4a8] sm:$0xff] }
 0x1a7   :  { %4053 = vmatprep.subr.bf16.mxu1 %v8302_v56  ;;  %3967 = vmatprep.subr.bf16.mxu0 %v8556_v57  ;;  %v8595_v56 = vcombine.low %v1123_v0, %v1127_v40  ;;  %v8350_v57 = vcombine.high %v876_v46, %v880_v49  ;;  %v8604_v58 = vcombine.high %v1131_v53, %v1135_v54  ;;  %v1147_v6 = vld [vmem:[#allocation8 + $0xc80] sm:$0xff]  ;;  %v900_v12 = vld [vmem:[#allocation8 + $0x4c8] sm:$0xff] }
 0x1a8   :  { %v904_v19 = vld [vmem:[#allocation8 + $0x4e8] sm:$0xff]  ;;  %v1155_v20 = vld [vmem:[#allocation8 + $0xcc0] sm:$0xff] }
 0x1a9   :  { %v908_v26 = vld [vmem:[#allocation8 + $0x508] sm:$0xff]  ;;  %v1163_v28 = vld [vmem:[#allocation8 + $0xd00] sm:$0xff] }
 0x1aa   :  { %4054 = vmatpush1.bf16.msra.mxu1 %v8301_v62  ;;  %3968 = vmatpush1.bf16.msra.mxu0 %v8555_v63  ;;  %v888_v62 = vld [vmem:[#allocation8 + $0x468] sm:$0xff]  ;;  %v8349_v63 = vcombine.low %v876_v46, %v880_v49  ;;  %v1171_v40 = vld [vmem:[#allocation8 + $0xd40] sm:$0xff] }
 0x1ab   :  { %4055 = vmatprep.subr.bf16.mxu1 %v8310_v1  ;;  %3969 = vmatprep.subr.bf16.mxu0 %v8564_v2  ;;  %v8603_v1 = vcombine.low %v1131_v53, %v1135_v54  ;;  %v8612_v2 = vcombine.high %v1139_v59, %v1143_v60  ;;  %v8358_v3 = vcombine.high %v884_v61, %v888_v62  ;;  %v912_v27 = vld [vmem:[#allocation8 + $0x528] sm:$0xff]  ;;  %v1179_v54 = vld [vmem:[#allocation8 + $0xd80] sm:$0xff] }
 0x1ac   :  { %v916_v37 = vld [vmem:[#allocation8 + $0x548] sm:$0xff] }
 0x1ad   :  { %v920_v0 = vld [vmem:[#allocation8 + $0x568] sm:$0xff] }
 0x1ae   :  { %4056 = vmatpush1.bf16.msra.mxu1 %v8309_v7  ;;  %3970 = vmatpush1.bf16.msra.mxu0 %v8563_v15  ;;  %v1151_v7 = vld [vmem:[#allocation8 + $0xca0] sm:$0xff]  ;;  %v8357_v15 = vcombine.low %v884_v61, %v888_v62  ;;  %v924_v49 = vld [vmem:[#allocation8 + $0x588] sm:$0xff] }
 0x1af   :  { %4057 = vmatprep.subr.bf16.mxu1 %v8318_v8  ;;  %3971 = vmatprep.subr.bf16.mxu0 %v8572_v9  ;;  %v8611_v8 = vcombine.low %v1139_v59, %v1143_v60  ;;  %v8366_v9 = vcombine.high %v892_v4, %v896_v5  ;;  %v8620_v11 = vcombine.high %v1147_v6, %v1151_v7  ;;  %v928_v53 = vld [vmem:[#allocation8 + $0x5a8] sm:$0xff]  ;;  %v1187_v62 = vld [vmem:[#allocation8 + $0xdc0] sm:$0xff] }
 0x1b0   :  { %v932_v60 = vld [vmem:[#allocation8 + $0x5c8] sm:$0xff] }
 0x1b1   :  { %v936_v61 = vld [vmem:[#allocation8 + $0x5e8] sm:$0xff] }
 0x1b2   :  { %4058 = vmatpush1.bf16.msra.mxu1 %v8317_v21  ;;  %3972 = vmatpush1.bf16.msra.mxu0 %v8571_v22  ;;  %v1159_v21 = vld [vmem:[#allocation8 + $0xce0] sm:$0xff]  ;;  %v8365_v22 = vcombine.low %v892_v4, %v896_v5  ;;  %v940_v5 = vld [vmem:[#allocation8 + $0x608] sm:$0xff] }
 0x1b3   :  { %4059 = vmatprep.subr.bf16.mxu1 %v8326_v23  ;;  %3973 = vmatprep.subr.bf16.mxu0 %v8580_v24  ;;  %v8619_v23 = vcombine.low %v1147_v6, %v1151_v7  ;;  %v8374_v24 = vcombine.high %v900_v12, %v904_v19  ;;  %v8628_v25 = vcombine.high %v1155_v20, %v1159_v21  ;;  %v944_v6 = vld [vmem:[#allocation8 + $0x628] sm:$0xff]  ;;  %v1195_v7 = vld [vmem:[#allocation8 + $0xe00] sm:$0xff] }
 0x1b6   :  { %4060 = vmatpush1.bf16.msra.mxu1 %v8325_v29  ;;  %3974 = vmatpush1.bf16.msra.mxu0 %v8579_v31  ;;  %v1167_v29 = vld [vmem:[#allocation8 + $0xd20] sm:$0xff]  ;;  %v8373_v31 = vcombine.low %v900_v12, %v904_v19  ;;  %v948_v19 = vld [vmem:[#allocation8 + $0x648] sm:$0xff] }
 0x1b7   :  { %4061 = vmatprep.subr.bf16.mxu1 %v8334_v32  ;;  %3975 = vmatprep.subr.bf16.mxu0 %v8588_v33  ;;  %v8627_v32 = vcombine.low %v1155_v20, %v1159_v21  ;;  %v8382_v33 = vcombine.high %v908_v26, %v912_v27  ;;  %v8636_v35 = vcombine.high %v1163_v28, %v1167_v29  ;;  %v952_v20 = vld [vmem:[#allocation8 + $0x668] sm:$0xff]  ;;  %v1203_v21 = vld [vmem:[#allocation8 + $0xe40] sm:$0xff] }
 0x1ba   :  { %4062 = vmatpush1.bf16.msra.mxu1 %v8333_v41  ;;  %3976 = vmatpush1.bf16.msra.mxu0 %v8587_v42  ;;  %v1175_v41 = vld [vmem:[#allocation8 + $0xd60] sm:$0xff]  ;;  %v8381_v42 = vcombine.low %v908_v26, %v912_v27  ;;  %v956_v27 = vld [vmem:[#allocation8 + $0x688] sm:$0xff] }
 0x1bb   :  { %4063 = vmatprep.subr.bf16.mxu1 %v8342_v44  ;;  %3977 = vmatprep.subr.bf16.mxu0 %v8596_v45  ;;  %v8635_v44 = vcombine.low %v1163_v28, %v1167_v29  ;;  %v8390_v45 = vcombine.high %v916_v37, %v920_v0  ;;  %v8644_v46 = vcombine.high %v1171_v40, %v1175_v41  ;;  %v960_v28 = vld [vmem:[#allocation8 + $0x6a8] sm:$0xff]  ;;  %v1211_v29 = vld [vmem:[#allocation8 + $0xe80] sm:$0xff] }
 0x1be   :  { %4064 = vmatpush1.bf16.msra.mxu1 %v8341_v55  ;;  %3978 = vmatpush1.bf16.msra.mxu0 %v8595_v56  ;;  %v1183_v55 = vld [vmem:[#allocation8 + $0xda0] sm:$0xff]  ;;  %v8389_v56 = vcombine.low %v916_v37, %v920_v0  ;;  %v964_v0 = vld [vmem:[#allocation8 + $0x6c8] sm:$0xff] }
 0x1bf   :  { %4076 = vmatprep.subr.bf16.mxu1 %v8350_v57  ;;  %3990 = vmatprep.subr.bf16.mxu0 %v8604_v58  ;;  %v8643_v57 = vcombine.low %v1171_v40, %v1175_v41  ;;  %v8398_v58 = vcombine.high %v924_v49, %v928_v53  ;;  %v8652_v59 = vcombine.high %v1179_v54, %v1183_v55  ;;  %v968_v40 = vld [vmem:[#allocation8 + $0x6e8] sm:$0xff]  ;;  %v1219_v41 = vld [vmem:[#allocation8 + $0xec0] sm:$0xff] }
 0x1c1   :  { %4066 = vmatmul.mubr.bf16.vlgmr.msra.gmra.mrb[12].mxu1 %v10439_v48  ;;  %3980 = vmatmul.mubr.bf16.vlgmr.msra.gmra.mrb[8].mxu0 %v10471_v36 }
 0x1c2   :  { %4077 = vmatpush1.bf16.msra.mxu1 %v8349_v63  ;;  %3991 = vmatpush1.bf16.msra.mxu0 %v8603_v1  ;;  %v1191_v63 = vld [vmem:[#allocation8 + $0xde0] sm:$0xff]  ;;  %v8397_v1 = vcombine.low %v924_v49, %v928_v53  ;;  %v972_v53 = vld [vmem:[#allocation8 + $0x708] sm:$0xff] }
 0x1c3   :  { %4108 = vmatprep.mubr.bf16.mxu1 %v10445_v52  ;;  %3992 = vmatprep.subr.bf16.mxu0 %v8612_v2  ;;  %v8651_v2 = vcombine.low %v1179_v54, %v1183_v55  ;;  %v8660_v4 = vcombine.high %v1187_v62, %v1191_v63  ;;  %v976_v54 = vld [vmem:[#allocation8 + $0x728] sm:$0xff]  ;;  %v1227_v55 = vld [vmem:[#allocation8 + $0xf00] sm:$0xff] }
 0x1c4   :  { %4078 = vmatprep.subr.bf16.mxu1 %v8358_v3  ;;  %4022 = vmatprep.mubr.bf16.mxu0 %v10478_v47  ;;  %v8406_v3 = vcombine.high %v932_v60, %v936_v61 }
 0x1c6   :  { %4079 = vmatpush1.bf16.msra.mxu1 %v8357_v15  ;;  %3993 = vmatpush1.bf16.msra.mxu0 %v8611_v8  ;;  %v1199_v15 = vld [vmem:[#allocation8 + $0xe20] sm:$0xff]  ;;  %v8405_v8 = vcombine.low %v932_v60, %v936_v61  ;;  %v980_v61 = vld [vmem:[#allocation8 + $0x748] sm:$0xff] }
 0x1c7   :  { %4080 = vmatprep.subr.bf16.mxu1 %v8366_v9  ;;  %3994 = vmatprep.subr.bf16.mxu0 %v8620_v11  ;;  %v8659_v9 = vcombine.low %v1187_v62, %v1191_v63  ;;  %v8414_v11 = vcombine.high %v940_v5, %v944_v6  ;;  %v8668_v12 = vcombine.high %v1195_v7, %v1199_v15  ;;  %v984_v62 = vld [vmem:[#allocation8 + $0x768] sm:$0xff]  ;;  %v1235_v63 = vld [vmem:[#allocation8 + $0xf40] sm:$0xff] }
 0x1ca   :  { %4081 = vmatpush1.bf16.msra.mxu1 %v8365_v22  ;;  %3995 = vmatpush1.bf16.msra.mxu0 %v8619_v23  ;;  %v1207_v22 = vld [vmem:[#allocation8 + $0xe60] sm:$0xff]  ;;  %v8413_v23 = vcombine.low %v940_v5, %v944_v6  ;;  %v988_v6 = vld [vmem:[#allocation8 + $0x788] sm:$0xff] }
 0x1cb   :  { %4082 = vmatprep.subr.bf16.mxu1 %v8374_v24  ;;  %3996 = vmatprep.subr.bf16.mxu0 %v8628_v25  ;;  %v8667_v24 = vcombine.low %v1195_v7, %v1199_v15  ;;  %v8422_v25 = vcombine.high %v948_v19, %v952_v20  ;;  %v8676_v26 = vcombine.high %v1203_v21, %v1207_v22  ;;  %v992_v7 = vld [vmem:[#allocation8 + $0x7a8] sm:$0xff]  ;;  %v1243_v15 = vld [vmem:[#allocation8 + $0xf80] sm:$0xff] }
 0x1ce   :  { %4083 = vmatpush1.bf16.msra.mxu1 %v8373_v31  ;;  %3997 = vmatpush1.bf16.msra.mxu0 %v8627_v32  ;;  %v1215_v31 = vld [vmem:[#allocation8 + $0xea0] sm:$0xff]  ;;  %v8421_v32 = vcombine.low %v948_v19, %v952_v20  ;;  %v996_v20 = vld [vmem:[#allocation8 + $0x7c8] sm:$0xff] }
 0x1cf   :  { %4084 = vmatprep.subr.bf16.mxu1 %v8382_v33  ;;  %3998 = vmatprep.subr.bf16.mxu0 %v8636_v35  ;;  %v8675_v33 = vcombine.low %v1203_v21, %v1207_v22  ;;  %v8430_v35 = vcombine.high %v956_v27, %v960_v28  ;;  %v8684_v37 = vcombine.high %v1211_v29, %v1215_v31  ;;  %v1000_v21 = vld [vmem:[#allocation8 + $0x7e8] sm:$0xff]  ;;  %v1251_v22 = vld [vmem:[#allocation8 + $0xfc0] sm:$0xff] }
 0x1d2   :  { %4085 = vmatpush1.bf16.msra.mxu1 %v8381_v42  ;;  %3999 = vmatpush1.bf16.msra.mxu0 %v8635_v44  ;;  %v1223_v42 = vld [vmem:[#allocation8 + $0xee0] sm:$0xff]  ;;  %v8429_v44 = vcombine.low %v956_v27, %v960_v28  ;;  %v1004_v28 = vld [vmem:[#allocation8 + $0x808] sm:$0xff] }
 0x1d3   :  { %4086 = vmatprep.subr.bf16.mxu1 %v8390_v45  ;;  %4000 = vmatprep.subr.bf16.mxu0 %v8644_v46  ;;  %v8683_v45 = vcombine.low %v1211_v29, %v1215_v31  ;;  %v8438_v46 = vcombine.high %v964_v0, %v968_v40  ;;  %v8692_v49 = vcombine.high %v1219_v41, %v1223_v42  ;;  %v1008_v29 = vld [vmem:[#allocation8 + $0x828] sm:$0xff]  ;;  %v749_v31 = vld [vmem:[#allocation8 + $0x10] sm:$0xff] }
 0x1d6   :  { %4087 = vmatpush1.bf16.msra.mxu1 %v8389_v56  ;;  %4001 = vmatpush1.bf16.msra.mxu0 %v8643_v57  ;;  %v1231_v56 = vld [vmem:[#allocation8 + $0xf20] sm:$0xff]  ;;  %v8437_v57 = vcombine.low %v964_v0, %v968_v40  ;;  %v1012_v40 = vld [vmem:[#allocation8 + $0x848] sm:$0xff] }
 0x1d7   :  { %4088 = vmatprep.subr.bf16.mxu1 %v8398_v58  ;;  %4002 = vmatprep.subr.bf16.mxu0 %v8652_v59  ;;  %v8691_v58 = vcombine.low %v1219_v41, %v1223_v42  ;;  %v8446_v59 = vcombine.high %v972_v53, %v976_v54  ;;  %v8700_v60 = vcombine.high %v1227_v55, %v1231_v56  ;;  %v1016_v41 = vld [vmem:[#allocation8 + $0x868] sm:$0xff] }
 0x1d8   :  { %v8477_v42 = vcombine.low %v1004_v28, %v1008_v29 }
 0x1da   :  { %4089 = vmatpush1.bf16.msra.mxu1 %v8397_v1  ;;  %4003 = vmatpush1.bf16.msra.mxu0 %v8651_v2  ;;  %v1239_v1 = vld [vmem:[#allocation8 + $0xf60] sm:$0xff]  ;;  %v8445_v2 = vcombine.low %v972_v53, %v976_v54  ;;  %v1020_v53 = vld [vmem:[#allocation8 + $0x888] sm:$0xff] }
 0x1db   :  { %4090 = vmatprep.subr.bf16.mxu1 %v8406_v3  ;;  %4004 = vmatprep.subr.bf16.mxu0 %v8660_v4  ;;  %v8699_v3 = vcombine.low %v1227_v55, %v1231_v56  ;;  %v8454_v4 = vcombine.high %v980_v61, %v984_v62  ;;  %v8708_v5 = vcombine.high %v1235_v63, %v1239_v1  ;;  %v1024_v54 = vld [vmem:[#allocation8 + $0x8a8] sm:$0xff]  ;;  %v765_v56 = vld [vmem:[#allocation8 + $0x90] sm:$0xff] }
 0x1de   :  { %4091 = vmatpush1.bf16.msra.mxu1 %v8405_v8  ;;  %4005 = vmatpush1.bf16.msra.mxu0 %v8659_v9  ;;  %v1247_v8 = vld [vmem:[#allocation8 + $0xfa0] sm:$0xff]  ;;  %v8453_v9 = vcombine.low %v980_v61, %v984_v62  ;;  %v1028_v62 = vld [vmem:[#allocation8 + $0x8c8] sm:$0xff] }
 0x1df   :  { %4092 = vmatprep.subr.bf16.mxu1 %v8414_v11  ;;  %4006 = vmatprep.subr.bf16.mxu0 %v8668_v12  ;;  %v8707_v11 = vcombine.low %v1235_v63, %v1239_v1  ;;  %v8462_v12 = vcombine.high %v988_v6, %v992_v7  ;;  %v8716_v19 = vcombine.high %v1243_v15, %v1247_v8  ;;  %v1032_v63 = vld [vmem:[#allocation8 + $0x8e8] sm:$0xff]  ;;  %v773_v1 = vld [vmem:[#allocation8 + $0xd0] sm:$0xff] }
 0x1e2   :  { %4093 = vmatpush1.bf16.msra.mxu1 %v8413_v23  ;;  %4007 = vmatpush1.bf16.msra.mxu0 %v8667_v24  ;;  %v1255_v23 = vld [vmem:[#allocation8 + $0xfe0] sm:$0xff]  ;;  %v8461_v24 = vcombine.low %v988_v6, %v992_v7  ;;  %v1036_v7 = vld [vmem:[#allocation8 + $0x908] sm:$0xff] }
 0x1e3   :  { %4094 = vmatprep.subr.bf16.mxu1 %v8422_v25  ;;  %4008 = vmatprep.subr.bf16.mxu0 %v8676_v26  ;;  %v8715_v25 = vcombine.low %v1243_v15, %v1247_v8  ;;  %v8470_v26 = vcombine.high %v996_v20, %v1000_v21  ;;  %v8724_v27 = vcombine.high %v1251_v22, %v1255_v23  ;;  %v1040_v15 = vld [vmem:[#allocation8 + $0x928] sm:$0xff]  ;;  %v781_v8 = vld [vmem:[#allocation8 + $0x110] sm:$0xff] }
 0x1e6   :  { %4095 = vmatpush1.bf16.msra.mxu1 %v8421_v32  ;;  %4009 = vmatpush1.bf16.msra.mxu0 %v8675_v33  ;;  %v753_v32 = vld [vmem:[#allocation8 + $0x30] sm:$0xff]  ;;  %v8469_v33 = vcombine.low %v996_v20, %v1000_v21  ;;  %v1044_v21 = vld [vmem:[#allocation8 + $0x948] sm:$0xff] }
 0x1e7   :  { %4096 = vmatprep.subr.bf16.mxu1 %v8430_v35  ;;  %4010 = vmatprep.subr.bf16.mxu0 %v8684_v37  ;;  %v8723_v35 = vcombine.low %v1251_v22, %v1255_v23  ;;  %v8478_v37 = vcombine.high %v1004_v28, %v1008_v29  ;;  %v8224_v0 = vcombine.high %v749_v31, %v753_v32  ;;  %v1048_v22 = vld [vmem:[#allocation8 + $0x968] sm:$0xff]  ;;  %v789_v23 = vld [vmem:[#allocation8 + $0x150] sm:$0xff] }
 0x1e8   :  { %v1052_v29 = vld [vmem:[#allocation8 + $0x988] sm:$0xff] }
 0x1ea   :  { %4097 = vmatpush1.bf16.msra.mxu1 %v8429_v44  ;;  %4011 = vmatpush1.bf16.msra.mxu0 %v8683_v45  ;;  %v757_v44 = vld [vmem:[#allocation8 + $0x50] sm:$0xff] }
 0x1eb   :  { %4098 = vmatprep.subr.bf16.mxu1 %v8438_v46  ;;  %4012 = vmatprep.subr.bf16.mxu0 %v8692_v49  ;;  %v761_v45 = vld [vmem:[#allocation8 + $0x70] sm:$0xff]  ;;  %v8223_v46 = vcombine.low %v749_v31, %v753_v32  ;;  %v8486_v49 = vcombine.high %v1012_v40, %v1016_v41  ;;  %v1056_v31 = vld [vmem:[#allocation8 + $0x9a8] sm:$0xff] }
 0x1ec   :  { %v8232_v55 = vcombine.high %v757_v44, %v761_v45  ;;  %v797_v32 = vld [vmem:[#allocation8 + $0x190] sm:$0xff] }
 0x1ee   :  { %4099 = vmatpush1.bf16.msra.mxu1 %v8437_v57  ;;  %4013 = vmatpush1.bf16.msra.mxu0 %v8691_v58  ;;  %v769_v57 = vld [vmem:[#allocation8 + $0xb0] sm:$0xff]  ;;  %v8485_v58 = vcombine.low %v1012_v40, %v1016_v41  ;;  %v1060_v41 = vld [vmem:[#allocation8 + $0x9c8] sm:$0xff] }
 0x1ef   :  { %4100 = vmatprep.subr.bf16.mxu1 %v8446_v59  ;;  %4014 = vmatprep.subr.bf16.mxu0 %v8700_v60  ;;  %v8231_v59 = vcombine.low %v757_v44, %v761_v45  ;;  %v8494_v60 = vcombine.high %v1020_v53, %v1024_v54  ;;  %v8240_v61 = vcombine.high %v765_v56, %v769_v57  ;;  %v805_v44 = vld [vmem:[#allocation8 + $0x1d0] sm:$0xff] }
 0x1f0   :  { %v809_v45 = vld [vmem:[#allocation8 + $0x1f0] sm:$0xff] }
 0x1f2   :  { %4101 = vmatpush1.bf16.msra.mxu1 %v8445_v2  ;;  %4015 = vmatpush1.bf16.msra.mxu0 %v8699_v3  ;;  %v777_v2 = vld [vmem:[#allocation8 + $0xf0] sm:$0xff]  ;;  %v8493_v3 = vcombine.low %v1020_v53, %v1024_v54  ;;  %v8280_v54 = vcombine.high %v805_v44, %v809_v45 }
 0x1f3   :  { %4102 = vmatprep.subr.bf16.mxu1 %v8454_v4  ;;  %4016 = vmatprep.subr.bf16.mxu0 %v8708_v5  ;;  %v8239_v4 = vcombine.low %v765_v56, %v769_v57  ;;  %v8502_v5 = vcombine.high %v1028_v62, %v1032_v63  ;;  %v8248_v6 = vcombine.high %v773_v1, %v777_v2  ;;  %v1072_v56 = vld [vmem:[#allocation8 + $0xa28] sm:$0xff]  ;;  %v813_v57 = vld [vmem:[#allocation8 + $0x210] sm:$0xff] }
 0x1f6   :  { %4103 = vmatpush1.bf16.msra.mxu1 %v8453_v9  ;;  %4017 = vmatpush1.bf16.msra.mxu0 %v8707_v11  ;;  %v785_v9 = vld [vmem:[#allocation8 + $0x130] sm:$0xff]  ;;  %v8501_v11 = vcombine.low %v1028_v62, %v1032_v63  ;;  %v1076_v63 = vld [vmem:[#allocation8 + $0xa48] sm:$0xff] }
 0x1f7   :  { %4104 = vmatprep.subr.bf16.mxu1 %v8462_v12  ;;  %4018 = vmatprep.subr.bf16.mxu0 %v8716_v19  ;;  %v8247_v12 = vcombine.low %v773_v1, %v777_v2  ;;  %v8510_v19 = vcombine.high %v1036_v7, %v1040_v15  ;;  %v8256_v20 = vcombine.high %v781_v8, %v785_v9  ;;  %v1080_v1 = vld [vmem:[#allocation8 + $0xa68] sm:$0xff]  ;;  %v821_v2 = vld [vmem:[#allocation8 + $0x250] sm:$0xff] }
 0x1fa   :  { %4105 = vmatpush1.bf16.msra.mxu1 %v8461_v24  ;;  %4019 = vmatpush1.bf16.msra.mxu0 %v8715_v25  ;;  %v793_v24 = vld [vmem:[#allocation8 + $0x170] sm:$0xff]  ;;  %v8509_v25 = vcombine.low %v1036_v7, %v1040_v15  ;;  %v1084_v15 = vld [vmem:[#allocation8 + $0xa88] sm:$0xff] }
 0x1fb   :  { %4106 = vmatprep.subr.bf16.mxu1 %v8470_v26  ;;  %4020 = vmatprep.subr.bf16.mxu0 %v8724_v27  ;;  %v8255_v26 = vcombine.low %v781_v8, %v785_v9  ;;  %v8518_v27 = vcombine.high %v1044_v21, %v1048_v22  ;;  %v8264_v28 = vcombine.high %v789_v23, %v793_v24  ;;  %v1088_v8 = vld [vmem:[#allocation8 + $0xaa8] sm:$0xff]  ;;  %v829_v9 = vld [vmem:[#allocation8 + $0x290] sm:$0xff] }
 0x1fe   :  { %4107 = vmatpush1.bf16.msra.mxu1 %v8469_v33  ;;  %4021 = vmatpush1.bf16.msra.mxu0 %v8723_v35  ;;  %v801_v33 = vld [vmem:[#allocation8 + $0x1b0] sm:$0xff]  ;;  %v8517_v35 = vcombine.low %v1044_v21, %v1048_v22  ;;  %v1092_v22 = vld [vmem:[#allocation8 + $0xac8] sm:$0xff] }
 0x1ff   :  { %4119 = vmatprep.subr.bf16.mxu1 %v8478_v37  ;;  %4205 = vmatprep.subr.bf16.mxu0 %v8224_v0  ;;  %v8263_v37 = vcombine.low %v789_v23, %v793_v24  ;;  %v8526_v0 = vcombine.high %v1052_v29, %v1056_v31  ;;  %v8272_v40 = vcombine.high %v797_v32, %v801_v33  ;;  %v1096_v23 = vld [vmem:[#allocation8 + $0xae8] sm:$0xff]  ;;  %v837_v24 = vld [vmem:[#allocation8 + $0x2d0] sm:$0xff] }
 0x201   :  { %4109 = vmatmul.mubr.bf16.vlgmr.msra.gmra.mrb[12].mxu1 %v10441_v50  ;;  %4023 = vmatmul.mubr.bf16.vlgmr.msra.gmra.mrb[8].mxu0 %v10475_v43 }
 0x202   :  { %4120 = vmatpush1.bf16.msra.mxu1 %v8477_v42  ;;  %4151 = vmatprep.mubr.bf16.mxu1 %v10473_v39  ;;  %v1064_v42 = vld [vmem:[#allocation8 + $0x9e8] sm:$0xff] }
 0x203   :  { %4206 = vmatpush1.bf16.msra.mxu0 %v8223_v46  ;;  %4237 = vmatprep.mubr.bf16.mxu0 %v10443_v51  ;;  %v8525_v46 = vcombine.low %v1052_v29, %v1056_v31  ;;  %v8534_v53 = vcombine.high %v1060_v41, %v1064_v42  ;;  %v1100_v31 = vld [vmem:[#allocation8 + $0xb08] sm:$0xff] }
 0x204   :  { %4121 = vmatprep.subr.bf16.mxu1 %v8486_v49  ;;  %4207 = vmatprep.subr.bf16.mxu0 %v8232_v55  ;;  %v8271_v49 = vcombine.low %v797_v32, %v801_v33  ;;  %v1068_v55 = vld [vmem:[#allocation8 + $0xa08] sm:$0xff]  ;;  %v845_v33 = vld [vmem:[#allocation8 + $0x310] sm:$0xff] }
 0x205   :  { %v1104_v32 = vld [vmem:[#allocation8 + $0xb28] sm:$0xff] }
 0x206   :  { %4122 = vmatpush1.bf16.msra.mxu1 %v8485_v58  ;;  %v817_v58 = vld [vmem:[#allocation8 + $0x230] sm:$0xff] }
 0x207   :  { %4208 = vmatpush1.bf16.msra.mxu0 %v8231_v59  ;;  %4123 = vmatprep.subr.bf16.mxu1 %v8494_v60  ;;  %v8533_v59 = vcombine.low %v1060_v41, %v1064_v42  ;;  %v8279_v60 = vcombine.low %v805_v44, %v809_v45  ;;  %v8288_v62 = vcombine.high %v813_v57, %v817_v58  ;;  %v1108_v42 = vld [vmem:[#allocation8 + $0xb48] sm:$0xff]  ;;  %v853_v45 = vld [vmem:[#allocation8 + $0x350] sm:$0xff] }
 0x208   :  { %4209 = vmatprep.subr.bf16.mxu0 %v8240_v61  ;;  %v8542_v61 = vcombine.high %v1068_v55, %v1072_v56  ;;  %v1112_v44 = vld [vmem:[#allocation8 + $0xb68] sm:$0xff] }
 0x20a   :  { %4124 = vmatpush1.bf16.msra.mxu1 %v8493_v3  ;;  %v825_v3 = vld [vmem:[#allocation8 + $0x270] sm:$0xff] }
 0x20b   :  { %4210 = vmatpush1.bf16.msra.mxu0 %v8239_v4  ;;  %4125 = vmatprep.subr.bf16.mxu1 %v8502_v5  ;;  %v8541_v4 = vcombine.low %v1068_v55, %v1072_v56  ;;  %v8287_v5 = vcombine.low %v813_v57, %v817_v58  ;;  %v8296_v7 = vcombine.high %v821_v2, %v825_v3  ;;  %v1116_v56 = vld [vmem:[#allocation8 + $0xb88] sm:$0xff]  ;;  %v861_v58 = vld [vmem:[#allocation8 + $0x390] sm:$0xff] }
 0x20c   :  { %4211 = vmatprep.subr.bf16.mxu0 %v8248_v6  ;;  %v8550_v6 = vcombine.high %v1076_v63, %v1080_v1  ;;  %v1120_v57 = vld [vmem:[#allocation8 + $0xba8] sm:$0xff] }
 0x20e   :  { %4126 = vmatpush1.bf16.msra.mxu1 %v8501_v11  ;;  %v833_v11 = vld [vmem:[#allocation8 + $0x2b0] sm:$0xff] }
 0x20f   :  { %4212 = vmatpush1.bf16.msra.mxu0 %v8247_v12  ;;  %4127 = vmatprep.subr.bf16.mxu1 %v8510_v19  ;;  %v8549_v12 = vcombine.low %v1076_v63, %v1080_v1  ;;  %v8295_v19 = vcombine.low %v821_v2, %v825_v3  ;;  %v8304_v21 = vcombine.high %v829_v9, %v833_v11  ;;  %v1124_v1 = vld [vmem:[#allocation8 + $0xbc8] sm:$0xff]  ;;  %v869_v3 = vld [vmem:[#allocation8 + $0x3d0] sm:$0xff] }
 0x210   :  { %4213 = vmatprep.subr.bf16.mxu0 %v8256_v20  ;;  %v8558_v20 = vcombine.high %v1084_v15, %v1088_v8  ;;  %v1128_v2 = vld [vmem:[#allocation8 + $0xbe8] sm:$0xff] }
 0x212   :  { %4128 = vmatpush1.bf16.msra.mxu1 %v8509_v25  ;;  %v841_v25 = vld [vmem:[#allocation8 + $0x2f0] sm:$0xff] }
 0x213   :  { %4214 = vmatpush1.bf16.msra.mxu0 %v8255_v26  ;;  %4129 = vmatprep.subr.bf16.mxu1 %v8518_v27  ;;  %v8557_v26 = vcombine.low %v1084_v15, %v1088_v8  ;;  %v8303_v27 = vcombine.low %v829_v9, %v833_v11  ;;  %v8312_v29 = vcombine.high %v837_v24, %v841_v25  ;;  %v1132_v8 = vld [vmem:[#allocation8 + $0xc08] sm:$0xff]  ;;  %v877_v11 = vld [vmem:[#allocation8 + $0x410] sm:$0xff] }
 0x214   :  { %4215 = vmatprep.subr.bf16.mxu0 %v8264_v28  ;;  %v8566_v28 = vcombine.high %v1092_v22, %v1096_v23  ;;  %v1136_v9 = vld [vmem:[#allocation8 + $0xc28] sm:$0xff] }
 0x216   :  { %4130 = vmatpush1.bf16.msra.mxu1 %v8517_v35  ;;  %v849_v35 = vld [vmem:[#allocation8 + $0x330] sm:$0xff] }
 0x217   :  { %4216 = vmatpush1.bf16.msra.mxu0 %v8263_v37  ;;  %4131 = vmatprep.subr.bf16.mxu1 %v8526_v0  ;;  %v8565_v37 = vcombine.low %v1092_v22, %v1096_v23  ;;  %v8311_v0 = vcombine.low %v837_v24, %v841_v25  ;;  %v8320_v41 = vcombine.high %v845_v33, %v849_v35  ;;  %v1140_v23 = vld [vmem:[#allocation8 + $0xc48] sm:$0xff] }
 0x218   :  { %4217 = vmatprep.subr.bf16.mxu0 %v8272_v40  ;;  %v8574_v40 = vcombine.high %v1100_v31, %v1104_v32  ;;  %v1144_v24 = vld [vmem:[#allocation8 + $0xc68] sm:$0xff]  ;;  %v8605_v25 = vcombine.low %v1132_v8, %v1136_v9 }
 0x21a   :  { %4132 = vmatpush1.bf16.msra.mxu1 %v8525_v46  ;;  %v857_v46 = vld [vmem:[#allocation8 + $0x370] sm:$0xff] }
 0x21b   :  { %4218 = vmatpush1.bf16.msra.mxu0 %v8271_v49  ;;  %4133 = vmatprep.subr.bf16.mxu1 %v8534_v53  ;;  %v8573_v49 = vcombine.low %v1100_v31, %v1104_v32  ;;  %v8319_v53 = vcombine.low %v845_v33, %v849_v35  ;;  %v8328_v55 = vcombine.high %v853_v45, %v857_v46  ;;  %v1148_v31 = vld [vmem:[#allocation8 + $0xc88] sm:$0xff]  ;;  %v893_v35 = vld [vmem:[#allocation8 + $0x490] sm:$0xff] }
 0x21c   :  { %4219 = vmatprep.subr.bf16.mxu0 %v8280_v54  ;;  %v8582_v54 = vcombine.high %v1108_v42, %v1112_v44  ;;  %v1152_v32 = vld [vmem:[#allocation8 + $0xca8] sm:$0xff] }
 0x21e   :  { %4134 = vmatpush1.bf16.msra.mxu1 %v8533_v59  ;;  %v865_v59 = vld [vmem:[#allocation8 + $0x3b0] sm:$0xff] }
 0x21f   :  { %4220 = vmatpush1.bf16.msra.mxu0 %v8279_v60  ;;  %4135 = vmatprep.subr.bf16.mxu1 %v8542_v61  ;;  %v8581_v60 = vcombine.low %v1108_v42, %v1112_v44  ;;  %v8327_v61 = vcombine.low %v853_v45, %v857_v46  ;;  %v8336_v63 = vcombine.high %v861_v58, %v865_v59  ;;  %v1156_v44 = vld [vmem:[#allocation8 + $0xcc8] sm:$0xff]  ;;  %v901_v46 = vld [vmem:[#allocation8 + $0x4d0] sm:$0xff] }
 0x220   :  { %4221 = vmatprep.subr.bf16.mxu0 %v8288_v62  ;;  %v8590_v62 = vcombine.high %v1116_v56, %v1120_v57  ;;  %v1160_v45 = vld [vmem:[#allocation8 + $0xce8] sm:$0xff] }
 0x222   :  { %4136 = vmatpush1.bf16.msra.mxu1 %v8541_v4  ;;  %v873_v4 = vld [vmem:[#allocation8 + $0x3f0] sm:$0xff] }
 0x223   :  { %4222 = vmatpush1.bf16.msra.mxu0 %v8287_v5  ;;  %4137 = vmatprep.subr.bf16.mxu1 %v8550_v6  ;;  %v8589_v5 = vcombine.low %v1116_v56, %v1120_v57  ;;  %v8335_v6 = vcombine.low %v861_v58, %v865_v59  ;;  %v8344_v15 = vcombine.high %v869_v3, %v873_v4  ;;  %v1164_v57 = vld [vmem:[#allocation8 + $0xd08] sm:$0xff]  ;;  %v909_v59 = vld [vmem:[#allocation8 + $0x510] sm:$0xff] }
 0x224   :  { %4223 = vmatprep.subr.bf16.mxu0 %v8296_v7  ;;  %v8598_v7 = vcombine.high %v1124_v1, %v1128_v2  ;;  %v1168_v58 = vld [vmem:[#allocation8 + $0xd28] sm:$0xff] }
 0x226   :  { %4138 = vmatpush1.bf16.msra.mxu1 %v8549_v12  ;;  %v881_v12 = vld [vmem:[#allocation8 + $0x430] sm:$0xff] }
 0x227   :  { %4224 = vmatpush1.bf16.msra.mxu0 %v8295_v19  ;;  %4139 = vmatprep.subr.bf16.mxu1 %v8558_v20  ;;  %v8597_v19 = vcombine.low %v1124_v1, %v1128_v2  ;;  %v8343_v20 = vcombine.low %v869_v3, %v873_v4  ;;  %v8352_v22 = vcombine.high %v877_v11, %v881_v12  ;;  %v1172_v2 = vld [vmem:[#allocation8 + $0xd48] sm:$0xff]  ;;  %v917_v4 = vld [vmem:[#allocation8 + $0x550] sm:$0xff] }
 0x228   :  { %4225 = vmatprep.subr.bf16.mxu0 %v8304_v21  ;;  %v8606_v21 = vcombine.high %v1132_v8, %v1136_v9  ;;  %v1176_v3 = vld [vmem:[#allocation8 + $0xd68] sm:$0xff] }
 0x229   :  { %v1180_v9 = vld [vmem:[#allocation8 + $0xd88] sm:$0xff] }
 0x22a   :  { %4140 = vmatpush1.bf16.msra.mxu1 %v8557_v26  ;;  %v885_v26 = vld [vmem:[#allocation8 + $0x450] sm:$0xff] }
 0x22b   :  { %4226 = vmatpush1.bf16.msra.mxu0 %v8303_v27  ;;  %4141 = vmatprep.subr.bf16.mxu1 %v8566_v28  ;;  %v889_v27 = vld [vmem:[#allocation8 + $0x470] sm:$0xff]  ;;  %v8351_v28 = vcombine.low %v877_v11, %v881_v12  ;;  %v1184_v11 = vld [vmem:[#allocation8 + $0xda8] sm:$0xff] }
 0x22c   :  { %4227 = vmatprep.subr.bf16.mxu0 %v8312_v29  ;;  %v8614_v29 = vcombine.high %v1140_v23, %v1144_v24  ;;  %v8360_v33 = vcombine.high %v885_v26, %v889_v27  ;;  %v925_v12 = vld [vmem:[#allocation8 + $0x590] sm:$0xff] }
 0x22e   :  { %4142 = vmatpush1.bf16.msra.mxu1 %v8565_v37  ;;  %v897_v37 = vld [vmem:[#allocation8 + $0x4b0] sm:$0xff] }
 0x22f   :  { %4228 = vmatpush1.bf16.msra.mxu0 %v8311_v0  ;;  %4143 = vmatprep.subr.bf16.mxu1 %v8574_v40  ;;  %v8613_v0 = vcombine.low %v1140_v23, %v1144_v24  ;;  %v8359_v40 = vcombine.low %v885_v26, %v889_v27  ;;  %v8368_v42 = vcombine.high %v893_v35, %v897_v37  ;;  %v1192_v26 = vld [vmem:[#allocation8 + $0xde8] sm:$0xff] }
 0x230   :  { %4229 = vmatprep.subr.bf16.mxu0 %v8320_v41  ;;  %v8622_v41 = vcombine.high %v1148_v31, %v1152_v32 }
 0x232   :  { %4144 = vmatpush1.bf16.msra.mxu1 %v8573_v49  ;;  %v905_v49 = vld [vmem:[#allocation8 + $0x4f0] sm:$0xff] }
 0x233   :  { %4230 = vmatpush1.bf16.msra.mxu0 %v8319_v53  ;;  %4145 = vmatprep.subr.bf16.mxu1 %v8582_v54  ;;  %v8621_v53 = vcombine.low %v1148_v31, %v1152_v32  ;;  %v8367_v54 = vcombine.low %v893_v35, %v897_v37  ;;  %v8376_v56 = vcombine.high %v901_v46, %v905_v49 }
 0x234   :  { %4231 = vmatprep.subr.bf16.mxu0 %v8328_v55  ;;  %v8630_v55 = vcombine.high %v1156_v44, %v1160_v45  ;;  %v8653_v32 = vcombine.low %v1180_v9, %v1184_v11 }
 0x236   :  { %4146 = vmatpush1.bf16.msra.mxu1 %v8581_v60  ;;  %v913_v60 = vld [vmem:[#allocation8 + $0x530] sm:$0xff] }
 0x237   :  { %4232 = vmatpush1.bf16.msra.mxu0 %v8327_v61  ;;  %4147 = vmatprep.subr.bf16.mxu1 %v8590_v62  ;;  %v8629_v61 = vcombine.low %v1156_v44, %v1160_v45  ;;  %v8375_v62 = vcombine.low %v901_v46, %v905_v49  ;;  %v8384_v1 = vcombine.high %v909_v59, %v913_v60  ;;  %v945_v44 = vld [vmem:[#allocation8 + $0x630] sm:$0xff] }
 0x238   :  { %4233 = vmatprep.subr.bf16.mxu0 %v8336_v63  ;;  %v8638_v63 = vcombine.high %v1164_v57, %v1168_v58 }
 0x23a   :  { %4148 = vmatpush1.bf16.msra.mxu1 %v8589_v5  ;;  %v921_v5 = vld [vmem:[#allocation8 + $0x570] sm:$0xff] }
 0x23b   :  { %4234 = vmatpush1.bf16.msra.mxu0 %v8335_v6  ;;  %4149 = vmatprep.subr.bf16.mxu1 %v8598_v7  ;;  %v8637_v6 = vcombine.low %v1164_v57, %v1168_v58  ;;  %v8383_v7 = vcombine.low %v909_v59, %v913_v60  ;;  %v8392_v8 = vcombine.high %v917_v4, %v921_v5  ;;  %v953_v57 = vld [vmem:[#allocation8 + $0x670] sm:$0xff] }
 0x23c   :  { %4235 = vmatprep.subr.bf16.mxu0 %v8344_v15  ;;  %v8646_v15 = vcombine.high %v1172_v2, %v1176_v3 }
 0x23e   :  { %4150 = vmatpush1.bf16.msra.mxu1 %v8597_v19  ;;  %v929_v19 = vld [vmem:[#allocation8 + $0x5b0] sm:$0xff] }
 0x23f   :  { %4236 = vmatpush1.bf16.msra.mxu0 %v8343_v20  ;;  %4162 = vmatprep.subr.bf16.mxu1 %v8606_v21  ;;  %v8645_v20 = vcombine.low %v1172_v2, %v1176_v3  ;;  %v8391_v21 = vcombine.low %v917_v4, %v921_v5  ;;  %v8400_v24 = vcombine.high %v925_v12, %v929_v19  ;;  %v961_v2 = vld [vmem:[#allocation8 + $0x6b0] sm:$0xff] }
 0x240   :  { %4248 = vmatprep.subr.bf16.mxu0 %v8352_v22  ;;  %v8654_v22 = vcombine.high %v1180_v9, %v1184_v11  ;;  %v8399_v35 = vcombine.low %v925_v12, %v929_v19  ;;  %v969_v9 = vld [vmem:[#allocation8 + $0x6f0] sm:$0xff] }
 0x241   :  { %4152 = vmatmul.mubr.bf16.vlgmr.msra.gmra.mrb[12].mxu1 %v10471_v36 }
 0x242   :  { %4238 = vmatmul.mubr.bf16.vlgmr.msra.gmra.mrb[12].mxu0 %v10439_v48  ;;  %4163 = vmatpush1.bf16.msra.mxu1 %v8605_v25  ;;  %v1188_v25 = vld [vmem:[#allocation8 + $0xdc8] sm:$0xff] }
 0x243   :  { %4194 = vmatprep.mubr.bf16.mxu1 %v10478_v47  ;;  %4249 = vmatpush1.bf16.msra.mxu0 %v8351_v28  ;;  %v933_v28 = vld [vmem:[#allocation8 + $0x5d0] sm:$0xff]  ;;  %v8662_v37 = vcombine.high %v1188_v25, %v1192_v26  ;;  %v8661_v45 = vcombine.low %v1188_v25, %v1192_v26 }
 0x244   :  { %4280 = vmatprep.mubr.bf16.mxu0 %v10445_v52  ;;  %4164 = vmatprep.subr.bf16.mxu1 %v8614_v29  ;;  %v937_v29 = vld [vmem:[#allocation8 + $0x5f0] sm:$0xff] }
 0x245   :  { %4250 = vmatprep.subr.bf16.mxu0 %v8360_v33  ;;  %v8407_v46 = vcombine.low %v933_v28, %v937_v29  ;;  %v977_v25 = vld [vmem:[#allocation8 + $0x730] sm:$0xff] }
 0x246   :  { %4165 = vmatpush1.bf16.msra.mxu1 %v8613_v0  ;;  %v8408_v0 = vcombine.high %v933_v28, %v937_v29 }
 0x247   :  { %4251 = vmatpush1.bf16.msra.mxu0 %v8359_v40  ;;  %4166 = vmatprep.subr.bf16.mxu1 %v8622_v41  ;;  %v1196_v40 = vld [vmem:[#allocation8 + $0xe08] sm:$0xff] }
 0x248   :  { %4252 = vmatprep.subr.bf16.mxu0 %v8368_v42  ;;  %v1200_v41 = vld [vmem:[#allocation8 + $0xe28] sm:$0xff]  ;;  %v941_v42 = vld [vmem:[#allocation8 + $0x610] sm:$0xff] }
 0x249   :  { %v8670_v49 = vcombine.high %v1196_v40, %v1200_v41  ;;  %v8669_v58 = vcombine.low %v1196_v40, %v1200_v41  ;;  %v8415_v59 = vcombine.low %v941_v42, %v945_v44  ;;  %v985_v40 = vld [vmem:[#allocation8 + $0x770] sm:$0xff] }
 0x24a   :  { %4167 = vmatpush1.bf16.msra.mxu1 %v8621_v53  ;;  %v8416_v53 = vcombine.high %v941_v42, %v945_v44 }
 0x24b   :  { %4253 = vmatpush1.bf16.msra.mxu0 %v8367_v54  ;;  %4168 = vmatprep.subr.bf16.mxu1 %v8630_v55  ;;  %v1204_v54 = vld [vmem:[#allocation8 + $0xe48] sm:$0xff] }
 0x24c   :  { %4254 = vmatprep.subr.bf16.mxu0 %v8376_v56  ;;  %v1208_v55 = vld [vmem:[#allocation8 + $0xe68] sm:$0xff]  ;;  %v949_v56 = vld [vmem:[#allocation8 + $0x650] sm:$0xff] }
 0x24d   :  { %v8678_v60 = vcombine.high %v1204_v54, %v1208_v55  ;;  %v8677_v3 = vcombine.low %v1204_v54, %v1208_v55  ;;  %v8423_v4 = vcombine.low %v949_v56, %v953_v57  ;;  %v993_v54 = vld [vmem:[#allocation8 + $0x7b0] sm:$0xff] }
 0x24e   :  { %4169 = vmatpush1.bf16.msra.mxu1 %v8629_v61  ;;  %v8424_v61 = vcombine.high %v949_v56, %v953_v57 }
 0x24f   :  { %4255 = vmatpush1.bf16.msra.mxu0 %v8375_v62  ;;  %4170 = vmatprep.subr.bf16.mxu1 %v8638_v63  ;;  %v1212_v62 = vld [vmem:[#allocation8 + $0xe88] sm:$0xff] }
 0x250   :  { %4256 = vmatprep.subr.bf16.mxu0 %v8384_v1  ;;  %v1216_v63 = vld [vmem:[#allocation8 + $0xea8] sm:$0xff]  ;;  %v957_v1 = vld [vmem:[#allocation8 + $0x690] sm:$0xff] }
 0x251   :  { %v8686_v5 = vcombine.high %v1212_v62, %v1216_v63  ;;  %v8685_v11 = vcombine.low %v1212_v62, %v1216_v63  ;;  %v8431_v12 = vcombine.low %v957_v1, %v961_v2  ;;  %v1001_v62 = vld [vmem:[#allocation8 + $0x7f0] sm:$0xff] }
 0x252   :  { %4171 = vmatpush1.bf16.msra.mxu1 %v8637_v6  ;;  %v8432_v6 = vcombine.high %v957_v1, %v961_v2 }
 0x253   :  { %4257 = vmatpush1.bf16.msra.mxu0 %v8383_v7  ;;  %4172 = vmatprep.subr.bf16.mxu1 %v8646_v15  ;;  %v1220_v7 = vld [vmem:[#allocation8 + $0xec8] sm:$0xff] }
 0x254   :  { %v10492_v23 = vpop.f32.mrb[8].mxu1  ;;  %4258 = vmatprep.subr.bf16.mxu0 %v8392_v8  ;;  %v1224_v15 = vld [vmem:[#allocation8 + $0xee8] sm:$0xff]  ;;  %v965_v8 = vld [vmem:[#allocation8 + $0x6d0] sm:$0xff] }
 0x255   :  { %v10494_v27 = vpop.f32.mrb[9].mxu1  ;;  %v8694_v19 = vcombine.high %v1220_v7, %v1224_v15  ;;  %v8693_v26 = vcombine.low %v1220_v7, %v1224_v15  ;;  %v8439_v28 = vcombine.low %v965_v8, %v969_v9  ;;  %v1009_v7 = vld [vmem:[#allocation8 + $0x830] sm:$0xff] }
 0x256   :  { %4173 = vmatpush1.bf16.msra.mxu1 %v8645_v20  ;;  %v10496_v31 = vpop.f32.mrb[10].mxu1  ;;  %v8440_v20 = vcombine.high %v965_v8, %v969_v9 }
 0x257   :  { %4259 = vmatpush1.bf16.msra.mxu0 %v8391_v21  ;;  %v10498_v33 = vpop.f32.mrb[11].mxu1  ;;  %4174 = vmatprep.subr.bf16.mxu1 %v8654_v22  ;;  %v1228_v21 = vld [vmem:[#allocation8 + $0xf08] sm:$0xff] }
 0x258   :  { %4260 = vmatprep.subr.bf16.mxu0 %v8400_v24  ;;  %v1232_v22 = vld [vmem:[#allocation8 + $0xf28] sm:$0xff]  ;;  %v973_v24 = vld [vmem:[#allocation8 + $0x710] sm:$0xff] }
 0x259   :  { %v8702_v29 = vcombine.high %v1228_v21, %v1232_v22  ;;  %v8701_v41 = vcombine.low %v1228_v21, %v1232_v22  ;;  %v8447_v42 = vcombine.low %v973_v24, %v977_v25  ;;  %v758_v21 = vld [vmem:[#allocation8 + $0x58] sm:$0xff] }
 0x25a   :  { %4175 = vmatpush1.bf16.msra.mxu1 %v8653_v32  ;;  %v8448_v32 = vcombine.high %v973_v24, %v977_v25  ;;  %v762_v22 = vld [vmem:[#allocation8 + $0x78] sm:$0xff] }
 0x25b   :  { %4261 = vmatpush1.bf16.msra.mxu0 %v8399_v35  ;;  %4176 = vmatprep.subr.bf16.mxu1 %v8662_v37  ;;  %v1236_v35 = vld [vmem:[#allocation8 + $0xf48] sm:$0xff] }
 0x25c   :  { %4262 = vmatprep.subr.bf16.mxu0 %v8408_v0  ;;  %v1240_v37 = vld [vmem:[#allocation8 + $0xf68] sm:$0xff]  ;;  %v981_v0 = vld [vmem:[#allocation8 + $0x750] sm:$0xff] }
 0x25d   :  { %v8710_v44 = vcombine.high %v1236_v35, %v1240_v37  ;;  %v8709_v55 = vcombine.low %v1236_v35, %v1240_v37  ;;  %v8455_v56 = vcombine.low %v981_v0, %v985_v40  ;;  %v1025_v35 = vld [vmem:[#allocation8 + $0x8b0] sm:$0xff]  ;;  %v8233_v37 = vcombine.low %v758_v21, %v762_v22 }
 0x25e   :  { %4177 = vmatpush1.bf16.msra.mxu1 %v8661_v45  ;;  %v8456_v45 = vcombine.high %v981_v0, %v985_v40 }
 0x25f   :  { %4263 = vmatpush1.bf16.msra.mxu0 %v8407_v46  ;;  %4178 = vmatprep.subr.bf16.mxu1 %v8670_v49  ;;  %v1244_v46 = vld [vmem:[#allocation8 + $0xf88] sm:$0xff] }
 0x260   :  { %4264 = vmatprep.subr.bf16.mxu0 %v8416_v53  ;;  %v1248_v49 = vld [vmem:[#allocation8 + $0xfa8] sm:$0xff]  ;;  %v989_v53 = vld [vmem:[#allocation8 + $0x790] sm:$0xff] }
 0x261   :  { %v8718_v57 = vcombine.high %v1244_v46, %v1248_v49  ;;  %v8717_v63 = vcombine.low %v1244_v46, %v1248_v49  ;;  %v8463_v1 = vcombine.low %v989_v53, %v993_v54  ;;  %v1033_v46 = vld [vmem:[#allocation8 + $0x8f0] sm:$0xff] }
 0x262   :  { %4179 = vmatpush1.bf16.msra.mxu1 %v8669_v58  ;;  %v8464_v58 = vcombine.high %v989_v53, %v993_v54 }
 0x263   :  { %4265 = vmatpush1.bf16.msra.mxu0 %v8415_v59  ;;  %4180 = vmatprep.subr.bf16.mxu1 %v8678_v60  ;;  %v1252_v59 = vld [vmem:[#allocation8 + $0xfc8] sm:$0xff] }
 0x264   :  { %4266 = vmatprep.subr.bf16.mxu0 %v8424_v61  ;;  %v1256_v60 = vld [vmem:[#allocation8 + $0xfe8] sm:$0xff]  ;;  %v997_v61 = vld [vmem:[#allocation8 + $0x7d0] sm:$0xff] }
 0x265   :  { %v8726_v2 = vcombine.high %v1252_v59, %v1256_v60  ;;  %v8725_v15 = vcombine.low %v1252_v59, %v1256_v60  ;;  %v8471_v8 = vcombine.low %v997_v61, %v1001_v62  ;;  %v1041_v59 = vld [vmem:[#allocation8 + $0x930] sm:$0xff] }
 0x266   :  { %4181 = vmatpush1.bf16.msra.mxu1 %v8677_v3  ;;  %v8472_v3 = vcombine.high %v997_v61, %v1001_v62 }
 0x267   :  { %4267 = vmatpush1.bf16.msra.mxu0 %v8423_v4  ;;  %4182 = vmatprep.subr.bf16.mxu1 %v8686_v5  ;;  %v750_v4 = vld [vmem:[#allocation8 + $0x18] sm:$0xff] }
 0x268   :  { %4268 = vmatprep.subr.bf16.mxu0 %v8432_v6  ;;  %v754_v5 = vld [vmem:[#allocation8 + $0x38] sm:$0xff]  ;;  %v1005_v6 = vld [vmem:[#allocation8 + $0x810] sm:$0xff] }
 0x269   :  { %v8226_v9 = vcombine.high %v750_v4, %v754_v5  ;;  %v8479_v24 = vcombine.low %v1005_v6, %v1009_v7 }
 0x26a   :  { %4183 = vmatpush1.bf16.msra.mxu1 %v8685_v11  ;;  %v8480_v11 = vcombine.high %v1005_v6, %v1009_v7 }
 0x26b   :  { %4269 = vmatpush1.bf16.msra.mxu0 %v8431_v12  ;;  %4184 = vmatprep.subr.bf16.mxu1 %v8694_v19  ;;  %v1013_v12 = vld [vmem:[#allocation8 + $0x850] sm:$0xff] }
 0x26c   :  { %4270 = vmatprep.subr.bf16.mxu0 %v8440_v20  ;;  %v1017_v19 = vld [vmem:[#allocation8 + $0x870] sm:$0xff]  ;;  %v8225_v20 = vcombine.low %v750_v4, %v754_v5 }
 0x26d   :  { %v8488_v25 = vcombine.high %v1013_v12, %v1017_v19  ;;  %v8487_v0 = vcombine.low %v1013_v12, %v1017_v19 }
 0x26e   :  { %4185 = vmatpush1.bf16.msra.mxu1 %v8693_v26  ;;  %v766_v26 = vld [vmem:[#allocation8 + $0x98] sm:$0xff] }
 0x26f   :  { %4271 = vmatpush1.bf16.msra.mxu0 %v8439_v28  ;;  %4186 = vmatprep.subr.bf16.mxu1 %v8702_v29  ;;  %v770_v28 = vld [vmem:[#allocation8 + $0xb8] sm:$0xff]  ;;  %v8234_v29 = vcombine.high %v758_v21, %v762_v22 }
 0x270   :  { %4272 = vmatprep.subr.bf16.mxu0 %v8448_v32  ;;  %v1021_v32 = vld [vmem:[#allocation8 + $0x890] sm:$0xff]  ;;  %v8242_v40 = vcombine.high %v766_v26, %v770_v28  ;;  %v8241_v49 = vcombine.low %v766_v26, %v770_v28  ;;  %v806_v22 = vld [vmem:[#allocation8 + $0x1d8] sm:$0xff] }
 0x271   :  { %v8495_v53 = vcombine.low %v1021_v32, %v1025_v35  ;;  %v1065_v26 = vld [vmem:[#allocation8 + $0x9f0] sm:$0xff] }
 0x272   :  { %4187 = vmatpush1.bf16.msra.mxu1 %v8701_v41  ;;  %v8496_v41 = vcombine.high %v1021_v32, %v1025_v35 }
 0x273   :  { %4273 = vmatpush1.bf16.msra.mxu0 %v8447_v42  ;;  %4188 = vmatprep.subr.bf16.mxu1 %v8710_v44  ;;  %v774_v42 = vld [vmem:[#allocation8 + $0xd8] sm:$0xff] }
 0x274   :  { %4274 = vmatprep.subr.bf16.mxu0 %v8456_v45  ;;  %v778_v44 = vld [vmem:[#allocation8 + $0xf8] sm:$0xff]  ;;  %v1029_v45 = vld [vmem:[#allocation8 + $0x8d0] sm:$0xff] }
 0x275   :  { %v8250_v54 = vcombine.high %v774_v42, %v778_v44  ;;  %v8503_v60 = vcombine.low %v1029_v45, %v1033_v46 }
 0x276   :  { %4189 = vmatpush1.bf16.msra.mxu1 %v8709_v55  ;;  %v8504_v55 = vcombine.high %v1029_v45, %v1033_v46 }
 0x277   :  { %4275 = vmatpush1.bf16.msra.mxu0 %v8455_v56  ;;  %4190 = vmatprep.subr.bf16.mxu1 %v8718_v57  ;;  %v782_v56 = vld [vmem:[#allocation8 + $0x118] sm:$0xff] }
 0x278   :  { %4276 = vmatprep.subr.bf16.mxu0 %v8464_v58  ;;  %v786_v57 = vld [vmem:[#allocation8 + $0x138] sm:$0xff]  ;;  %v1037_v58 = vld [vmem:[#allocation8 + $0x910] sm:$0xff] }
 0x279   :  { %v8258_v61 = vcombine.high %v782_v56, %v786_v57  ;;  %v8512_v62 = vcombine.high %v1037_v58, %v1041_v59  ;;  %v8257_v4 = vcombine.low %v782_v56, %v786_v57  ;;  %v8511_v5 = vcombine.low %v1037_v58, %v1041_v59 }
 0x27a   :  { %4191 = vmatpush1.bf16.msra.mxu1 %v8717_v63  ;;  %v790_v63 = vld [vmem:[#allocation8 + $0x158] sm:$0xff] }
 0x27b   :  { %4277 = vmatpush1.bf16.msra.mxu0 %v8463_v1  ;;  %4192 = vmatprep.subr.bf16.mxu1 %v8726_v2  ;;  %v794_v1 = vld [vmem:[#allocation8 + $0x178] sm:$0xff]  ;;  %v1045_v2 = vld [vmem:[#allocation8 + $0x950] sm:$0xff] }
 0x27c   :  { %4278 = vmatprep.subr.bf16.mxu0 %v8472_v3  ;;  %v1049_v3 = vld [vmem:[#allocation8 + $0x970] sm:$0xff]  ;;  %v8266_v6 = vcombine.high %v790_v63, %v794_v1  ;;  %v8265_v12 = vcombine.low %v790_v63, %v794_v1 }
 0x27d   :  { %v8520_v7 = vcombine.high %v1045_v2, %v1049_v3  ;;  %v8519_v19 = vcombine.low %v1045_v2, %v1049_v3 }
 0x27e   :  { %4193 = vmatpush1.bf16.msra.mxu1 %v8725_v15  ;;  %v798_v15 = vld [vmem:[#allocation8 + $0x198] sm:$0xff] }
 0x27f   :  { %4279 = vmatpush1.bf16.msra.mxu0 %v8471_v8  ;;  %4377 = vmatprep.subr.bf16.mxu1 %v8226_v9  ;;  %v802_v8 = vld [vmem:[#allocation8 + $0x1b8] sm:$0xff]  ;;  %v1053_v9 = vld [vmem:[#allocation8 + $0x990] sm:$0xff] }
 0x280   :  { %4291 = vmatprep.subr.bf16.mxu0 %v8480_v11  ;;  %v1057_v11 = vld [vmem:[#allocation8 + $0x9b0] sm:$0xff]  ;;  %v8273_v28 = vcombine.low %v798_v15, %v802_v8 }
 0x281   :  { %4195 = vmatmul.mubr.bf16.vlgmr.msra.gmra.mrb[12].mxu1 %v10475_v43  ;;  %v8528_v21 = vcombine.high %v1053_v9, %v1057_v11 }
 0x282   :  { %4281 = vmatmul.mubr.bf16.vlgmr.msra.gmra.mrb[12].mxu0 %v10441_v50  ;;  %4378 = vmatpush1.bf16.msra.mxu1 %v8225_v20  ;;  %v8274_v20 = vcombine.high %v798_v15, %v802_v8 }
 0x283   :  { %4292 = vmatpush1.bf16.msra.mxu0 %v8479_v24  ;;  %4323 = vmatprep.mubr.bf16.mxu0 %v10473_v39  ;;  %v810_v24 = vld [vmem:[#allocation8 + $0x1f8] sm:$0xff] }
 0x284   :  { %4409 = vmatprep.mubr.bf16.mxu1 %v10443_v51  ;;  %4293 = vmatprep.subr.bf16.mxu0 %v8488_v25  ;;  %v8249_v51 = vcombine.low %v774_v42, %v778_v44  ;;  %v1061_v25 = vld [vmem:[#allocation8 + $0x9d0] sm:$0xff]  ;;  %v8282_v32 = vcombine.high %v806_v22, %v810_v24  ;;  %v8281_v42 = vcombine.low %v806_v22, %v810_v24 }
 0x285   :  { %4379 = vmatprep.subr.bf16.mxu1 %v8234_v29  ;;  %v8527_v29 = vcombine.low %v1053_v9, %v1057_v11  ;;  %v8536_v35 = vcombine.high %v1061_v25, %v1065_v26  ;;  %v8535_v44 = vcombine.low %v1061_v25, %v1065_v26 }
 0x286   :  { %4380 = vmatpush1.bf16.msra.mxu1 %v8233_v37  ;;  %v814_v37 = vld [vmem:[#allocation8 + $0x218] sm:$0xff] }
 0x287   :  { %4294 = vmatpush1.bf16.msra.mxu0 %v8487_v0  ;;  %4381 = vmatprep.subr.bf16.mxu1 %v8242_v40  ;;  %v818_v0 = vld [vmem:[#allocation8 + $0x238] sm:$0xff]  ;;  %v1069_v40 = vld [vmem:[#allocation8 + $0xa10] sm:$0xff] }
 0x288   :  { %4295 = vmatprep.subr.bf16.mxu0 %v8496_v41  ;;  %v1073_v41 = vld [vmem:[#allocation8 + $0xa30] sm:$0xff]  ;;  %v8290_v45 = vcombine.high %v814_v37, %v818_v0  ;;  %v8289_v56 = vcombine.low %v814_v37, %v818_v0 }
 0x289   :  { %v8544_v46 = vcombine.high %v1069_v40, %v1073_v41  ;;  %v8543_v57 = vcombine.low %v1069_v40, %v1073_v41 }
 0x28a   :  { %4382 = vmatpush1.bf16.msra.mxu1 %v8241_v49  ;;  %v822_v49 = vld [vmem:[#allocation8 + $0x258] sm:$0xff] }
 0x28b   :  { %4296 = vmatpush1.bf16.msra.mxu0 %v8495_v53  ;;  %4383 = vmatprep.subr.bf16.mxu1 %v8250_v54  ;;  %v826_v53 = vld [vmem:[#allocation8 + $0x278] sm:$0xff]  ;;  %v1077_v54 = vld [vmem:[#allocation8 + $0xa50] sm:$0xff] }
 0x28c   :  { %4297 = vmatprep.subr.bf16.mxu0 %v8504_v55  ;;  %v1081_v55 = vld [vmem:[#allocation8 + $0xa70] sm:$0xff]  ;;  %v8298_v58 = vcombine.high %v822_v49, %v826_v53  ;;  %v8297_v63 = vcombine.low %v822_v49, %v826_v53 }
 0x28d   :  { %v8552_v59 = vcombine.high %v1077_v54, %v1081_v55  ;;  %v8551_v1 = vcombine.low %v1077_v54, %v1081_v55 }
 0x28e   :  { %4384 = vmatpush1.bf16.msra.mxu1 %v8249_v51  ;;  %v830_v51 = vld [vmem:[#allocation8 + $0x298] sm:$0xff] }
 0x28f   :  { %4298 = vmatpush1.bf16.msra.mxu0 %v8503_v60  ;;  %4385 = vmatprep.subr.bf16.mxu1 %v8258_v61  ;;  %v834_v60 = vld [vmem:[#allocation8 + $0x2b8] sm:$0xff]  ;;  %v1085_v61 = vld [vmem:[#allocation8 + $0xa90] sm:$0xff] }
 0x290   :  { %4299 = vmatprep.subr.bf16.mxu0 %v8512_v62  ;;  %v1089_v62 = vld [vmem:[#allocation8 + $0xab0] sm:$0xff]  ;;  %v8306_v2 = vcombine.high %v830_v51, %v834_v60  ;;  %v8305_v15 = vcombine.low %v830_v51, %v834_v60 }
 0x291   :  { %v8560_v3 = vcombine.high %v1085_v61, %v1089_v62  ;;  %v8559_v8 = vcombine.low %v1085_v61, %v1089_v62 }
 0x292   :  { %4386 = vmatpush1.bf16.msra.mxu1 %v8257_v4  ;;  %v838_v4 = vld [vmem:[#allocation8 + $0x2d8] sm:$0xff] }
 0x293   :  { %4300 = vmatpush1.bf16.msra.mxu0 %v8511_v5  ;;  %4387 = vmatprep.subr.bf16.mxu1 %v8266_v6  ;;  %v842_v5 = vld [vmem:[#allocation8 + $0x2f8] sm:$0xff]  ;;  %v1093_v6 = vld [vmem:[#allocation8 + $0xad0] sm:$0xff] }
 0x294   :  { %4301 = vmatprep.subr.bf16.mxu0 %v8520_v7  ;;  %v1097_v7 = vld [vmem:[#allocation8 + $0xaf0] sm:$0xff]  ;;  %v8314_v9 = vcombine.high %v838_v4, %v842_v5  ;;  %v8313_v22 = vcombine.low %v838_v4, %v842_v5 }
 0x295   :  { %v8568_v11 = vcombine.high %v1093_v6, %v1097_v7  ;;  %v8567_v24 = vcombine.low %v1093_v6, %v1097_v7 }
 0x296   :  { %4388 = vmatpush1.bf16.msra.mxu1 %v8265_v12  ;;  %v846_v12 = vld [vmem:[#allocation8 + $0x318] sm:$0xff] }
 0x297   :  { %4302 = vmatpush1.bf16.msra.mxu0 %v8519_v19  ;;  %4389 = vmatprep.subr.bf16.mxu1 %v8274_v20  ;;  %v850_v19 = vld [vmem:[#allocation8 + $0x338] sm:$0xff]  ;;  %v1101_v20 = vld [vmem:[#allocation8 + $0xb10] sm:$0xff] }
 0x298   :  { %4303 = vmatprep.subr.bf16.mxu0 %v8528_v21  ;;  %v1105_v21 = vld [vmem:[#allocation8 + $0xb30] sm:$0xff]  ;;  %v8322_v25 = vcombine.high %v846_v12, %v850_v19  ;;  %v8321_v37 = vcombine.low %v846_v12, %v850_v19  ;;  %v890_v12 = vld [vmem:[#allocation8 + $0x478] sm:$0xff] }
 0x299   :  { %v8576_v26 = vcombine.high %v1101_v20, %v1105_v21  ;;  %v8575_v0 = vcombine.low %v1101_v20, %v1105_v21  ;;  %v894_v21 = vld [vmem:[#allocation8 + $0x498] sm:$0xff] }
 0x29a   :  { %4390 = vmatpush1.bf16.msra.mxu1 %v8273_v28  ;;  %v854_v28 = vld [vmem:[#allocation8 + $0x358] sm:$0xff] }
 0x29b   :  { %4304 = vmatpush1.bf16.msra.mxu0 %v8527_v29  ;;  %4391 = vmatprep.subr.bf16.mxu1 %v8282_v32  ;;  %v858_v29 = vld [vmem:[#allocation8 + $0x378] sm:$0xff]  ;;  %v1109_v32 = vld [vmem:[#allocation8 + $0xb50] sm:$0xff] }
 0x29c   :  { %4305 = vmatprep.subr.bf16.mxu0 %v8536_v35  ;;  %v1113_v35 = vld [vmem:[#allocation8 + $0xb70] sm:$0xff]  ;;  %v8330_v40 = vcombine.high %v854_v28, %v858_v29  ;;  %v8329_v49 = vcombine.low %v854_v28, %v858_v29 }
 0x29d   :  { %v8584_v41 = vcombine.high %v1109_v32, %v1113_v35  ;;  %v8583_v53 = vcombine.low %v1109_v32, %v1113_v35 }
 0x29e   :  { %4392 = vmatpush1.bf16.msra.mxu1 %v8281_v42  ;;  %v862_v42 = vld [vmem:[#allocation8 + $0x398] sm:$0xff] }
 0x29f   :  { %4306 = vmatpush1.bf16.msra.mxu0 %v8535_v44  ;;  %4393 = vmatprep.subr.bf16.mxu1 %v8290_v45  ;;  %v866_v44 = vld [vmem:[#allocation8 + $0x3b8] sm:$0xff]  ;;  %v1117_v45 = vld [vmem:[#allocation8 + $0xb90] sm:$0xff] }
 0x2a0   :  { %4307 = vmatprep.subr.bf16.mxu0 %v8544_v46  ;;  %v1121_v46 = vld [vmem:[#allocation8 + $0xbb0] sm:$0xff]  ;;  %v8338_v54 = vcombine.high %v862_v42, %v866_v44  ;;  %v8337_v51 = vcombine.low %v862_v42, %v866_v44 }
 0x2a1   :  { %v8592_v55 = vcombine.high %v1117_v45, %v1121_v46  ;;  %v8591_v60 = vcombine.low %v1117_v45, %v1121_v46  ;;  %v910_v46 = vld [vmem:[#allocation8 + $0x518] sm:$0xff] }
 0x2a2   :  { %4394 = vmatpush1.bf16.msra.mxu1 %v8289_v56  ;;  %v870_v56 = vld [vmem:[#allocation8 + $0x3d8] sm:$0xff] }
 0x2a3   :  { %4308 = vmatpush1.bf16.msra.mxu0 %v8543_v57  ;;  %4395 = vmatprep.subr.bf16.mxu1 %v8298_v58  ;;  %v874_v57 = vld [vmem:[#allocation8 + $0x3f8] sm:$0xff]  ;;  %v1125_v58 = vld [vmem:[#allocation8 + $0xbd0] sm:$0xff] }
 0x2a4   :  { %4309 = vmatprep.subr.bf16.mxu0 %v8552_v59  ;;  %v1129_v59 = vld [vmem:[#allocation8 + $0xbf0] sm:$0xff]  ;;  %v8346_v61 = vcombine.high %v870_v56, %v874_v57  ;;  %v8345_v4 = vcombine.low %v870_v56, %v874_v57 }
 0x2a5   :  { %v8600_v62 = vcombine.high %v1125_v58, %v1129_v59  ;;  %v8599_v5 = vcombine.low %v1125_v58, %v1129_v59  ;;  %v918_v58 = vld [vmem:[#allocation8 + $0x558] sm:$0xff] }
 0x2a6   :  { %4396 = vmatpush1.bf16.msra.mxu1 %v8297_v63  ;;  %v878_v63 = vld [vmem:[#allocation8 + $0x418] sm:$0xff] }
 0x2a7   :  { %4310 = vmatpush1.bf16.msra.mxu0 %v8551_v1  ;;  %4397 = vmatprep.subr.bf16.mxu1 %v8306_v2  ;;  %v882_v1 = vld [vmem:[#allocation8 + $0x438] sm:$0xff]  ;;  %v1133_v2 = vld [vmem:[#allocation8 + $0xc10] sm:$0xff] }
 0x2a8   :  { %4311 = vmatprep.subr.bf16.mxu0 %v8560_v3  ;;  %v1137_v3 = vld [vmem:[#allocation8 + $0xc30] sm:$0xff]  ;;  %v8354_v6 = vcombine.high %v878_v63, %v882_v1  ;;  %v922_v59 = vld [vmem:[#allocation8 + $0x578] sm:$0xff] }
 0x2a9   :  { %v8608_v7 = vcombine.high %v1133_v2, %v1137_v3  ;;  %v8607_v19 = vcombine.low %v1133_v2, %v1137_v3 }
 0x2aa   :  { %4398 = vmatpush1.bf16.msra.mxu1 %v8305_v15  ;;  %v1141_v15 = vld [vmem:[#allocation8 + $0xc50] sm:$0xff] }
 0x2ab   :  { %4312 = vmatpush1.bf16.msra.mxu0 %v8559_v8  ;;  %4399 = vmatprep.subr.bf16.mxu1 %v8314_v9  ;;  %v1145_v8 = vld [vmem:[#allocation8 + $0xc70] sm:$0xff]  ;;  %v8353_v9 = vcombine.low %v878_v63, %v882_v1  ;;  %v8394_v1 = vcombine.high %v918_v58, %v922_v59 }
 0x2ac   :  { %4313 = vmatprep.subr.bf16.mxu0 %v8568_v11  ;;  %v886_v11 = vld [vmem:[#allocation8 + $0x458] sm:$0xff]  ;;  %v8616_v20 = vcombine.high %v1141_v15, %v1145_v8  ;;  %v8615_v29 = vcombine.low %v1141_v15, %v1145_v8  ;;  %v1185_v15 = vld [vmem:[#allocation8 + $0xdb0] sm:$0xff]  ;;  %v8393_v8 = vcombine.low %v918_v58, %v922_v59 }
 0x2ad   :  { %v8361_v28 = vcombine.low %v886_v11, %v890_v12 }
 0x2ae   :  { %4400 = vmatpush1.bf16.msra.mxu1 %v8313_v22  ;;  %v898_v22 = vld [vmem:[#allocation8 + $0x4b8] sm:$0xff] }
 0x2af   :  { %4314 = vmatpush1.bf16.msra.mxu0 %v8567_v24  ;;  %4401 = vmatprep.subr.bf16.mxu1 %v8322_v25  ;;  %v8362_v24 = vcombine.high %v886_v11, %v890_v12  ;;  %v1149_v25 = vld [vmem:[#allocation8 + $0xc90] sm:$0xff]  ;;  %v8370_v32 = vcombine.high %v894_v21, %v898_v22 }
 0x2b0   :  { %4315 = vmatprep.subr.bf16.mxu0 %v8576_v26  ;;  %v1153_v26 = vld [vmem:[#allocation8 + $0xcb0] sm:$0xff] }
 0x2b1   :  { %v8624_v35 = vcombine.high %v1149_v25, %v1153_v26  ;;  %v8623_v42 = vcombine.low %v1149_v25, %v1153_v26  ;;  %v1189_v25 = vld [vmem:[#allocation8 + $0xdd0] sm:$0xff] }
 0x2b2   :  { %4402 = vmatpush1.bf16.msra.mxu1 %v8321_v37  ;;  %v902_v37 = vld [vmem:[#allocation8 + $0x4d8] sm:$0xff]  ;;  %v1193_v26 = vld [vmem:[#allocation8 + $0xdf0] sm:$0xff] }
 0x2b3   :  { %4316 = vmatpush1.bf16.msra.mxu0 %v8575_v0  ;;  %4403 = vmatprep.subr.bf16.mxu1 %v8330_v40  ;;  %v906_v0 = vld [vmem:[#allocation8 + $0x4f8] sm:$0xff]  ;;  %v1161_v40 = vld [vmem:[#allocation8 + $0xcf0] sm:$0xff] }
 0x2b4   :  { %4317 = vmatprep.subr.bf16.mxu0 %v8584_v41  ;;  %v8369_v41 = vcombine.low %v894_v21, %v898_v22  ;;  %v8378_v44 = vcombine.high %v902_v37, %v906_v0  ;;  %v938_v21 = vld [vmem:[#allocation8 + $0x5f8] sm:$0xff] }
 0x2b6   :  { %4404 = vmatpush1.bf16.msra.mxu1 %v8329_v49  ;;  %v914_v49 = vld [vmem:[#allocation8 + $0x538] sm:$0xff] }
 0x2b7   :  { %4318 = vmatpush1.bf16.msra.mxu0 %v8583_v53  ;;  %4405 = vmatprep.subr.bf16.mxu1 %v8338_v54  ;;  %v1165_v53 = vld [vmem:[#allocation8 + $0xd10] sm:$0xff]  ;;  %v8386_v56 = vcombine.high %v910_v46, %v914_v49 }
 0x2b8   :  { %4319 = vmatprep.subr.bf16.mxu0 %v8592_v55  ;;  %v1169_v54 = vld [vmem:[#allocation8 + $0xd30] sm:$0xff] }
 0x2b9   :  { %v8640_v57 = vcombine.high %v1165_v53, %v1169_v54  ;;  %v8639_v63 = vcombine.low %v1165_v53, %v1169_v54 }
 0x2ba   :  { %4406 = vmatpush1.bf16.msra.mxu1 %v8337_v51  ;;  %v10508_v51 = vld [vmem:[#allocation10] sm:$0xff] }
 0x2bb   :  { %4320 = vmatpush1.bf16.msra.mxu0 %v8591_v60  ;;  %4407 = vmatprep.subr.bf16.mxu1 %v8346_v61  ;;  %v1173_v60 = vld [vmem:[#allocation8 + $0xd50] sm:$0xff]  ;;  %v1264_v2 = vrot.slane %v10508_v51, %v10418_v14 }
 0x2bc   :  { %4321 = vmatprep.subr.bf16.mxu0 %v8600_v62  ;;  %v1177_v61 = vld [vmem:[#allocation8 + $0xd70] sm:$0xff]  ;;  %v8385_v62 = vcombine.low %v910_v46, %v914_v49 }
 0x2bd   :  { %v8648_v3 = vcombine.high %v1173_v60, %v1177_v61  ;;  %v3896_v12 = vadd.f32 %v10492_v23, %v1264_v2  ;;  %v1201_v49 = vld [vmem:[#allocation8 + $0xe30] sm:$0xff] }
 0x2be   :  { %4408 = vmatpush1.bf16.msra.mxu1 %v8345_v4  ;;  %v926_v4 = vld [vmem:[#allocation8 + $0x598] sm:$0xff] }
 0x2bf   :  { %4322 = vmatpush1.bf16.msra.mxu0 %v8599_v5  ;;  %4420 = vmatprep.subr.bf16.mxu1 %v8354_v6  ;;  %v930_v5 = vld [vmem:[#allocation8 + $0x5b8] sm:$0xff]  ;;  %v1268_v6 = vrot.slane %v10508_v51, %v10426_v17 }
 0x2c0   :  { %4334 = vmatprep.subr.bf16.mxu0 %v8608_v7  ;;  %v1181_v7 = vld [vmem:[#allocation8 + $0xd90] sm:$0xff]  ;;  %v8402_v11 = vcombine.high %v926_v4, %v930_v5 }
 0x2c1   :  { %4410 = vmatmul.mubr.bf16.vlgmr.msra.gmra.mrb[16].mxu1 %v10439_v48  ;;  %v1157_v48 = vld [vmem:[#allocation8 + $0xcd0] sm:$0xff]  ;;  %v3898_v22 = vadd.f32 %v10494_v27, %v1268_v6  ;;  %v8655_v23 = vcombine.low %v1181_v7, %v1185_v15  ;;  %v8664_v27 = vcombine.high %v1189_v25, %v1193_v26 }
 0x2c2   :  { %4324 = vmatmul.mubr.bf16.vlgmr.msra.gmra.mrb[12].mxu0 %v10471_v36  ;;  %4421 = vmatpush1.bf16.msra.mxu1 %v8353_v9  ;;  %v8632_v45 = vcombine.high %v1157_v48, %v1161_v40  ;;  %v8631_v55 = vcombine.low %v1157_v48, %v1161_v40  ;;  %v8647_v9 = vcombine.low %v1173_v60, %v1177_v61  ;;  %v950_v60 = vld [vmem:[#allocation8 + $0x658] sm:$0xff] }
 0x2c3   :  { %4335 = vmatpush1.bf16.msra.mxu0 %v8607_v19  ;;  %4366 = vmatprep.mubr.bf16.mxu0 %v10478_v47  ;;  %v8656_v19 = vcombine.high %v1181_v7, %v1185_v15  ;;  %v954_v61 = vld [vmem:[#allocation8 + $0x678] sm:$0xff]  ;;  %v1213_v15 = vld [vmem:[#allocation8 + $0xe90] sm:$0xff] }
 0x2c4   :  { %4452 = vmatprep.mubr.bf16.mxu1 %v10445_v52  ;;  %4336 = vmatprep.subr.bf16.mxu0 %v8616_v20  ;;  %v8377_v52 = vcombine.low %v902_v37, %v906_v0  ;;  %v934_v20 = vld [vmem:[#allocation8 + $0x5d8] sm:$0xff]  ;;  %v8401_v37 = vcombine.low %v926_v4, %v930_v5  ;;  %v8426_v4 = vcombine.high %v950_v60, %v954_v61 }
 0x2c5   :  { %4422 = vmatprep.subr.bf16.mxu1 %v8362_v24  ;;  %v8410_v40 = vcombine.high %v934_v20, %v938_v21  ;;  %v8409_v54 = vcombine.low %v934_v20, %v938_v21  ;;  %v962_v7 = vld [vmem:[#allocation8 + $0x6b8] sm:$0xff] }
 0x2c6   :  { %4423 = vmatpush1.bf16.msra.mxu1 %v8361_v28  ;;  %v3900_v28 = vadd.f32 %v10496_v31, %v1264_v2  ;;  %v1197_v31 = vld [vmem:[#allocation8 + $0xe10] sm:$0xff]  ;;  %v966_v20 = vld [vmem:[#allocation8 + $0x6d8] sm:$0xff] }
 0x2c7   :  { %4337 = vmatpush1.bf16.msra.mxu0 %v8615_v29  ;;  %4424 = vmatprep.subr.bf16.mxu1 %v8370_v32  ;;  %v3902_v29 = vadd.f32 %v10498_v33, %v1268_v6  ;;  %v8672_v59 = vcombine.high %v1197_v31, %v1201_v49  ;;  %v958_v6 = vld [vmem:[#allocation8 + $0x698] sm:$0xff] }
 0x2c8   :  { %4338 = vmatprep.subr.bf16.mxu0 %v8624_v35  ;;  %v970_v21 = vld [vmem:[#allocation8 + $0x6f8] sm:$0xff] }
 0x2ca   :  { %4425 = vmatpush1.bf16.msra.mxu1 %v8369_v41 }
 0x2cb   :  { %4339 = vmatpush1.bf16.msra.mxu0 %v8623_v42  ;;  %4426 = vmatprep.subr.bf16.mxu1 %v8378_v44  ;;  %v942_v44 = vld [vmem:[#allocation8 + $0x618] sm:$0xff] }
 0x2cc   :  { %4340 = vmatprep.subr.bf16.mxu0 %v8632_v45  ;;  %v946_v45 = vld [vmem:[#allocation8 + $0x638] sm:$0xff] }
 0x2cd   :  { %v8417_v2 = vcombine.low %v942_v44, %v946_v45 }
 0x2ce   :  { %4427 = vmatpush1.bf16.msra.mxu1 %v8377_v52 }
 0x2cf   :  { %4341 = vmatpush1.bf16.msra.mxu0 %v8631_v55  ;;  %4428 = vmatprep.subr.bf16.mxu1 %v8386_v56  ;;  %v8663_v56 = vcombine.low %v1189_v25, %v1193_v26  ;;  %v8433_v25 = vcombine.low %v958_v6, %v962_v7 }
 0x2d0   :  { %4342 = vmatprep.subr.bf16.mxu0 %v8640_v57  ;;  %v8418_v57 = vcombine.high %v942_v44, %v946_v45  ;;  %v1237_v44 = vld [vmem:[#allocation8 + $0xf50] sm:$0xff] }
 0x2d1   :  { %v1241_v45 = vld [vmem:[#allocation8 + $0xf70] sm:$0xff] }
 0x2d2   :  { %4429 = vmatpush1.bf16.msra.mxu1 %v8385_v62 }
 0x2d3   :  { %4343 = vmatpush1.bf16.msra.mxu0 %v8639_v63  ;;  %4430 = vmatprep.subr.bf16.mxu1 %v8394_v1  ;;  %v1205_v63 = vld [vmem:[#allocation8 + $0xe50] sm:$0xff] }
 0x2d4   :  { %4344 = vmatprep.subr.bf16.mxu0 %v8648_v3  ;;  %v4024_v24 = vpop.f32.mrb[8].mxu0  ;;  %v1209_v1 = vld [vmem:[#allocation8 + $0xe70] sm:$0xff]  ;;  %v8671_v3 = vcombine.low %v1197_v31, %v1201_v49 }
 0x2d5   :  { %v9268_v32 = vadd.f32 %v4024_v24, %v3896_v12  ;;  %v4026_v35 = vpop.f32.mrb[9].mxu0  ;;  %v8680_v5 = vcombine.high %v1205_v63, %v1209_v1  ;;  %v8434_v12 = vcombine.high %v958_v6, %v962_v7  ;;  %v1225_v24 = vld [vmem:[#allocation8 + $0xef0] sm:$0xff]  ;;  %v1006_v7 = vld [vmem:[#allocation8 + $0x818] sm:$0xff] }
 0x2d6   :  { %4431 = vmatpush1.bf16.msra.mxu1 %v8393_v8  ;;  %v9270_v0 = vadd.f32 %v4026_v35, %v3898_v22  ;;  %v4028_v48 = vpop.f32.mrb[10].mxu0  ;;  %v1217_v8 = vld [vmem:[#allocation8 + $0xeb0] sm:$0xff]  ;;  %v978_v35 = vld [vmem:[#allocation8 + $0x738] sm:$0xff] }
 0x2d7   :  { %4345 = vmatpush1.bf16.msra.mxu0 %v8647_v9  ;;  %4432 = vmatprep.subr.bf16.mxu1 %v8402_v11  ;;  %v9272_v41 = vadd.f32 %v4028_v48, %v3900_v28  ;;  %v4030_v42 = vpop.f32.mrb[11].mxu0  ;;  %v4549_v33 = vmax.f32 %v9268_v32, 0.0  ;;  %v8425_v9 = vcombine.low %v950_v60, %v954_v61  ;;  %v8679_v11 = vcombine.low %v1205_v63, %v1209_v1  ;;  %v1221_v22 = vld [vmem:[#allocation8 + $0xed0] sm:$0xff]  ;;  %v974_v32 = vld [vmem:[#allocation8 + $0x718] sm:$0xff] }
 0x2d8   :  { %4346 = vmatprep.subr.bf16.mxu0 %v8656_v19  ;;  %v9274_v46 = vadd.f32 %v4030_v42, %v3902_v29  ;;  %v4550_v52 = vmax.f32 %v9270_v0, 0.0  ;;  %v8688_v19 = vcombine.high %v1213_v15, %v1217_v8  ;;  %v8687_v26 = vcombine.low %v1213_v15, %v1217_v8  ;;  %v1233_v0 = vld [vmem:[#allocation8 + $0xf30] sm:$0xff]  ;;  %v982_v42 = vld [vmem:[#allocation8 + $0x758] sm:$0xff] }
 0x2d9   :  { %v4557_v53 = vmax.f32 %v9272_v41, 0.0  ;;  %v8442_v28 = vcombine.high %v966_v20, %v970_v21  ;;  %v8696_v29 = vcombine.high %v1221_v22, %v1225_v24  ;;  %v8441_v48 = vcombine.low %v966_v20, %v970_v21  ;;  %v998_v61 = vld [vmem:[#allocation8 + $0x7d8] sm:$0xff]  ;;  %v1253_v1 = vld [vmem:[#allocation8 + $0xfd0] sm:$0xff] }
 0x2da   :  { %4433 = vmatpush1.bf16.msra.mxu1 %v8401_v37  ;;  %v4558_v55 = vmax.f32 %v9274_v46, 0.0  ;;  %v1229_v37 = vld [vmem:[#allocation8 + $0xf10] sm:$0xff]  ;;  %v8449_v46 = vcombine.low %v974_v32, %v978_v35  ;;  %v1002_v63 = vld [vmem:[#allocation8 + $0x7f8] sm:$0xff] }
 0x2db   :  { %4347 = vmatpush1.bf16.msra.mxu0 %v8655_v23  ;;  %4434 = vmatprep.subr.bf16.mxu1 %v8410_v40  ;;  %v10518_v58 = vpack.c.bf16 %v4557_v53, %v4549_v33  ;;  %v8695_v23 = vcombine.low %v1221_v22, %v1225_v24  ;;  %v8450_v40 = vcombine.high %v974_v32, %v978_v35  ;;  %v990_v53 = vld [vmem:[#allocation8 + $0x798] sm:$0xff]  ;;  %v9397_v22 = vld [vmem:[#allocation11] ss:$28 sps:$4 sm:$0xff]  }
 0x2dc   :  { %4348 = vmatprep.subr.bf16.mxu0 %v8664_v27  ;;  %v10520_v62 = vpack.c.bf16 %v4558_v55, %v4550_v52  ;;  %v8704_v41 = vcombine.high %v1229_v37, %v1233_v0  ;;  %v986_v27 = vld [vmem:[#allocation8 + $0x778] sm:$0xff]  ;;  %v8703_v31 = vcombine.low %v1229_v37, %v1233_v0  ;;  %v8712_v33 = vcombine.high %v1237_v44, %v1241_v45  ;;  %v1245_v52 = vld [vmem:[#allocation8 + $0xf90] sm:$0xff] }
 0x2dd   :  { %v8458_v49 = vcombine.high %v982_v42, %v986_v27  ;;  %v1249_v55 = vld [vmem:[#allocation8 + $0xfb0] sm:$0xff]  ;;  %v1010_v15 = vld [vmem:[#allocation8 + $0x838] sm:$0xff]  ;;  %v8473_v8 = vcombine.low %v998_v61, %v1002_v63 }
 0x2de   :  { %4435 = vmatpush1.bf16.msra.mxu1 %v8409_v54  ;;  %v994_v54 = vld [vmem:[#allocation8 + $0x7b8] sm:$0xff]  ;;  %v8720_v60 = vcombine.high %v1245_v52, %v1249_v55  ;;  %v8481_v21 = vcombine.low %v1006_v7, %v1010_v15 }
 0x2df   :  { %4349 = vmatpush1.bf16.msra.mxu0 %v8663_v56  ;;  %4436 = vmatprep.subr.bf16.mxu1 %v8418_v57  ;;  %v8457_v56 = vcombine.low %v982_v42, %v986_v27  ;;  %v8711_v57 = vcombine.low %v1237_v44, %v1241_v45  ;;  %v1018_v20 = vld [vmem:[#allocation8 + $0x878] sm:$0xff]  ;;  %v9406_v44 = vld [vmem:[#allocation11 + $0xa8] ss:$28 sps:$4 sm:$0xff]  }
 0x2e0   :  { %4350 = vmatprep.subr.bf16.mxu0 %v8672_v59  ;;  %v8466_v59 = vcombine.high %v990_v53, %v994_v54  ;;  %v9400_v32 = vld [vmem:[#allocation11 + $0x38] ss:$28 sps:$4 sm:$0xff]  }
 0x2e1   :  { %v9405_v37 = vld [vmem:[#allocation11 + $0x74] ss:$28 sps:$4 sm:$0xff]  }
 0x2e2   :  { %4437 = vmatpush1.bf16.msra.mxu1 %v8417_v2  ;;  %v1257_v2 = vld [vmem:[#allocation8 + $0xff0] sm:$0xff]  ;;  %v1030_v0 = vld [vmem:[#allocation8 + $0x8d8] sm:$0xff] }
 0x2e3   :  { %4351 = vmatpush1.bf16.msra.mxu0 %v8671_v3  ;;  %4438 = vmatprep.subr.bf16.mxu1 %v8426_v4  ;;  %v8465_v3 = vcombine.low %v990_v53, %v994_v54  ;;  %v8719_v4 = vcombine.low %v1245_v52, %v1249_v55  ;;  %v8728_v6 = vcombine.high %v1253_v1, %v1257_v2  ;;  %v1038_v42 = vld [vmem:[#allocation8 + $0x918] sm:$0xff]  ;;  %v9409_v53 = vld [vmem:[#allocation11 + $0xe0] ss:$28 sps:$4 sm:$0xff]  }
 0x2e4   :  { %4352 = vmatprep.subr.bf16.mxu0 %v8680_v5  ;;  %v8474_v5 = vcombine.high %v998_v61, %v1002_v63  ;;  %v9414_v52 = vld [vmem:[#allocation11 + $0x11c] ss:$28 sps:$4 sm:$0xff]   ;;  %v1054_v55 = vld [vmem:[#allocation8 + $0x998] sm:$0xff] }
 0x2e5   :  { %v9417_v61 = vld [vmem:[#allocation11 + $0x154] ss:$28 sps:$4 sm:$0xff]  }
 0x2e6   :  { %4439 = vmatpush1.bf16.msra.mxu1 %v8425_v9  ;;  %v8727_v9 = vcombine.low %v1253_v1, %v1257_v2  ;;  %v1062_v63 = vld [vmem:[#allocation8 + $0x9d8] sm:$0xff] }
 0x2e7   :  { %4353 = vmatpush1.bf16.msra.mxu0 %v8679_v11  ;;  %4440 = vmatprep.subr.bf16.mxu1 %v8434_v12  ;;  %v8482_v11 = vcombine.high %v1006_v7, %v1010_v15  ;;  %v9399_v12 = vld [vmem:[#allocation11 + $0x4] ss:$28 sps:$4 sm:$0xff]   ;;  %v1066_v1 = vld [vmem:[#allocation8 + $0x9f8] sm:$0xff] }
 0x2e8   :  { %4354 = vmatprep.subr.bf16.mxu0 %v8688_v19  ;;  %v1014_v19 = vld [vmem:[#allocation8 + $0x858] sm:$0xff]  ;;  %v8537_v15 = vcombine.low %v1062_v63, %v1066_v1 }
 0x2e9   :  { %v8490_v24 = vcombine.high %v1014_v19, %v1018_v20  ;;  %v1074_v7 = vld [vmem:[#allocation8 + $0xa38] sm:$0xff] }
 0x2ea   :  { %4441 = vmatpush1.bf16.msra.mxu1 %v8433_v25  ;;  %v1022_v25 = vld [vmem:[#allocation8 + $0x898] sm:$0xff] }
 0x2eb   :  { %4355 = vmatpush1.bf16.msra.mxu0 %v8687_v26  ;;  %4442 = vmatprep.subr.bf16.mxu1 %v8442_v28  ;;  %v1026_v26 = vld [vmem:[#allocation8 + $0x8b8] sm:$0xff]  ;;  %v9402_v28 = vld [vmem:[#allocation11 + $0x3c] ss:$28 sps:$4 sm:$0xff]  }
 0x2ec   :  { %4356 = vmatprep.subr.bf16.mxu0 %v8696_v29  ;;  %v8489_v29 = vcombine.low %v1014_v19, %v1018_v20  ;;  %v8498_v35 = vcombine.high %v1022_v25, %v1026_v26  ;;  %v1082_v19 = vld [vmem:[#allocation8 + $0xa78] sm:$0xff] }
 0x2ee   :  { %4443 = vmatpush1.bf16.msra.mxu1 %v8441_v48  ;;  %v1034_v48 = vld [vmem:[#allocation8 + $0x8f8] sm:$0xff] }
 0x2ef   :  { %4357 = vmatpush1.bf16.msra.mxu0 %v8695_v23  ;;  %4444 = vmatprep.subr.bf16.mxu1 %v8450_v40  ;;  %v8497_v23 = vcombine.low %v1022_v25, %v1026_v26  ;;  %v8506_v40 = vcombine.high %v1030_v0, %v1034_v48  ;;  %v8505_v27 = vcombine.low %v1030_v0, %v1034_v48  ;;  %v1086_v25 = vld [vmem:[#allocation8 + $0xa98] sm:$0xff] }
 0x2f0   :  { %4358 = vmatprep.subr.bf16.mxu0 %v8704_v41  ;;  %v9408_v41 = vld [vmem:[#allocation11 + $0xac] ss:$28 sps:$4 sm:$0xff]   ;;  %v1090_v26 = vld [vmem:[#allocation8 + $0xab8] sm:$0xff] }
 0x2f1   :  { %v1098_v0 = vld [vmem:[#allocation8 + $0xaf8] sm:$0xff]  ;;  %v8561_v48 = vcombine.low %v1086_v25, %v1090_v26 }
 0x2f2   :  { %4445 = vmatpush1.bf16.msra.mxu1 %v8449_v46  ;;  %v9411_v46 = vld [vmem:[#allocation11 + $0xe4] ss:$28 sps:$4 sm:$0xff]  }
 0x2f3   :  { %4359 = vmatpush1.bf16.msra.mxu0 %v8703_v31  ;;  %4446 = vmatprep.subr.bf16.mxu1 %v8458_v49  ;;  %v1046_v31 = vld [vmem:[#allocation8 + $0x958] sm:$0xff] }
 0x2f4   :  { %4360 = vmatprep.subr.bf16.mxu0 %v8712_v33  ;;  %v1050_v49 = vld [vmem:[#allocation8 + $0x978] sm:$0xff] }
 0x2f5   :  { %v8522_v54 = vcombine.high %v1046_v31, %v1050_v49 }
 0x2f6   :  { %4447 = vmatpush1.bf16.msra.mxu1 %v8457_v56  ;;  %v1058_v56 = vld [vmem:[#allocation8 + $0x9b8] sm:$0xff] }
 0x2f7   :  { %4361 = vmatpush1.bf16.msra.mxu0 %v8711_v57  ;;  %4448 = vmatprep.subr.bf16.mxu1 %v8466_v59  ;;  %v8521_v57 = vcombine.low %v1046_v31, %v1050_v49  ;;  %v9412_v59 = vld [vmem:[#allocation11 + $0x118] ss:$28 sps:$4 sm:$0xff]   ;;  %v8529_v2 = vcombine.low %v1054_v55, %v1058_v56 }
 0x2f8   :  { %4362 = vmatprep.subr.bf16.mxu0 %v8720_v60  ;;  %v8530_v60 = vcombine.high %v1054_v55, %v1058_v56  ;;  %v1114_v31 = vld [vmem:[#allocation8 + $0xb78] sm:$0xff] }
 0x2f9   :  { %v1122_v55 = vld [vmem:[#allocation8 + $0xbb8] sm:$0xff] }
 0x2fa   :  { %4449 = vmatpush1.bf16.msra.mxu1 %v8465_v3  ;;  %v9415_v3 = vld [vmem:[#allocation11 + $0x150] ss:$28 sps:$4 sm:$0xff]  }
 0x2fb   :  { %4363 = vmatpush1.bf16.msra.mxu0 %v8719_v4  ;;  %4450 = vmatprep.subr.bf16.mxu1 %v8474_v5  ;;  %v8538_v4 = vcombine.high %v1062_v63, %v1066_v1  ;;  %v9420_v5 = vld [vmem:[#allocation11 + $0x18c] ss:$28 sps:$4 sm:$0xff]   ;;  %v1130_v63 = vld [vmem:[#allocation8 + $0xbf8] sm:$0xff] }
 0x2fc   :  { %4364 = vmatprep.subr.bf16.mxu0 %v8728_v6  ;;  %v1070_v6 = vld [vmem:[#allocation8 + $0xa18] sm:$0xff] }
 0x2fd   :  { %v8545_v20 = vcombine.low %v1070_v6, %v1074_v7 }
 0x2fe   :  { %4451 = vmatpush1.bf16.msra.mxu1 %v8473_v8  ;;  %v9418_v8 = vld [vmem:[#allocation11 + $0x188] ss:$28 sps:$4 sm:$0xff]  }
 0x2ff   :  { %4365 = vmatpush1.bf16.msra.mxu0 %v8727_v9  ;;  %4463 = vmatprep.subr.bf16.mxu1 %v8482_v11  ;;  %v8546_v9 = vcombine.high %v1070_v6, %v1074_v7  ;;  %v9423_v11 = vld [vmem:[#allocation11 + $0x1c4] ss:$28 sps:$4 sm:$0xff]   ;;  %v1138_v6 = vld [vmem:[#allocation8 + $0xc38] sm:$0xff] }
 0x300   :  { %7426 = vmatprep.subr.bf16.mxu0 %v9399_v12  ;;  %v1078_v12 = vld [vmem:[#allocation8 + $0xa58] sm:$0xff] }
 0x301   :  { %4453 = vmatmul.mubr.bf16.vlgmr.msra.gmra.mrb[16].mxu1 %v10441_v50  ;;  %v9403_v50 = vld [vmem:[#allocation11 + $0x70] ss:$28 sps:$4 sm:$0xff]  }
 0x302   :  { %4367 = vmatmul.mubr.bf16.vlgmr.msra.gmra.mrb[12].mxu0 %v10475_v43  ;;  %4464 = vmatpush1.bf16.msra.mxu1 %v8481_v21  ;;  %v9421_v21 = vld [vmem:[#allocation11 + $0x1c0] ss:$28 sps:$4 sm:$0xff]  }
 0x303   :  { %4495 = vmatprep.mubr.bf16.mxu1 %v10473_v39  ;;  %7427 = vmatpush1.bf16.msra.mxu0 %v9397_v22  ;;  %v1042_v39 = vld [vmem:[#allocation8 + $0x938] sm:$0xff]  ;;  %v8554_v22 = vcombine.high %v1078_v12, %v1082_v19 }
 0x304   :  { %7458 = vmatprep.mubr.bf16.mxu0 %v10520_v62  ;;  %4465 = vmatprep.subr.bf16.mxu1 %v8490_v24  ;;  %v8514_v45 = vcombine.high %v1038_v42, %v1042_v39  ;;  %v8513_v33 = vcombine.low %v1038_v42, %v1042_v39  ;;  %v9426_v24 = vld [vmem:[#allocation11 + $0x1fc] ss:$28 sps:$4 sm:$0xff]   ;;  %v1106_v42 = vld [vmem:[#allocation8 + $0xb38] sm:$0xff] }
 0x305   :  { %7428 = vmatprep.subr.bf16.mxu0 %v9402_v28  ;;  %v8553_v28 = vcombine.low %v1078_v12, %v1082_v19  ;;  %v1146_v12 = vld [vmem:[#allocation8 + $0xc78] sm:$0xff] }
 0x306   :  { %4466 = vmatpush1.bf16.msra.mxu1 %v8489_v29  ;;  %v9424_v29 = vld [vmem:[#allocation11 + $0x1f8] ss:$28 sps:$4 sm:$0xff]  }
 0x307   :  { %7429 = vmatpush1.bf16.msra.mxu0 %v9400_v32  ;;  %4467 = vmatprep.subr.bf16.mxu1 %v8498_v35  ;;  %v8562_v32 = vcombine.high %v1086_v25, %v1090_v26  ;;  %v9429_v35 = vld [vmem:[#allocation11 + $0x234] ss:$28 sps:$4 sm:$0xff]  }
 0x308   :  { %7430 = vmatprep.subr.bf16.mxu0 %v9405_v37  ;;  %v1094_v37 = vld [vmem:[#allocation8 + $0xad8] sm:$0xff] }
 0x309   :  { %v8569_v39 = vcombine.low %v1094_v37, %v1098_v0  ;;  %v1154_v25 = vld [vmem:[#allocation8 + $0xcb8] sm:$0xff] }
 0x30a   :  { %4468 = vmatpush1.bf16.msra.mxu1 %v8497_v23  ;;  %v9427_v23 = vld [vmem:[#allocation11 + $0x230] ss:$28 sps:$4 sm:$0xff]  }
 0x30b   :  { %7431 = vmatpush1.bf16.msra.mxu0 %v9403_v50  ;;  %4469 = vmatprep.subr.bf16.mxu1 %v8506_v40  ;;  %v8570_v50 = vcombine.high %v1094_v37, %v1098_v0  ;;  %v9432_v40 = vld [vmem:[#allocation11 + $0x26c] ss:$28 sps:$4 sm:$0xff]   ;;  %v1162_v37 = vld [vmem:[#allocation8 + $0xcf8] sm:$0xff] }
 0x30c   :  { %7432 = vmatprep.subr.bf16.mxu0 %v9408_v41  ;;  %v1102_v41 = vld [vmem:[#allocation8 + $0xb18] sm:$0xff] }
 0x30d   :  { %v8577_v49 = vcombine.low %v1102_v41, %v1106_v42 }
 0x30e   :  { %4470 = vmatpush1.bf16.msra.mxu1 %v8505_v27  ;;  %v9430_v27 = vld [vmem:[#allocation11 + $0x268] ss:$28 sps:$4 sm:$0xff]  }
 0x30f   :  { %7433 = vmatpush1.bf16.msra.mxu0 %v9406_v44  ;;  %4471 = vmatprep.subr.bf16.mxu1 %v8514_v45  ;;  %v8578_v44 = vcombine.high %v1102_v41, %v1106_v42  ;;  %v9435_v45 = vld [vmem:[#allocation11 + $0x2a4] ss:$28 sps:$4 sm:$0xff]  }
 0x310   :  { %7434 = vmatprep.subr.bf16.mxu0 %v9411_v46  ;;  %v1110_v46 = vld [vmem:[#allocation8 + $0xb58] sm:$0xff]  ;;  %v9454_v41 = vld [vmem:[#allocation11 + $0x428] ss:$28 sps:$4 sm:$0xff]  }
 0x311   :  { %v8585_v56 = vcombine.low %v1110_v46, %v1114_v31 }
 0x312   :  { %4472 = vmatpush1.bf16.msra.mxu1 %v8513_v33  ;;  %v9433_v33 = vld [vmem:[#allocation11 + $0x2a0] ss:$28 sps:$4 sm:$0xff]  }
 0x313   :  { %7435 = vmatpush1.bf16.msra.mxu0 %v9409_v53  ;;  %4473 = vmatprep.subr.bf16.mxu1 %v8522_v54  ;;  %v8586_v53 = vcombine.high %v1110_v46, %v1114_v31  ;;  %v9438_v54 = vld [vmem:[#allocation11 + $0x2dc] ss:$28 sps:$4 sm:$0xff]  }
 0x314   :  { %7436 = vmatprep.subr.bf16.mxu0 %v9414_v52  ;;  %v1118_v52 = vld [vmem:[#allocation8 + $0xb98] sm:$0xff]  ;;  %v9457_v46 = vld [vmem:[#allocation11 + $0x460] ss:$28 sps:$4 sm:$0xff]  }
 0x315   :  { %v8593_v1 = vcombine.low %v1118_v52, %v1122_v55 }
 0x316   :  { %4474 = vmatpush1.bf16.msra.mxu1 %v8521_v57  ;;  %v9436_v57 = vld [vmem:[#allocation11 + $0x2d8] ss:$28 sps:$4 sm:$0xff]  }
 0x317   :  { %7437 = vmatpush1.bf16.msra.mxu0 %v9412_v59  ;;  %4475 = vmatprep.subr.bf16.mxu1 %v8530_v60  ;;  %v8594_v59 = vcombine.high %v1118_v52, %v1122_v55  ;;  %v9441_v60 = vld [vmem:[#allocation11 + $0x314] ss:$28 sps:$4 sm:$0xff]   ;;  %v1276_v52 = vrot.slane %v10508_v51, %v10429_v18 }
 0x318   :  { %7438 = vmatprep.subr.bf16.mxu0 %v9417_v61  ;;  %v1126_v61 = vld [vmem:[#allocation8 + $0xbd8] sm:$0xff] }
 0x319   :  { %v8601_v7 = vcombine.low %v1126_v61, %v1130_v63 }
 0x31a   :  { %4476 = vmatpush1.bf16.msra.mxu1 %v8529_v2  ;;  %v9439_v2 = vld [vmem:[#allocation11 + $0x310] ss:$28 sps:$4 sm:$0xff]  }
 0x31b   :  { %7439 = vmatpush1.bf16.msra.mxu0 %v9415_v3  ;;  %4477 = vmatprep.subr.bf16.mxu1 %v8538_v4  ;;  %v8602_v3 = vcombine.high %v1126_v61, %v1130_v63  ;;  %v9444_v4 = vld [vmem:[#allocation11 + $0x34c] ss:$28 sps:$4 sm:$0xff]   ;;  %v1190_v61 = vld [vmem:[#allocation8 + $0xdd8] sm:$0xff] }
 0x31c   :  { %7440 = vmatprep.subr.bf16.mxu0 %v9420_v5  ;;  %v1134_v5 = vld [vmem:[#allocation8 + $0xc18] sm:$0xff] }
 0x31d   :  { %v8609_v19 = vcombine.low %v1134_v5, %v1138_v6  ;;  %v1194_v63 = vld [vmem:[#allocation8 + $0xdf8] sm:$0xff] }
 0x31e   :  { %4478 = vmatpush1.bf16.msra.mxu1 %v8537_v15  ;;  %v9442_v15 = vld [vmem:[#allocation11 + $0x348] ss:$28 sps:$4 sm:$0xff]  }
 0x31f   :  { %7441 = vmatpush1.bf16.msra.mxu0 %v9418_v8  ;;  %4479 = vmatprep.subr.bf16.mxu1 %v8546_v9  ;;  %v8610_v8 = vcombine.high %v1134_v5, %v1138_v6  ;;  %v9447_v9 = vld [vmem:[#allocation11 + $0x384] ss:$28 sps:$4 sm:$0xff]  }
 0x320   :  { %7442 = vmatprep.subr.bf16.mxu0 %v9423_v11  ;;  %v1142_v11 = vld [vmem:[#allocation8 + $0xc58] sm:$0xff] }
 0x321   :  { %v8617_v26 = vcombine.low %v1142_v11, %v1146_v12 }
 0x322   :  { %4480 = vmatpush1.bf16.msra.mxu1 %v8545_v20  ;;  %v9445_v20 = vld [vmem:[#allocation11 + $0x380] ss:$28 sps:$4 sm:$0xff]  }
 0x323   :  { %7443 = vmatpush1.bf16.msra.mxu0 %v9421_v21  ;;  %4481 = vmatprep.subr.bf16.mxu1 %v8554_v22  ;;  %v8618_v21 = vcombine.high %v1142_v11, %v1146_v12  ;;  %v9450_v22 = vld [vmem:[#allocation11 + $0x3bc] ss:$28 sps:$4 sm:$0xff]   ;;  %v1198_v11 = vld [vmem:[#allocation8 + $0xe18] sm:$0xff] }
 0x324   :  { %7444 = vmatprep.subr.bf16.mxu0 %v9426_v24  ;;  %v1150_v24 = vld [vmem:[#allocation8 + $0xc98] sm:$0xff] }
 0x325   :  { %v8625_v0 = vcombine.low %v1150_v24, %v1154_v25  ;;  %v1202_v12 = vld [vmem:[#allocation8 + $0xe38] sm:$0xff] }
 0x326   :  { %4482 = vmatpush1.bf16.msra.mxu1 %v8553_v28  ;;  %v9448_v28 = vld [vmem:[#allocation11 + $0x3b8] ss:$28 sps:$4 sm:$0xff]  }
 0x327   :  { %7445 = vmatpush1.bf16.msra.mxu0 %v9424_v29  ;;  %4483 = vmatprep.subr.bf16.mxu1 %v8562_v32  ;;  %v8626_v29 = vcombine.high %v1150_v24, %v1154_v25  ;;  %v9453_v32 = vld [vmem:[#allocation11 + $0x3f4] ss:$28 sps:$4 sm:$0xff]   ;;  %v8665_v24 = vcombine.low %v1190_v61, %v1194_v63 }
 0x328   :  { %7446 = vmatprep.subr.bf16.mxu0 %v9429_v35  ;;  %v1158_v35 = vld [vmem:[#allocation8 + $0xcd8] sm:$0xff] }
 0x32a   :  { %4484 = vmatpush1.bf16.msra.mxu1 %v8561_v48  ;;  %v9451_v48 = vld [vmem:[#allocation11 + $0x3f0] ss:$28 sps:$4 sm:$0xff]  }
 0x32b   :  { %7447 = vmatpush1.bf16.msra.mxu0 %v9427_v23  ;;  %4485 = vmatprep.subr.bf16.mxu1 %v8570_v50  ;;  %v9456_v23 = vld [vmem:[#allocation11 + $0x42c] ss:$28 sps:$4 sm:$0xff]   ;;  %v1166_v50 = vld [vmem:[#allocation8 + $0xd18] sm:$0xff] }
 0x32c   :  { %7448 = vmatprep.subr.bf16.mxu0 %v9432_v40  ;;  %v1170_v40 = vld [vmem:[#allocation8 + $0xd38] sm:$0xff] }
 0x32d   :  { %v8642_v42 = vcombine.high %v1166_v50, %v1170_v40 }
 0x32e   :  { %4486 = vmatpush1.bf16.msra.mxu1 %v8569_v39  ;;  %v9459_v39 = vld [vmem:[#allocation11 + $0x464] ss:$28 sps:$4 sm:$0xff]  }
 0x32f   :  { %7449 = vmatpush1.bf16.msra.mxu0 %v9430_v27  ;;  %4487 = vmatprep.subr.bf16.mxu1 %v8578_v44  ;;  %v1174_v27 = vld [vmem:[#allocation8 + $0xd58] sm:$0xff] }
 0x330   :  { %7450 = vmatprep.subr.bf16.mxu0 %v9435_v45  ;;  %v1178_v44 = vld [vmem:[#allocation8 + $0xd78] sm:$0xff]  ;;  %v8641_v45 = vcombine.low %v1166_v50, %v1170_v40 }
 0x331   :  { %v8650_v31 = vcombine.high %v1174_v27, %v1178_v44  ;;  %v8649_v55 = vcombine.low %v1174_v27, %v1178_v44  ;;  %v1214_v50 = vld [vmem:[#allocation8 + $0xe98] sm:$0xff] }
 0x332   :  { %4488 = vmatpush1.bf16.msra.mxu1 %v8577_v49  ;;  %v9462_v49 = vld [vmem:[#allocation11 + $0x49c] ss:$28 sps:$4 sm:$0xff]   ;;  %v1218_v40 = vld [vmem:[#allocation8 + $0xeb8] sm:$0xff] }
 0x333   :  { %7451 = vmatpush1.bf16.msra.mxu0 %v9433_v33  ;;  %4489 = vmatprep.subr.bf16.mxu1 %v8586_v53  ;;  %v1182_v33 = vld [vmem:[#allocation8 + $0xd98] sm:$0xff] }
 0x334   :  { %7452 = vmatprep.subr.bf16.mxu0 %v9438_v54  ;;  %v1186_v53 = vld [vmem:[#allocation8 + $0xdb8] sm:$0xff]  ;;  %v1272_v54 = vrot.slane %v10508_v51, %v10423_v16 }
 0x335   :  { %v8657_v5 = vcombine.low %v1182_v33, %v1186_v53  ;;  %v9463_v51 = vld [vmem:[#allocation11 + $0x4d0] ss:$28 sps:$4 sm:$0xff]  }
 0x336   :  { %4490 = vmatpush1.bf16.msra.mxu1 %v8585_v56  ;;  %v9460_v56 = vld [vmem:[#allocation11 + $0x498] ss:$28 sps:$4 sm:$0xff]  }
 0x337   :  { %7453 = vmatpush1.bf16.msra.mxu0 %v9436_v57  ;;  %4491 = vmatprep.subr.bf16.mxu1 %v8594_v59  ;;  %v8658_v57 = vcombine.high %v1182_v33, %v1186_v53  ;;  %v1222_v27 = vld [vmem:[#allocation8 + $0xed8] sm:$0xff] }
 0x338   :  { %7454 = vmatprep.subr.bf16.mxu0 %v9441_v60  ;;  %v9465_v60 = vld [vmem:[#allocation11 + $0x4d4] ss:$28 sps:$4 sm:$0xff]  }
 0x339   :  { %v1226_v44 = vld [vmem:[#allocation8 + $0xef8] sm:$0xff] }
 0x33a   :  { %4492 = vmatpush1.bf16.msra.mxu1 %v8593_v1  ;;  %v1230_v33 = vld [vmem:[#allocation8 + $0xf18] sm:$0xff] }
 0x33b   :  { %7455 = vmatpush1.bf16.msra.mxu0 %v9439_v2  ;;  %4493 = vmatprep.subr.bf16.mxu1 %v8602_v3  ;;  %v1234_v53 = vld [vmem:[#allocation8 + $0xf38] sm:$0xff] }
 0x33c   :  { %7456 = vmatprep.subr.bf16.mxu0 %v9444_v4 }
 0x33e   :  { %4494 = vmatpush1.bf16.msra.mxu1 %v8601_v7 }
 0x33f   :  { %7457 = vmatpush1.bf16.msra.mxu0 %v9442_v15  ;;  %4506 = vmatprep.subr.bf16.mxu1 %v8610_v8  ;;  %v8666_v15 = vcombine.high %v1190_v61, %v1194_v63  ;;  %v9481_v61 = vld [vmem:[#allocation11 + $0x620] ss:$28 sps:$4 sm:$0xff]  }
 0x340   :  { %7469 = vmatprep.subr.bf16.mxu0 %v9447_v9  ;;  %v9468_v9 = vld [vmem:[#allocation11 + $0x50c] ss:$28 sps:$4 sm:$0xff]  }
 0x341   :  { %4496 = vmatmul.mubr.bf16.vlgmr.msra.gmra.mrb[16].mxu1 %v10471_v36  ;;  %v8634_v36 = vcombine.high %v1158_v35, %v1162_v37 }
 0x342   :  { %7459 = vmatmul.mubr.bf16.vlgmr.msra.gmra.mrb[16].mxu0 %v10518_v58  ;;  %4507 = vmatpush1.bf16.msra.mxu1 %v8609_v19 }
 0x343   :  { %4538 = vmatprep.mubr.bf16.mxu1 %v10478_v47  ;;  %7470 = vmatpush1.bf16.msra.mxu0 %v9445_v20  ;;  %v8633_v47 = vcombine.low %v1158_v35, %v1162_v37  ;;  %v1206_v35 = vld [vmem:[#allocation8 + $0xe58] sm:$0xff] }
 0x344   :  { %4508 = vmatprep.subr.bf16.mxu1 %v8618_v21  ;;  %7471 = vmatprep.subr.bf16.mxu0 %v9450_v22  ;;  %v1210_v37 = vld [vmem:[#allocation8 + $0xe78] sm:$0xff] }
 0x346   :  { %4509 = vmatpush1.bf16.msra.mxu1 %v8617_v26  ;;  %v9466_v26 = vld [vmem:[#allocation11 + $0x508] ss:$28 sps:$4 sm:$0xff]  }
 0x347   :  { %7472 = vmatpush1.bf16.msra.mxu0 %v9448_v28  ;;  %4510 = vmatprep.subr.bf16.mxu1 %v8626_v29  ;;  %v8674_v28 = vcombine.high %v1198_v11, %v1202_v12 }
 0x348   :  { %7473 = vmatprep.subr.bf16.mxu0 %v9453_v32  ;;  %v9471_v32 = vld [vmem:[#allocation11 + $0x544] ss:$28 sps:$4 sm:$0xff]  }
 0x34a   :  { %4511 = vmatpush1.bf16.msra.mxu1 %v8625_v0  ;;  %v8673_v0 = vcombine.low %v1198_v11, %v1202_v12  ;;  %v9492_v12 = vld [vmem:[#allocation11 + $0x6cc] ss:$28 sps:$4 sm:$0xff]  }
 0x34b   :  { %7474 = vmatpush1.bf16.msra.mxu0 %v9451_v48  ;;  %4512 = vmatprep.subr.bf16.mxu1 %v8634_v36  ;;  %v9469_v48 = vld [vmem:[#allocation11 + $0x540] ss:$28 sps:$4 sm:$0xff]   ;;  %v8682_v36 = vcombine.high %v1206_v35, %v1210_v37 }
 0x34c   :  { %7475 = vmatprep.subr.bf16.mxu0 %v9456_v23  ;;  %v9474_v23 = vld [vmem:[#allocation11 + $0x57c] ss:$28 sps:$4 sm:$0xff]  }
 0x34e   :  { %4513 = vmatpush1.bf16.msra.mxu1 %v8633_v47  ;;  %v8681_v47 = vcombine.low %v1206_v35, %v1210_v37  ;;  %v9496_v35 = vld [vmem:[#allocation11 + $0x40] ss:$28 sps:$4 sm:$0xff]  }
 0x34f   :  { %7476 = vmatpush1.bf16.msra.mxu0 %v9454_v41  ;;  %4514 = vmatprep.subr.bf16.mxu1 %v8642_v42  ;;  %v9472_v41 = vld [vmem:[#allocation11 + $0x578] ss:$28 sps:$4 sm:$0xff]   ;;  %v8690_v42 = vcombine.high %v1214_v50, %v1218_v40 }
 0x350   :  { %7477 = vmatprep.subr.bf16.mxu0 %v9459_v39  ;;  %v9477_v39 = vld [vmem:[#allocation11 + $0x5b4] ss:$28 sps:$4 sm:$0xff]   ;;  %v9501_v37 = vld [vmem:[#allocation11 + $0x7c] ss:$28 sps:$4 sm:$0xff]  }
 0x352   :  { %4515 = vmatpush1.bf16.msra.mxu1 %v8641_v45  ;;  %v8689_v45 = vcombine.low %v1214_v50, %v1218_v40  ;;  %v9529_v50 = vld [vmem:[#allocation11 + $0x770] ss:$28 sps:$4 sm:$0xff]  }
 0x353   :  { %7478 = vmatpush1.bf16.msra.mxu0 %v9457_v46  ;;  %4516 = vmatprep.subr.bf16.mxu1 %v8650_v31  ;;  %v9475_v46 = vld [vmem:[#allocation11 + $0x5b0] ss:$28 sps:$4 sm:$0xff]   ;;  %v8698_v31 = vcombine.high %v1222_v27, %v1226_v44 }
 0x354   :  { %v4196_v59 = vpop.f32.mrb[12].mxu1  ;;  %7479 = vmatprep.subr.bf16.mxu0 %v9462_v49  ;;  %v9480_v49 = vld [vmem:[#allocation11 + $0x5ec] ss:$28 sps:$4 sm:$0xff]  }
 0x355   :  { %v9275_v1 = vadd.f32 %v4196_v59, %v1272_v54  ;;  %v4198_v2 = vpop.f32.mrb[13].mxu1  ;;  %v1242_v59 = vld [vmem:[#allocation8 + $0xf78] sm:$0xff] }
 0x356   :  { %v9276_v3 = vadd.f32 %v4198_v2, %v1276_v52  ;;  %v4200_v4 = vpop.f32.mrb[14].mxu1  ;;  %4517 = vmatpush1.bf16.msra.mxu1 %v8649_v55  ;;  %v8706_v55 = vcombine.high %v1230_v33, %v1234_v53  ;;  %v1246_v2 = vld [vmem:[#allocation8 + $0xf98] sm:$0xff] }
 0x357   :  { %v9277_v6 = vadd.f32 %v4200_v4, %v1272_v54  ;;  %7480 = vmatpush1.bf16.msra.mxu0 %v9460_v56  ;;  %v4202_v7 = vpop.f32.mrb[15].mxu1  ;;  %4518 = vmatprep.subr.bf16.mxu1 %v8658_v57  ;;  %v4551_v19 = vmax.f32 %v9275_v1, 0.0  ;;  %v8697_v54 = vcombine.low %v1222_v27, %v1226_v44  ;;  %v9483_v56 = vld [vmem:[#allocation11 + $0x624] ss:$28 sps:$4 sm:$0xff]   ;;  %v1238_v57 = vld [vmem:[#allocation8 + $0xf58] sm:$0xff] }
 0x358   :  { %v9278_v8 = vadd.f32 %v4202_v7, %v1276_v52  ;;  %7481 = vmatprep.subr.bf16.mxu0 %v9465_v60  ;;  %v4552_v21 = vmax.f32 %v9276_v3, 0.0  ;;  %v9478_v52 = vld [vmem:[#allocation11 + $0x5e8] ss:$28 sps:$4 sm:$0xff]   ;;  %v8705_v60 = vcombine.low %v1230_v33, %v1234_v53  ;;  %v8714_v63 = vcombine.high %v1238_v57, %v1242_v59  ;;  %v9486_v1 = vld [vmem:[#allocation11 + $0x65c] ss:$28 sps:$4 sm:$0xff]   ;;  %v1250_v3 = vld [vmem:[#allocation8 + $0xfb8] sm:$0xff] }
 0x359   :  { %v4559_v20 = vmax.f32 %v9277_v6, 0.0  ;;  %v8713_v4 = vcombine.low %v1238_v57, %v1242_v59  ;;  %v8722_v6 = vcombine.high %v1246_v2, %v1250_v3  ;;  %v9489_v7 = vld [vmem:[#allocation11 + $0x694] ss:$28 sps:$4 sm:$0xff]   ;;  %v9510_v27 = vld [vmem:[#allocation11 + $0x124] ss:$28 sps:$4 sm:$0xff]  }
 0x35a   :  { %v4560_v22 = vmax.f32 %v9278_v8, 0.0  ;;  %4519 = vmatpush1.bf16.msra.mxu1 %v8657_v5  ;;  %v9484_v5 = vld [vmem:[#allocation11 + $0x658] ss:$28 sps:$4 sm:$0xff]   ;;  %v8721_v8 = vcombine.low %v1246_v2, %v1250_v3  ;;  %v9502_v40 = vld [vmem:[#allocation11 + $0xb0] ss:$28 sps:$4 sm:$0xff]  }
 0x35b   :  { %v10533_v25 = vpack.c.bf16 %v4559_v20, %v4551_v19  ;;  %7482 = vmatpush1.bf16.msra.mxu0 %v9463_v51  ;;  %4520 = vmatprep.subr.bf16.mxu1 %v8666_v15  ;;  %v1254_v51 = vld [vmem:[#allocation8 + $0xfd8] sm:$0xff]  ;;  %v9490_v20 = vld [vmem:[#allocation11 + $0x6c8] ss:$28 sps:$4 sm:$0xff]   ;;  %v9541_v44 = vld [vmem:[#allocation11 + $0x7e0] ss:$28 sps:$4 sm:$0xff]  }
 0x35c   :  { %v10535_v29 = vpack.c.bf16 %v4560_v22, %v4552_v21  ;;  %7483 = vmatprep.subr.bf16.mxu0 %v9468_v9  ;;  %v1258_v15 = vld [vmem:[#allocation8 + $0xff8] sm:$0xff]  ;;  %v9495_v21 = vld [vmem:[#allocation11 + $0xc] ss:$28 sps:$4 sm:$0xff]   ;;  %v9519_v22 = vld [vmem:[#allocation11 + $0x704] ss:$28 sps:$4 sm:$0xff]  }
 0x35d   :  { %v9487_v9 = vld [vmem:[#allocation11 + $0x690] ss:$28 sps:$4 sm:$0xff]   ;;  %v8730_v11 = vcombine.high %v1254_v51, %v1258_v15  ;;  %v8729_v19 = vcombine.low %v1254_v51, %v1258_v15  ;;  %v9511_v53 = vld [vmem:[#allocation11 + $0x158] ss:$28 sps:$4 sm:$0xff]   ;;  %v9559_v59 = vld [vmem:[#allocation11 + $0x888] ss:$28 sps:$4 sm:$0xff]  }
 0x35e   :  { %4521 = vmatpush1.bf16.msra.mxu1 %v8665_v24  ;;  %7501 = vmatprep.mubr.bf16.mxu0 %v10535_v29  ;;  %v9493_v24 = vld [vmem:[#allocation11 + $0x8] ss:$28 sps:$4 sm:$0xff]   ;;  %v9555_v33 = vld [vmem:[#allocation11 + $0x854] ss:$28 sps:$4 sm:$0xff]   ;;  %v9573_v2 = vld [vmem:[#allocation11 + $0x8fc] ss:$28 sps:$4 sm:$0xff]  }
 0x35f   :  { %7484 = vmatpush1.bf16.msra.mxu0 %v9466_v26  ;;  %4522 = vmatprep.subr.bf16.mxu1 %v8674_v28  ;;  %v9498_v26 = vld [vmem:[#allocation11 + $0x44] ss:$28 sps:$4 sm:$0xff]   ;;  %v9522_v57 = vld [vmem:[#allocation11 + $0x1cc] ss:$28 sps:$4 sm:$0xff]   ;;  %v9540_v51 = vld [vmem:[#allocation11 + $0x274] ss:$28 sps:$4 sm:$0xff]  }
 0x360   :  { %7485 = vmatprep.subr.bf16.mxu0 %v9471_v32  ;;  %v9517_v28 = vld [vmem:[#allocation11 + $0x700] ss:$28 sps:$4 sm:$0xff]   ;;  %v9577_v15 = vld [vmem:[#allocation11 + $0x930] ss:$28 sps:$4 sm:$0xff]  }
 0x361   :  { %v9525_v32 = vld [vmem:[#allocation11 + $0x73c] ss:$28 sps:$4 sm:$0xff]  }
 0x362   :  { %4523 = vmatpush1.bf16.msra.mxu1 %v8673_v0  ;;  %v9523_v0 = vld [vmem:[#allocation11 + $0x738] ss:$28 sps:$4 sm:$0xff]   ;;  %v9526_v3 = vld [vmem:[#allocation11 + $0x200] ss:$28 sps:$4 sm:$0xff]  }
 0x363   :  { %7486 = vmatpush1.bf16.msra.mxu0 %v9469_v48  ;;  %4524 = vmatprep.subr.bf16.mxu1 %v8682_v36  ;;  %v9531_v48 = vld [vmem:[#allocation11 + $0x774] ss:$28 sps:$4 sm:$0xff]  }
 0x364   :  { %7487 = vmatprep.subr.bf16.mxu0 %v9474_v23  ;;  %v9499_v36 = vld [vmem:[#allocation11 + $0x78] ss:$28 sps:$4 sm:$0xff]  }
 0x365   :  { %v9504_v23 = vld [vmem:[#allocation11 + $0xb4] ss:$28 sps:$4 sm:$0xff]  }
 0x366   :  { %4525 = vmatpush1.bf16.msra.mxu1 %v8681_v47  ;;  %v9507_v47 = vld [vmem:[#allocation11 + $0xec] ss:$28 sps:$4 sm:$0xff]  }
 0x367   :  { %7488 = vmatpush1.bf16.msra.mxu0 %v9472_v41  ;;  %4526 = vmatprep.subr.bf16.mxu1 %v8690_v42  ;;  %v9535_v41 = vld [vmem:[#allocation11 + $0x7a8] ss:$28 sps:$4 sm:$0xff]  }
 0x368   :  { %7489 = vmatprep.subr.bf16.mxu0 %v9477_v39  ;;  %v9543_v42 = vld [vmem:[#allocation11 + $0x7e4] ss:$28 sps:$4 sm:$0xff]  }
 0x369   :  { %v9505_v39 = vld [vmem:[#allocation11 + $0xe8] ss:$28 sps:$4 sm:$0xff]  }
 0x36a   :  { %4527 = vmatpush1.bf16.msra.mxu1 %v8689_v45  ;;  %v9549_v45 = vld [vmem:[#allocation11 + $0x81c] ss:$28 sps:$4 sm:$0xff]  }
 0x36b   :  { %7490 = vmatpush1.bf16.msra.mxu0 %v9475_v46  ;;  %4528 = vmatprep.subr.bf16.mxu1 %v8698_v31  ;;  %v9508_v46 = vld [vmem:[#allocation11 + $0x120] ss:$28 sps:$4 sm:$0xff]  }
 0x36c   :  { %7491 = vmatprep.subr.bf16.mxu0 %v9480_v49  ;;  %v9513_v31 = vld [vmem:[#allocation11 + $0x15c] ss:$28 sps:$4 sm:$0xff]  }
 0x36d   :  { %v9547_v49 = vld [vmem:[#allocation11 + $0x818] ss:$28 sps:$4 sm:$0xff]  }
 0x36e   :  { %4529 = vmatpush1.bf16.msra.mxu1 %v8697_v54  ;;  %v9516_v54 = vld [vmem:[#allocation11 + $0x194] ss:$28 sps:$4 sm:$0xff]  }
 0x36f   :  { %7492 = vmatpush1.bf16.msra.mxu0 %v9478_v52  ;;  %4530 = vmatprep.subr.bf16.mxu1 %v8706_v55  ;;  %v9553_v52 = vld [vmem:[#allocation11 + $0x850] ss:$28 sps:$4 sm:$0xff]  }
 0x370   :  { %7493 = vmatprep.subr.bf16.mxu0 %v9483_v56  ;;  %v9561_v55 = vld [vmem:[#allocation11 + $0x88c] ss:$28 sps:$4 sm:$0xff]  }
 0x371   :  { %v9514_v56 = vld [vmem:[#allocation11 + $0x190] ss:$28 sps:$4 sm:$0xff]  }
 0x372   :  { %4531 = vmatpush1.bf16.msra.mxu1 %v8705_v60  ;;  %v9567_v60 = vld [vmem:[#allocation11 + $0x8c4] ss:$28 sps:$4 sm:$0xff]  }
 0x373   :  { %7494 = vmatpush1.bf16.msra.mxu0 %v9481_v61  ;;  %4532 = vmatprep.subr.bf16.mxu1 %v8714_v63  ;;  %v9520_v61 = vld [vmem:[#allocation11 + $0x1c8] ss:$28 sps:$4 sm:$0xff]  }
 0x374   :  { %7495 = vmatprep.subr.bf16.mxu0 %v9486_v1  ;;  %v9528_v63 = vld [vmem:[#allocation11 + $0x204] ss:$28 sps:$4 sm:$0xff]  }
 0x375   :  { %v9565_v1 = vld [vmem:[#allocation11 + $0x8c0] ss:$28 sps:$4 sm:$0xff]  }
 0x376   :  { %4533 = vmatpush1.bf16.msra.mxu1 %v8713_v4  ;;  %v9534_v4 = vld [vmem:[#allocation11 + $0x23c] ss:$28 sps:$4 sm:$0xff]  }
 0x377   :  { %7496 = vmatpush1.bf16.msra.mxu0 %v9484_v5  ;;  %4534 = vmatprep.subr.bf16.mxu1 %v8722_v6  ;;  %v9571_v5 = vld [vmem:[#allocation11 + $0x8f8] ss:$28 sps:$4 sm:$0xff]  }
 0x378   :  { %7497 = vmatprep.subr.bf16.mxu0 %v9489_v7  ;;  %v9579_v6 = vld [vmem:[#allocation11 + $0x934] ss:$28 sps:$4 sm:$0xff]  }
 0x379   :  { %v9532_v7 = vld [vmem:[#allocation11 + $0x238] ss:$28 sps:$4 sm:$0xff]  }
 0x37a   :  { %4535 = vmatpush1.bf16.msra.mxu1 %v8721_v8  ;;  %v9585_v8 = vld [vmem:[#allocation11 + $0x96c] ss:$28 sps:$4 sm:$0xff]  }
 0x37b   :  { %7498 = vmatpush1.bf16.msra.mxu0 %v9487_v9  ;;  %4536 = vmatprep.subr.bf16.mxu1 %v8730_v11  ;;  %v9538_v9 = vld [vmem:[#allocation11 + $0x270] ss:$28 sps:$4 sm:$0xff]  }
 0x37c   :  { %7499 = vmatprep.subr.bf16.mxu0 %v9492_v12  ;;  %v9546_v11 = vld [vmem:[#allocation11 + $0x2ac] ss:$28 sps:$4 sm:$0xff]  }
 0x37d   :  { %v9583_v12 = vld [vmem:[#allocation11 + $0x968] ss:$28 sps:$4 sm:$0xff]  }
 0x37e   :  { %4537 = vmatpush1.bf16.msra.mxu1 %v8729_v19  ;;  %v9591_v19 = vld [vmem:[#allocation11 + $0x9a4] ss:$28 sps:$4 sm:$0xff]  }
 0x37f   :  { %7500 = vmatpush1.bf16.msra.mxu0 %v9490_v20  ;;  %7598 = vmatprep.subr.bf16.mxu1 %v9495_v21  ;;  %v9544_v20 = vld [vmem:[#allocation11 + $0x2a8] ss:$28 sps:$4 sm:$0xff]  }
 0x380   :  { %7512 = vmatprep.subr.bf16.mxu0 %v9519_v22  ;;  %v9552_v21 = vld [vmem:[#allocation11 + $0x2e4] ss:$28 sps:$4 sm:$0xff]  }
 0x381   :  { %4539 = vmatmul.mubr.bf16.vlgmr.msra.gmra.mrb[16].mxu1 %v10475_v43  ;;  %v9537_v43 = vld [vmem:[#allocation11 + $0x7ac] ss:$28 sps:$4 sm:$0xff]   ;;  %v9589_v22 = vld [vmem:[#allocation11 + $0x9a0] ss:$28 sps:$4 sm:$0xff]  }
 0x382   :  { %7502 = vmatmul.mubr.bf16.vlgmr.msra.gmra.mrb[16].mxu0 %v10533_v25  ;;  %7599 = vmatpush1.bf16.msra.mxu1 %v9493_v24  ;;  %v9597_v24 = vld [vmem:[#allocation11 + $0x9dc] ss:$28 sps:$4 sm:$0xff]  }
 0x383   :  { %7630 = vmatprep.mubr.bf16.mxu1 %v10520_v62  ;;  %7600 = vmatprep.subr.bf16.mxu1 %v9498_v26  ;;  %v9550_v26 = vld [vmem:[#allocation11 + $0x2e0] ss:$28 sps:$4 sm:$0xff]  }
 0x384   :  { %7513 = vmatpush1.bf16.msra.mxu0 %v9517_v28  ;;  %v9558_v28 = vld [vmem:[#allocation11 + $0x31c] ss:$28 sps:$4 sm:$0xff]  }
 0x385   :  { %7514 = vmatprep.subr.bf16.mxu0 %v9525_v32  ;;  %v9595_v32 = vld [vmem:[#allocation11 + $0x9d8] ss:$28 sps:$4 sm:$0xff]  }
 0x386   :  { %7601 = vmatpush1.bf16.msra.mxu1 %v9496_v35  ;;  %v9603_v35 = vld [vmem:[#allocation11 + $0xa14] ss:$28 sps:$4 sm:$0xff]  }
 0x387   :  { %7602 = vmatprep.subr.bf16.mxu1 %v9501_v37  ;;  %v9556_v37 = vld [vmem:[#allocation11 + $0x318] ss:$28 sps:$4 sm:$0xff]  }
 0x388   :  { %7515 = vmatpush1.bf16.msra.mxu0 %v9523_v0  ;;  %v9564_v0 = vld [vmem:[#allocation11 + $0x354] ss:$28 sps:$4 sm:$0xff]  }
 0x389   :  { %7516 = vmatprep.subr.bf16.mxu0 %v9531_v48  ;;  %v9601_v48 = vld [vmem:[#allocation11 + $0xa10] ss:$28 sps:$4 sm:$0xff]  }
 0x38a   :  { %7603 = vmatpush1.bf16.msra.mxu1 %v9499_v36  ;;  %v9609_v36 = vld [vmem:[#allocation11 + $0xa4c] ss:$28 sps:$4 sm:$0xff]  }
 0x38b   :  { %7604 = vmatprep.subr.bf16.mxu1 %v9504_v23  ;;  %v9562_v23 = vld [vmem:[#allocation11 + $0x350] ss:$28 sps:$4 sm:$0xff]  }
 0x38c   :  { %7517 = vmatpush1.bf16.msra.mxu0 %v9529_v50  ;;  %v9570_v50 = vld [vmem:[#allocation11 + $0x38c] ss:$28 sps:$4 sm:$0xff]  }
 0x38d   :  { %7518 = vmatprep.subr.bf16.mxu0 %v9537_v43  ;;  %v9607_v43 = vld [vmem:[#allocation11 + $0xa48] ss:$28 sps:$4 sm:$0xff]  }
 0x38e   :  { %7605 = vmatpush1.bf16.msra.mxu1 %v9502_v40  ;;  %v9663_v40 = vld [vmem:[#allocation11 + $0xa84] ss:$28 sps:$4 sm:$0xff]  }
 0x38f   :  { %7606 = vmatprep.subr.bf16.mxu1 %v9507_v47  ;;  %v9568_v47 = vld [vmem:[#allocation11 + $0x388] ss:$28 sps:$4 sm:$0xff]  }
 0x390   :  { %7519 = vmatpush1.bf16.msra.mxu0 %v9535_v41  ;;  %v9576_v41 = vld [vmem:[#allocation11 + $0x3c4] ss:$28 sps:$4 sm:$0xff]  }
 0x391   :  { %7520 = vmatprep.subr.bf16.mxu0 %v9543_v42  ;;  %v9574_v42 = vld [vmem:[#allocation11 + $0x3c0] ss:$28 sps:$4 sm:$0xff]  }
 0x392   :  { %7607 = vmatpush1.bf16.msra.mxu1 %v9505_v39  ;;  %v9582_v39 = vld [vmem:[#allocation11 + $0x3fc] ss:$28 sps:$4 sm:$0xff]  }
 0x393   :  { %7608 = vmatprep.subr.bf16.mxu1 %v9510_v27  ;;  %v9580_v27 = vld [vmem:[#allocation11 + $0x3f8] ss:$28 sps:$4 sm:$0xff]  }
 0x394   :  { %7521 = vmatpush1.bf16.msra.mxu0 %v9541_v44  ;;  %v9588_v44 = vld [vmem:[#allocation11 + $0x434] ss:$28 sps:$4 sm:$0xff]  }
 0x395   :  { %7522 = vmatprep.subr.bf16.mxu0 %v9549_v45  ;;  %v9586_v45 = vld [vmem:[#allocation11 + $0x430] ss:$28 sps:$4 sm:$0xff]  }
 0x396   :  { %7609 = vmatpush1.bf16.msra.mxu1 %v9508_v46  ;;  %v9594_v46 = vld [vmem:[#allocation11 + $0x46c] ss:$28 sps:$4 sm:$0xff]  }
 0x397   :  { %7610 = vmatprep.subr.bf16.mxu1 %v9513_v31  ;;  %v9592_v31 = vld [vmem:[#allocation11 + $0x468] ss:$28 sps:$4 sm:$0xff]  }
 0x398   :  { %7523 = vmatpush1.bf16.msra.mxu0 %v9547_v49  ;;  %v9600_v49 = vld [vmem:[#allocation11 + $0x4a4] ss:$28 sps:$4 sm:$0xff]  }
 0x399   :  { %7524 = vmatprep.subr.bf16.mxu0 %v9555_v33  ;;  %v10543_v33 = vld [vmem:[#allocation10] sm:$0xff] }
 0x39a   :  { %7611 = vmatpush1.bf16.msra.mxu1 %v9511_v53  ;;  %v1280_v53 = vrot.slane %v10543_v33, %v10453_v30 }
 0x39b   :  { %7612 = vmatprep.subr.bf16.mxu1 %v9516_v54  ;;  %v9598_v54 = vld [vmem:[#allocation11 + $0x4a0] ss:$28 sps:$4 sm:$0xff]  }
 0x39c   :  { %7525 = vmatpush1.bf16.msra.mxu0 %v9553_v52  ;;  %v1284_v52 = vrot.slane %v10543_v33, %v10456_v34 }
 0x39d   :  { %7526 = vmatprep.subr.bf16.mxu0 %v9561_v55  ;;  %v9606_v55 = vld [vmem:[#allocation11 + $0x4dc] ss:$28 sps:$4 sm:$0xff]  }
 0x39e   :  { %7613 = vmatpush1.bf16.msra.mxu1 %v9514_v56 }
 0x39f   :  { %7614 = vmatprep.subr.bf16.mxu1 %v9522_v57 }
 0x3a0   :  { %7527 = vmatpush1.bf16.msra.mxu0 %v9559_v59 }
 0x3a1   :  { %7528 = vmatprep.subr.bf16.mxu0 %v9567_v60  ;;  %v9604_v60 = vld [vmem:[#allocation11 + $0x4d8] ss:$28 sps:$4 sm:$0xff]  }
 0x3a2   :  { %7615 = vmatpush1.bf16.msra.mxu1 %v9520_v61 }
 0x3a3   :  { %7616 = vmatprep.subr.bf16.mxu1 %v9528_v63 }
 0x3a4   :  { %7529 = vmatpush1.bf16.msra.mxu0 %v9565_v1  ;;  %v9612_v1 = vld [vmem:[#allocation11 + $0x514] ss:$28 sps:$4 sm:$0xff]  }
 0x3a5   :  { %7530 = vmatprep.subr.bf16.mxu0 %v9573_v2 }
 0x3a6   :  { %7617 = vmatpush1.bf16.msra.mxu1 %v9526_v3 }
 0x3a7   :  { %7618 = vmatprep.subr.bf16.mxu1 %v9534_v4 }
 0x3a8   :  { %7531 = vmatpush1.bf16.msra.mxu0 %v9571_v5 }
 0x3a9   :  { %7532 = vmatprep.subr.bf16.mxu0 %v9579_v6 }
 0x3aa   :  { %7619 = vmatpush1.bf16.msra.mxu1 %v9532_v7  ;;  %v9610_v7 = vld [vmem:[#allocation11 + $0x510] ss:$28 sps:$4 sm:$0xff]  }
 0x3ab   :  { %7620 = vmatprep.subr.bf16.mxu1 %v9540_v51 }
 0x3ac   :  { %7533 = vmatpush1.bf16.msra.mxu0 %v9577_v15 }
 0x3ad   :  { %7534 = vmatprep.subr.bf16.mxu0 %v9585_v8  ;;  %v9615_v8 = vld [vmem:[#allocation11 + $0x54c] ss:$28 sps:$4 sm:$0xff]  }
 0x3ae   :  { %7621 = vmatpush1.bf16.msra.mxu1 %v9538_v9 }
 0x3af   :  { %7622 = vmatprep.subr.bf16.mxu1 %v9546_v11 }
 0x3b0   :  { %7535 = vmatpush1.bf16.msra.mxu0 %v9583_v12  ;;  %v9661_v12 = vld [vmem:[#allocation11 + $0xa80] ss:$28 sps:$4 sm:$0xff]  }
 0x3b1   :  { %7536 = vmatprep.subr.bf16.mxu0 %v9591_v19  ;;  %v9613_v19 = vld [vmem:[#allocation11 + $0x548] ss:$28 sps:$4 sm:$0xff]  }
 0x3b2   :  { %7623 = vmatpush1.bf16.msra.mxu1 %v9544_v20  ;;  %v9669_v20 = vld [vmem:[#allocation11 + $0xabc] ss:$28 sps:$4 sm:$0xff]  }
 0x3b3   :  { %7624 = vmatprep.subr.bf16.mxu1 %v9552_v21  ;;  %v9618_v21 = vld [vmem:[#allocation11 + $0x584] ss:$28 sps:$4 sm:$0xff]  }
 0x3b4   :  { %7537 = vmatpush1.bf16.msra.mxu0 %v9589_v22  ;;  %v9667_v22 = vld [vmem:[#allocation11 + $0xab8] ss:$28 sps:$4 sm:$0xff]  }
 0x3b5   :  { %7538 = vmatprep.subr.bf16.mxu0 %v9597_v24  ;;  %v9616_v24 = vld [vmem:[#allocation11 + $0x580] ss:$28 sps:$4 sm:$0xff]  }
 0x3b6   :  { %7625 = vmatpush1.bf16.msra.mxu1 %v9550_v26  ;;  %v9675_v26 = vld [vmem:[#allocation11 + $0xaf4] ss:$28 sps:$4 sm:$0xff]  }
 0x3b7   :  { %7626 = vmatprep.subr.bf16.mxu1 %v9558_v28  ;;  %v9621_v28 = vld [vmem:[#allocation11 + $0x5bc] ss:$28 sps:$4 sm:$0xff]  }
 0x3b8   :  { %7539 = vmatpush1.bf16.msra.mxu0 %v9595_v32  ;;  %v9673_v32 = vld [vmem:[#allocation11 + $0xaf0] ss:$28 sps:$4 sm:$0xff]  }
 0x3b9   :  { %7540 = vmatprep.subr.bf16.mxu0 %v9603_v35  ;;  %v9619_v35 = vld [vmem:[#allocation11 + $0x5b8] ss:$28 sps:$4 sm:$0xff]  }
 0x3ba   :  { %7627 = vmatpush1.bf16.msra.mxu1 %v9556_v37  ;;  %v9681_v37 = vld [vmem:[#allocation11 + $0xb2c] ss:$28 sps:$4 sm:$0xff]  }
 0x3bb   :  { %7628 = vmatprep.subr.bf16.mxu1 %v9564_v0  ;;  %v9624_v0 = vld [vmem:[#allocation11 + $0x5f4] ss:$28 sps:$4 sm:$0xff]  }
 0x3bc   :  { %7541 = vmatpush1.bf16.msra.mxu0 %v9601_v48  ;;  %v9679_v48 = vld [vmem:[#allocation11 + $0xb28] ss:$28 sps:$4 sm:$0xff]  }
 0x3bd   :  { %7542 = vmatprep.subr.bf16.mxu0 %v9609_v36  ;;  %v9622_v36 = vld [vmem:[#allocation11 + $0x5f0] ss:$28 sps:$4 sm:$0xff]  }
 0x3be   :  { %7629 = vmatpush1.bf16.msra.mxu1 %v9562_v23  ;;  %v9687_v23 = vld [vmem:[#allocation11 + $0xb64] ss:$28 sps:$4 sm:$0xff]  }
 0x3bf   :  { %7641 = vmatprep.subr.bf16.mxu1 %v9570_v50  ;;  %v9627_v50 = vld [vmem:[#allocation11 + $0x62c] ss:$28 sps:$4 sm:$0xff]  }
 0x3c0   :  { %7543 = vmatpush1.bf16.msra.mxu0 %v9607_v43  ;;  %v9685_v43 = vld [vmem:[#allocation11 + $0xb60] ss:$28 sps:$4 sm:$0xff]  }
 0x3c1   :  { %7631 = vmatmul.mubr.bf16.vlgmr.msra.gmra.mrb[20].mxu1 %v10518_v58  ;;  %7555 = vmatprep.subr.bf16.mxu0 %v9663_v40  ;;  %v9625_v40 = vld [vmem:[#allocation11 + $0x628] ss:$28 sps:$4 sm:$0xff]  }
 0x3c2   :  { %7642 = vmatpush1.bf16.msra.mxu1 %v9568_v47  ;;  %7673 = vmatprep.mubr.bf16.mxu1 %v10535_v29  ;;  %v9693_v47 = vld [vmem:[#allocation11 + $0xb9c] ss:$28 sps:$4 sm:$0xff]  }
 0x3c3   :  { %7643 = vmatprep.subr.bf16.mxu1 %v9576_v41  ;;  %v9630_v41 = vld [vmem:[#allocation11 + $0x664] ss:$28 sps:$4 sm:$0xff]  }
 0x3c6   :  { %7644 = vmatpush1.bf16.msra.mxu1 %v9574_v42  ;;  %v9691_v42 = vld [vmem:[#allocation11 + $0xb98] ss:$28 sps:$4 sm:$0xff]  }
 0x3c7   :  { %7645 = vmatprep.subr.bf16.mxu1 %v9582_v39  ;;  %v9628_v39 = vld [vmem:[#allocation11 + $0x660] ss:$28 sps:$4 sm:$0xff]  }
 0x3ca   :  { %7646 = vmatpush1.bf16.msra.mxu1 %v9580_v27  ;;  %v9699_v27 = vld [vmem:[#allocation11 + $0xbd4] ss:$28 sps:$4 sm:$0xff]  }
 0x3cb   :  { %7647 = vmatprep.subr.bf16.mxu1 %v9588_v44  ;;  %v9633_v44 = vld [vmem:[#allocation11 + $0x69c] ss:$28 sps:$4 sm:$0xff]  }
 0x3ce   :  { %7648 = vmatpush1.bf16.msra.mxu1 %v9586_v45  ;;  %v9697_v45 = vld [vmem:[#allocation11 + $0xbd0] ss:$28 sps:$4 sm:$0xff]  }
 0x3cf   :  { %7649 = vmatprep.subr.bf16.mxu1 %v9594_v46  ;;  %v9631_v46 = vld [vmem:[#allocation11 + $0x698] ss:$28 sps:$4 sm:$0xff]  }
 0x3d2   :  { %7650 = vmatpush1.bf16.msra.mxu1 %v9592_v31  ;;  %v9705_v31 = vld [vmem:[#allocation11 + $0xc0c] ss:$28 sps:$4 sm:$0xff]  }
 0x3d3   :  { %7651 = vmatprep.subr.bf16.mxu1 %v9600_v49  ;;  %v9636_v49 = vld [vmem:[#allocation11 + $0x6d4] ss:$28 sps:$4 sm:$0xff]  }
 0x3d5   :  { %v4368_v56 = vpop.f32.mrb[12].mxu0 }
 0x3d6   :  { %v9279_v57 = vadd.f32 %v4368_v56, %v1280_v53  ;;  %v4370_v59 = vpop.f32.mrb[13].mxu0  ;;  %7652 = vmatpush1.bf16.msra.mxu1 %v9598_v54  ;;  %v9634_v54 = vld [vmem:[#allocation11 + $0x6d0] ss:$28 sps:$4 sm:$0xff]   ;;  %v9709_v56 = vld [vmem:[#allocation11 + $0xc40] ss:$28 sps:$4 sm:$0xff]  }
 0x3d7   :  { %v9280_v61 = vadd.f32 %v4370_v59, %v1284_v52  ;;  %v4372_v63 = vpop.f32.mrb[14].mxu0  ;;  %7653 = vmatprep.subr.bf16.mxu1 %v9606_v55  ;;  %v9639_v55 = vld [vmem:[#allocation11 + $0x70c] ss:$28 sps:$4 sm:$0xff]   ;;  %v9642_v59 = vld [vmem:[#allocation11 + $0x744] ss:$28 sps:$4 sm:$0xff]  }
 0x3d8   :  { %v9281_v2 = vadd.f32 %v4372_v63, %v1280_v53  ;;  %v4374_v3 = vpop.f32.mrb[15].mxu0  ;;  %v4553_v5 = vmax.f32 %v9279_v57, 0.0  ;;  %v9703_v53 = vld [vmem:[#allocation11 + $0xc08] ss:$28 sps:$4 sm:$0xff]   ;;  %v9640_v63 = vld [vmem:[#allocation11 + $0x740] ss:$28 sps:$4 sm:$0xff]  }
 0x3d9   :  { %v9282_v4 = vadd.f32 %v4374_v3, %v1284_v52  ;;  %v4554_v51 = vmax.f32 %v9280_v61, 0.0  ;;  %v9711_v52 = vld [vmem:[#allocation11 + $0xc44] ss:$28 sps:$4 sm:$0xff]   ;;  %v9715_v61 = vld [vmem:[#allocation11 + $0xc78] ss:$28 sps:$4 sm:$0xff]  }
 0x3da   :  { %v4561_v6 = vmax.f32 %v9281_v2, 0.0  ;;  %7654 = vmatpush1.bf16.msra.mxu1 %v9604_v60  ;;  %v9637_v57 = vld [vmem:[#allocation11 + $0x708] ss:$28 sps:$4 sm:$0xff]   ;;  %v9717_v60 = vld [vmem:[#allocation11 + $0xc7c] ss:$28 sps:$4 sm:$0xff]  }
 0x3db   :  { %v4562_v15 = vmax.f32 %v9282_v4, 0.0  ;;  %7655 = vmatprep.subr.bf16.mxu1 %v9612_v1  ;;  %v9723_v1 = vld [vmem:[#allocation11 + $0xcb4] ss:$28 sps:$4 sm:$0xff]   ;;  %v9645_v2 = vld [vmem:[#allocation11 + $0x77c] ss:$28 sps:$4 sm:$0xff]  }
 0x3dc   :  { %v10549_v9 = vpack.c.bf16 %v4561_v6, %v4553_v5  ;;  %v9721_v3 = vld [vmem:[#allocation11 + $0xcb0] ss:$28 sps:$4 sm:$0xff]   ;;  %v9643_v4 = vld [vmem:[#allocation11 + $0x778] ss:$28 sps:$4 sm:$0xff]  }
 0x3dd   :  { %v10551_v11 = vpack.c.bf16 %v4562_v15, %v4554_v51  ;;  %v9729_v5 = vld [vmem:[#allocation11 + $0xcec] ss:$28 sps:$4 sm:$0xff]   ;;  %v9648_v6 = vld [vmem:[#allocation11 + $0x7b4] ss:$28 sps:$4 sm:$0xff]   ;;  %v9735_v15 = vld [vmem:[#allocation11 + $0xd24] ss:$28 sps:$4 sm:$0xff]  }
 0x3de   :  { %7656 = vmatpush1.bf16.msra.mxu1 %v9610_v7  ;;  %v9727_v7 = vld [vmem:[#allocation11 + $0xce8] ss:$28 sps:$4 sm:$0xff]   ;;  %v9646_v51 = vld [vmem:[#allocation11 + $0x7b0] ss:$28 sps:$4 sm:$0xff]  }
 0x3df   :  { %7544 = vmatprep.mubr.bf16.mxu0 %v10551_v11  ;;  %7657 = vmatprep.subr.bf16.mxu1 %v9615_v8  ;;  %v9651_v8 = vld [vmem:[#allocation11 + $0x7ec] ss:$28 sps:$4 sm:$0xff]  }
 0x3e0   :  { %7545 = vmatmul.mubr.bf16.vlgmr.msra.gmra.mrb[16].mxu0 %v10549_v9 }
 0x3e1   :  { %7556 = vmatpush1.bf16.msra.mxu0 %v9661_v12  ;;  %v9733_v12 = vld [vmem:[#allocation11 + $0xd20] ss:$28 sps:$4 sm:$0xff]  }
 0x3e2   :  { %7658 = vmatpush1.bf16.msra.mxu1 %v9613_v19  ;;  %7557 = vmatprep.subr.bf16.mxu0 %v9669_v20  ;;  %v9649_v19 = vld [vmem:[#allocation11 + $0x7e8] ss:$28 sps:$4 sm:$0xff]   ;;  %v9741_v20 = vld [vmem:[#allocation11 + $0xd5c] ss:$28 sps:$4 sm:$0xff]  }
 0x3e3   :  { %7659 = vmatprep.subr.bf16.mxu1 %v9618_v21  ;;  %v9654_v21 = vld [vmem:[#allocation11 + $0x824] ss:$28 sps:$4 sm:$0xff]  }
 0x3e5   :  { %7558 = vmatpush1.bf16.msra.mxu0 %v9667_v22  ;;  %v9739_v22 = vld [vmem:[#allocation11 + $0xd58] ss:$28 sps:$4 sm:$0xff]  }
 0x3e6   :  { %7660 = vmatpush1.bf16.msra.mxu1 %v9616_v24  ;;  %7559 = vmatprep.subr.bf16.mxu0 %v9675_v26  ;;  %v9652_v24 = vld [vmem:[#allocation11 + $0x820] ss:$28 sps:$4 sm:$0xff]   ;;  %v9747_v26 = vld [vmem:[#allocation11 + $0xd94] ss:$28 sps:$4 sm:$0xff]  }
 0x3e7   :  { %7661 = vmatprep.subr.bf16.mxu1 %v9621_v28  ;;  %v9657_v28 = vld [vmem:[#allocation11 + $0x85c] ss:$28 sps:$4 sm:$0xff]  }
 0x3e9   :  { %7560 = vmatpush1.bf16.msra.mxu0 %v9673_v32  ;;  %v9745_v32 = vld [vmem:[#allocation11 + $0xd90] ss:$28 sps:$4 sm:$0xff]  }
 0x3ea   :  { %7662 = vmatpush1.bf16.msra.mxu1 %v9619_v35  ;;  %7561 = vmatprep.subr.bf16.mxu0 %v9681_v37  ;;  %v9655_v35 = vld [vmem:[#allocation11 + $0x858] ss:$28 sps:$4 sm:$0xff]   ;;  %v9753_v37 = vld [vmem:[#allocation11 + $0xdcc] ss:$28 sps:$4 sm:$0xff]  }
 0x3eb   :  { %7663 = vmatprep.subr.bf16.mxu1 %v9624_v0  ;;  %v9660_v0 = vld [vmem:[#allocation11 + $0x894] ss:$28 sps:$4 sm:$0xff]  }
 0x3ed   :  { %7562 = vmatpush1.bf16.msra.mxu0 %v9679_v48  ;;  %v9751_v48 = vld [vmem:[#allocation11 + $0xdc8] ss:$28 sps:$4 sm:$0xff]  }
 0x3ee   :  { %7664 = vmatpush1.bf16.msra.mxu1 %v9622_v36  ;;  %7563 = vmatprep.subr.bf16.mxu0 %v9687_v23  ;;  %v9658_v36 = vld [vmem:[#allocation11 + $0x890] ss:$28 sps:$4 sm:$0xff]  }
 0x3ef   :  { %7665 = vmatprep.subr.bf16.mxu1 %v9627_v50  ;;  %v9759_v23 = vld [vmem:[#allocation11 + $0x14] ss:$28 sps:$4 sm:$0xff]   ;;  %v9666_v50 = vld [vmem:[#allocation11 + $0x8cc] ss:$28 sps:$4 sm:$0xff]  }
 0x3f1   :  { %7564 = vmatpush1.bf16.msra.mxu0 %v9685_v43  ;;  %v9664_v43 = vld [vmem:[#allocation11 + $0x8c8] ss:$28 sps:$4 sm:$0xff]  }
 0x3f2   :  { %7666 = vmatpush1.bf16.msra.mxu1 %v9625_v40  ;;  %7565 = vmatprep.subr.bf16.mxu0 %v9693_v47  ;;  %v9672_v40 = vld [vmem:[#allocation11 + $0x904] ss:$28 sps:$4 sm:$0xff]  }
 0x3f3   :  { %7667 = vmatprep.subr.bf16.mxu1 %v9630_v41  ;;  %v9670_v47 = vld [vmem:[#allocation11 + $0x900] ss:$28 sps:$4 sm:$0xff]  }
 0x3f4   :  { %v9678_v41 = vld [vmem:[#allocation11 + $0x93c] ss:$28 sps:$4 sm:$0xff]  }
 0x3f5   :  { %7566 = vmatpush1.bf16.msra.mxu0 %v9691_v42  ;;  %v9676_v42 = vld [vmem:[#allocation11 + $0x938] ss:$28 sps:$4 sm:$0xff]  }
 0x3f6   :  { %7668 = vmatpush1.bf16.msra.mxu1 %v9628_v39  ;;  %7567 = vmatprep.subr.bf16.mxu0 %v9699_v27  ;;  %v9684_v39 = vld [vmem:[#allocation11 + $0x974] ss:$28 sps:$4 sm:$0xff]  }
 0x3f7   :  { %7669 = vmatprep.subr.bf16.mxu1 %v9633_v44  ;;  %v9682_v27 = vld [vmem:[#allocation11 + $0x970] ss:$28 sps:$4 sm:$0xff]  }
 0x3f8   :  { %v9690_v44 = vld [vmem:[#allocation11 + $0x9ac] ss:$28 sps:$4 sm:$0xff]  }
 0x3f9   :  { %7568 = vmatpush1.bf16.msra.mxu0 %v9697_v45  ;;  %v9688_v45 = vld [vmem:[#allocation11 + $0x9a8] ss:$28 sps:$4 sm:$0xff]  }
 0x3fa   :  { %7670 = vmatpush1.bf16.msra.mxu1 %v9631_v46  ;;  %7569 = vmatprep.subr.bf16.mxu0 %v9705_v31  ;;  %v9696_v46 = vld [vmem:[#allocation11 + $0x9e4] ss:$28 sps:$4 sm:$0xff]  }
 0x3fb   :  { %7671 = vmatprep.subr.bf16.mxu1 %v9636_v49  ;;  %v9694_v31 = vld [vmem:[#allocation11 + $0x9e0] ss:$28 sps:$4 sm:$0xff]  }
 0x3fc   :  { %v9702_v49 = vld [vmem:[#allocation11 + $0xa1c] ss:$28 sps:$4 sm:$0xff]  }
 0x3fd   :  { %7570 = vmatpush1.bf16.msra.mxu0 %v9703_v53  ;;  %v9700_v53 = vld [vmem:[#allocation11 + $0xa18] ss:$28 sps:$4 sm:$0xff]  }
 0x3fe   :  { %7672 = vmatpush1.bf16.msra.mxu1 %v9634_v54  ;;  %7571 = vmatprep.subr.bf16.mxu0 %v9711_v52  ;;  %v9708_v54 = vld [vmem:[#allocation11 + $0xa54] ss:$28 sps:$4 sm:$0xff]  }
 0x3ff   :  { %7684 = vmatprep.subr.bf16.mxu1 %v9639_v55  ;;  %v9706_v52 = vld [vmem:[#allocation11 + $0xa50] ss:$28 sps:$4 sm:$0xff]  }
 0x400   :  { %v9714_v55 = vld [vmem:[#allocation11 + $0xa8c] ss:$28 sps:$4 sm:$0xff]  }
 0x401   :  { %7674 = vmatmul.mubr.bf16.vlgmr.msra.gmra.mrb[20].mxu1 %v10533_v25  ;;  %7572 = vmatpush1.bf16.msra.mxu0 %v9709_v56  ;;  %v9712_v56 = vld [vmem:[#allocation11 + $0xa88] ss:$28 sps:$4 sm:$0xff]  }
 0x402   :  { %7685 = vmatpush1.bf16.msra.mxu1 %v9637_v57  ;;  %7716 = vmatprep.mubr.bf16.mxu1 %v10551_v11  ;;  %v9720_v57 = vld [vmem:[#allocation11 + $0xac4] ss:$28 sps:$4 sm:$0xff]  }
 0x403   :  { %7686 = vmatprep.subr.bf16.mxu1 %v9642_v59  ;;  %7573 = vmatprep.subr.bf16.mxu0 %v9717_v60  ;;  %v9718_v59 = vld [vmem:[#allocation11 + $0xac0] ss:$28 sps:$4 sm:$0xff]  }
 0x404   :  { %v9726_v60 = vld [vmem:[#allocation11 + $0xafc] ss:$28 sps:$4 sm:$0xff]  }
 0x405   :  { %7574 = vmatpush1.bf16.msra.mxu0 %v9715_v61  ;;  %v9724_v61 = vld [vmem:[#allocation11 + $0xaf8] ss:$28 sps:$4 sm:$0xff]  }
 0x406   :  { %7687 = vmatpush1.bf16.msra.mxu1 %v9640_v63  ;;  %7575 = vmatprep.subr.bf16.mxu0 %v9723_v1  ;;  %v9732_v63 = vld [vmem:[#allocation11 + $0xb34] ss:$28 sps:$4 sm:$0xff]  }
 0x407   :  { %7688 = vmatprep.subr.bf16.mxu1 %v9645_v2  ;;  %v9730_v1 = vld [vmem:[#allocation11 + $0xb30] ss:$28 sps:$4 sm:$0xff]  }
 0x408   :  { %v9738_v2 = vld [vmem:[#allocation11 + $0xb6c] ss:$28 sps:$4 sm:$0xff]  }
 0x409   :  { %7576 = vmatpush1.bf16.msra.mxu0 %v9721_v3  ;;  %v9736_v3 = vld [vmem:[#allocation11 + $0xb68] ss:$28 sps:$4 sm:$0xff]  }
 0x40a   :  { %7689 = vmatpush1.bf16.msra.mxu1 %v9643_v4  ;;  %7577 = vmatprep.subr.bf16.mxu0 %v9729_v5  ;;  %v9744_v4 = vld [vmem:[#allocation11 + $0xba4] ss:$28 sps:$4 sm:$0xff]   ;;  %v1288_v5 = vrot.slane %v10543_v33, %v10459_v10 }
 0x40b   :  { %7690 = vmatprep.subr.bf16.mxu1 %v9648_v6  ;;  %v1292_v6 = vrot.slane %v10543_v33, %v215_v38  ;;  %v9754_v38 = vld [vmem:[#allocation11 + $0xc10] ss:$28 sps:$4 sm:$0xff]  }
 0x40d   :  { %7578 = vmatpush1.bf16.msra.mxu0 %v9727_v7  ;;  %v9742_v7 = vld [vmem:[#allocation11 + $0xba0] ss:$28 sps:$4 sm:$0xff]  }
 0x40e   :  { %7691 = vmatpush1.bf16.msra.mxu1 %v9646_v51  ;;  %7579 = vmatprep.subr.bf16.mxu0 %v9735_v15  ;;  %v9750_v51 = vld [vmem:[#allocation11 + $0xbdc] ss:$28 sps:$4 sm:$0xff]  }
 0x40f   :  { %7692 = vmatprep.subr.bf16.mxu1 %v9651_v8 }
 0x411   :  { %7580 = vmatpush1.bf16.msra.mxu0 %v9733_v12 }
 0x412   :  { %7693 = vmatpush1.bf16.msra.mxu1 %v9649_v19  ;;  %7581 = vmatprep.subr.bf16.mxu0 %v9741_v20 }
 0x413   :  { %7694 = vmatprep.subr.bf16.mxu1 %v9654_v21  ;;  %v9748_v21 = vld [vmem:[#allocation11 + $0xbd8] ss:$28 sps:$4 sm:$0xff]  }
 0x415   :  { %7582 = vmatpush1.bf16.msra.mxu0 %v9739_v22 }
 0x416   :  { %7695 = vmatpush1.bf16.msra.mxu1 %v9652_v24  ;;  %7583 = vmatprep.subr.bf16.mxu0 %v9747_v26  ;;  %v9756_v26 = vld [vmem:[#allocation11 + $0xc14] ss:$28 sps:$4 sm:$0xff]  }
 0x417   :  { %7696 = vmatprep.subr.bf16.mxu1 %v9657_v28 }
 0x419   :  { %7584 = vmatpush1.bf16.msra.mxu0 %v9745_v32 }
 0x41a   :  { %7697 = vmatpush1.bf16.msra.mxu1 %v9655_v35  ;;  %7585 = vmatprep.subr.bf16.mxu0 %v9753_v37 }
 0x41b   :  { %7698 = vmatprep.subr.bf16.mxu1 %v9660_v0 }
 0x41d   :  { %7586 = vmatpush1.bf16.msra.mxu0 %v9751_v48  ;;  %v9757_v48 = vld [vmem:[#allocation11 + $0x10] ss:$28 sps:$4 sm:$0xff]  }
 0x41e   :  { %7699 = vmatpush1.bf16.msra.mxu1 %v9658_v36  ;;  %7770 = vmatprep.subr.bf16.mxu0 %v9759_v23  ;;  %v9762_v36 = vld [vmem:[#allocation11 + $0xc4c] ss:$28 sps:$4 sm:$0xff]  }
 0x41f   :  { %7700 = vmatprep.subr.bf16.mxu1 %v9666_v50  ;;  %v9765_v23 = vld [vmem:[#allocation11 + $0x4c] ss:$28 sps:$4 sm:$0xff]  }
 0x420   :  { %v9760_v50 = vld [vmem:[#allocation11 + $0xc48] ss:$28 sps:$4 sm:$0xff]  }
 0x422   :  { %7701 = vmatpush1.bf16.msra.mxu1 %v9664_v43  ;;  %v9768_v43 = vld [vmem:[#allocation11 + $0xc84] ss:$28 sps:$4 sm:$0xff]  }
 0x423   :  { %7702 = vmatprep.subr.bf16.mxu1 %v9672_v40  ;;  %v9763_v40 = vld [vmem:[#allocation11 + $0x48] ss:$28 sps:$4 sm:$0xff]  }
 0x426   :  { %7703 = vmatpush1.bf16.msra.mxu1 %v9670_v47  ;;  %v9771_v47 = vld [vmem:[#allocation11 + $0x84] ss:$28 sps:$4 sm:$0xff]  }
 0x427   :  { %7704 = vmatprep.subr.bf16.mxu1 %v9678_v41  ;;  %v9766_v41 = vld [vmem:[#allocation11 + $0xc80] ss:$28 sps:$4 sm:$0xff]  }
 0x42a   :  { %7705 = vmatpush1.bf16.msra.mxu1 %v9676_v42  ;;  %v9774_v42 = vld [vmem:[#allocation11 + $0xcbc] ss:$28 sps:$4 sm:$0xff]  }
 0x42b   :  { %7706 = vmatprep.subr.bf16.mxu1 %v9684_v39  ;;  %v9769_v39 = vld [vmem:[#allocation11 + $0x80] ss:$28 sps:$4 sm:$0xff]  }
 0x42e   :  { %7707 = vmatpush1.bf16.msra.mxu1 %v9682_v27  ;;  %v9777_v27 = vld [vmem:[#allocation11 + $0xbc] ss:$28 sps:$4 sm:$0xff]  }
 0x42f   :  { %7708 = vmatprep.subr.bf16.mxu1 %v9690_v44  ;;  %v9772_v44 = vld [vmem:[#allocation11 + $0xcb8] ss:$28 sps:$4 sm:$0xff]  }
 0x432   :  { %7709 = vmatpush1.bf16.msra.mxu1 %v9688_v45  ;;  %v9780_v45 = vld [vmem:[#allocation11 + $0xcf4] ss:$28 sps:$4 sm:$0xff]  }
 0x433   :  { %7710 = vmatprep.subr.bf16.mxu1 %v9696_v46  ;;  %v9775_v46 = vld [vmem:[#allocation11 + $0xb8] ss:$28 sps:$4 sm:$0xff]  }
 0x436   :  { %7711 = vmatpush1.bf16.msra.mxu1 %v9694_v31  ;;  %v9783_v31 = vld [vmem:[#allocation11 + $0xf4] ss:$28 sps:$4 sm:$0xff]  }
 0x437   :  { %7712 = vmatprep.subr.bf16.mxu1 %v9702_v49  ;;  %v9778_v49 = vld [vmem:[#allocation11 + $0xcf0] ss:$28 sps:$4 sm:$0xff]  }
 0x43a   :  { %7713 = vmatpush1.bf16.msra.mxu1 %v9700_v53  ;;  %v9786_v53 = vld [vmem:[#allocation11 + $0xd2c] ss:$28 sps:$4 sm:$0xff]  }
 0x43b   :  { %7714 = vmatprep.subr.bf16.mxu1 %v9708_v54  ;;  %v9781_v54 = vld [vmem:[#allocation11 + $0xf0] ss:$28 sps:$4 sm:$0xff]  }
 0x43e   :  { %7715 = vmatpush1.bf16.msra.mxu1 %v9706_v52  ;;  %v9789_v52 = vld [vmem:[#allocation11 + $0x12c] ss:$28 sps:$4 sm:$0xff]  }
 0x43f   :  { %7727 = vmatprep.subr.bf16.mxu1 %v9714_v55  ;;  %v9784_v55 = vld [vmem:[#allocation11 + $0xd28] ss:$28 sps:$4 sm:$0xff]  }
 0x441   :  { %7717 = vmatmul.mubr.bf16.vlgmr.msra.gmra.mrb[20].mxu1 %v10549_v9 }
 0x442   :  { %7728 = vmatpush1.bf16.msra.mxu1 %v9712_v56  ;;  %v9792_v56 = vld [vmem:[#allocation11 + $0xd64] ss:$28 sps:$4 sm:$0xff]  }
 0x443   :  { %7729 = vmatprep.subr.bf16.mxu1 %v9720_v57  ;;  %v9787_v57 = vld [vmem:[#allocation11 + $0x128] ss:$28 sps:$4 sm:$0xff]  }
 0x446   :  { %7730 = vmatpush1.bf16.msra.mxu1 %v9718_v59  ;;  %v9795_v59 = vld [vmem:[#allocation11 + $0x164] ss:$28 sps:$4 sm:$0xff]  }
 0x447   :  { %7731 = vmatprep.subr.bf16.mxu1 %v9726_v60  ;;  %v9790_v60 = vld [vmem:[#allocation11 + $0xd60] ss:$28 sps:$4 sm:$0xff]  }
 0x44a   :  { %7732 = vmatpush1.bf16.msra.mxu1 %v9724_v61  ;;  %v9798_v61 = vld [vmem:[#allocation11 + $0xd9c] ss:$28 sps:$4 sm:$0xff]  }
 0x44b   :  { %7733 = vmatprep.subr.bf16.mxu1 %v9732_v63  ;;  %v9793_v63 = vld [vmem:[#allocation11 + $0x160] ss:$28 sps:$4 sm:$0xff]  }
 0x44e   :  { %7734 = vmatpush1.bf16.msra.mxu1 %v9730_v1  ;;  %v9801_v1 = vld [vmem:[#allocation11 + $0x19c] ss:$28 sps:$4 sm:$0xff]  }
 0x44f   :  { %7735 = vmatprep.subr.bf16.mxu1 %v9738_v2  ;;  %v9796_v2 = vld [vmem:[#allocation11 + $0xd98] ss:$28 sps:$4 sm:$0xff]  }
 0x452   :  { %7736 = vmatpush1.bf16.msra.mxu1 %v9736_v3  ;;  %v9804_v3 = vld [vmem:[#allocation11 + $0xdd4] ss:$28 sps:$4 sm:$0xff]  }
 0x453   :  { %7737 = vmatprep.subr.bf16.mxu1 %v9744_v4  ;;  %v9799_v4 = vld [vmem:[#allocation11 + $0x198] ss:$28 sps:$4 sm:$0xff]  }
 0x454   :  { %v4540_v15 = vpop.f32.mrb[16].mxu1 }
 0x455   :  { %v9283_v8 = vadd.f32 %v4540_v15, %v1288_v5  ;;  %v4542_v12 = vpop.f32.mrb[17].mxu1  ;;  %v9811_v15 = vld [vmem:[#allocation11 + $0x20c] ss:$28 sps:$4 sm:$0xff]  }
 0x456   :  { %v9284_v19 = vadd.f32 %v4542_v12, %v1292_v6  ;;  %v4544_v20 = vpop.f32.mrb[18].mxu1  ;;  %7738 = vmatpush1.bf16.msra.mxu1 %v9742_v7  ;;  %v9808_v7 = vld [vmem:[#allocation11 + $0x1d8] ss:$28 sps:$4 sm:$0xff]   ;;  %v9813_v12 = vld [vmem:[#allocation11 + $0x210] ss:$28 sps:$4 sm:$0xff]  }
 0x457   :  { %v9285_v22 = vadd.f32 %v4544_v20, %v1288_v5  ;;  %v4546_v24 = vpop.f32.mrb[19].mxu1  ;;  %7739 = vmatprep.subr.bf16.mxu1 %v9750_v51  ;;  %v4555_v32 = vmax.f32 %v9283_v8, 0.0  ;;  %v9807_v5 = vld [vmem:[#allocation11 + $0x1d4] ss:$28 sps:$4 sm:$0xff]   ;;  %v9816_v20 = vld [vmem:[#allocation11 + $0x244] ss:$28 sps:$4 sm:$0xff]  }
 0x458   :  { %v9286_v28 = vadd.f32 %v4546_v24, %v1292_v6  ;;  %v4556_v13 = vmax.f32 %v9284_v19, 0.0  ;;  %v9802_v6 = vld [vmem:[#allocation11 + $0xdd0] ss:$28 sps:$4 sm:$0xff]   ;;  %v9812_v8 = vld [vmem:[#allocation11 + $0x18] ss:$28 sps:$4 sm:$0xff]  }
 0x459   :  { %v4563_v35 = vmax.f32 %v9285_v22, 0.0  ;;  %v9805_v51 = vld [vmem:[#allocation11 + $0x1d0] ss:$28 sps:$4 sm:$0xff]   ;;  %v9809_v19 = vld [vmem:[#allocation11 + $0x208] ss:$28 sps:$4 sm:$0xff]  }
 0x45a   :  { %v4564_v37 = vmax.f32 %v9286_v28, 0.0  ;;  %7740 = vmatpush1.bf16.msra.mxu1 %v9748_v21  ;;  %v9817_v21 = vld [vmem:[#allocation11 + $0x50] ss:$28 sps:$4 sm:$0xff]   ;;  %v9818_v22 = vld [vmem:[#allocation11 + $0x248] ss:$28 sps:$4 sm:$0xff]  }
 0x45b   :  { %v10563_v33 = vpack.c.bf16 %v4563_v35, %v4555_v32  ;;  %7741 = vmatprep.subr.bf16.mxu1 %v9756_v26  ;;  %v9814_v24 = vld [vmem:[#allocation11 + $0x240] ss:$28 sps:$4 sm:$0xff]   ;;  %v9822_v28 = vld [vmem:[#allocation11 + $0x88] ss:$28 sps:$4 sm:$0xff]   ;;  %v9819_v35 = vld [vmem:[#allocation11 + $0x278] ss:$28 sps:$4 sm:$0xff]  }
 0x45c   :  { %v10565_v0 = vpack.c.bf16 %v4564_v37, %v4556_v13  ;;  %v9821_v26 = vld [vmem:[#allocation11 + $0x27c] ss:$28 sps:$4 sm:$0xff]   ;;  %v9826_v13 = vld [vmem:[#allocation11 + $0x2b4] ss:$28 sps:$4 sm:$0xff]  }
 0x45d   :  { %v9823_v32 = vld [vmem:[#allocation11 + $0x280] ss:$28 sps:$4 sm:$0xff]  }
 0x45e   :  { %7587 = vmatprep.mubr.bf16.mxu0 %v10565_v0  ;;  %7742 = vmatpush1.bf16.msra.mxu1 %v9754_v38  ;;  %v9827_v37 = vld [vmem:[#allocation11 + $0xc0] ss:$28 sps:$4 sm:$0xff]   ;;  %v9828_v38 = vld [vmem:[#allocation11 + $0x2b8] ss:$28 sps:$4 sm:$0xff]  }
 0x45f   :  { %7759 = vmatprep.mubr.bf16.mxu1 %v10565_v0  ;;  %7588 = vmatmul.mubr.bf16.vlgmr.msra.gmra.mrb[16].mxu0 %v10563_v33 }
 0x460   :  { %7771 = vmatpush1.bf16.msra.mxu0 %v9757_v48  ;;  %7802 = vmatprep.mubr.bf16.mxu0 %v10520_v62  ;;  %v9831_v48 = vld [vmem:[#allocation11 + $0x2ec] ss:$28 sps:$4 sm:$0xff]  }
 0x461   :  { %7743 = vmatprep.subr.bf16.mxu1 %v9762_v36  ;;  %7772 = vmatprep.subr.bf16.mxu0 %v9765_v23  ;;  %v9832_v36 = vld [vmem:[#allocation11 + $0xf8] ss:$28 sps:$4 sm:$0xff]   ;;  %v9833_v23 = vld [vmem:[#allocation11 + $0x2f0] ss:$28 sps:$4 sm:$0xff]  }
 0x462   :  { %7744 = vmatpush1.bf16.msra.mxu1 %v9760_v50  ;;  %v9829_v50 = vld [vmem:[#allocation11 + $0x2e8] ss:$28 sps:$4 sm:$0xff]  }
 0x463   :  { %7745 = vmatprep.subr.bf16.mxu1 %v9768_v43  ;;  %v9836_v43 = vld [vmem:[#allocation11 + $0x324] ss:$28 sps:$4 sm:$0xff]  }
 0x464   :  { %7773 = vmatpush1.bf16.msra.mxu0 %v9763_v40  ;;  %v9837_v40 = vld [vmem:[#allocation11 + $0x130] ss:$28 sps:$4 sm:$0xff]  }
 0x465   :  { %7774 = vmatprep.subr.bf16.mxu0 %v9771_v47  ;;  %v9838_v47 = vld [vmem:[#allocation11 + $0x328] ss:$28 sps:$4 sm:$0xff]  }
 0x466   :  { %7746 = vmatpush1.bf16.msra.mxu1 %v9766_v41  ;;  %v9834_v41 = vld [vmem:[#allocation11 + $0x320] ss:$28 sps:$4 sm:$0xff]  }
 0x467   :  { %7747 = vmatprep.subr.bf16.mxu1 %v9774_v42  ;;  %v9841_v42 = vld [vmem:[#allocation11 + $0x35c] ss:$28 sps:$4 sm:$0xff]  }
 0x468   :  { %7775 = vmatpush1.bf16.msra.mxu0 %v9769_v39  ;;  %v9842_v39 = vld [vmem:[#allocation11 + $0x168] ss:$28 sps:$4 sm:$0xff]  }
 0x469   :  { %7776 = vmatprep.subr.bf16.mxu0 %v9777_v27  ;;  %v9843_v27 = vld [vmem:[#allocation11 + $0x360] ss:$28 sps:$4 sm:$0xff]  }
 0x46a   :  { %7748 = vmatpush1.bf16.msra.mxu1 %v9772_v44  ;;  %v9839_v44 = vld [vmem:[#allocation11 + $0x358] ss:$28 sps:$4 sm:$0xff]  }
 0x46b   :  { %7749 = vmatprep.subr.bf16.mxu1 %v9780_v45  ;;  %v9846_v45 = vld [vmem:[#allocation11 + $0x394] ss:$28 sps:$4 sm:$0xff]  }
 0x46c   :  { %7777 = vmatpush1.bf16.msra.mxu0 %v9775_v46  ;;  %v9847_v46 = vld [vmem:[#allocation11 + $0x1a0] ss:$28 sps:$4 sm:$0xff]  }
 0x46d   :  { %7778 = vmatprep.subr.bf16.mxu0 %v9783_v31  ;;  %v9848_v31 = vld [vmem:[#allocation11 + $0x558] ss:$28 sps:$4 sm:$0xff]  }
 0x46e   :  { %7750 = vmatpush1.bf16.msra.mxu1 %v9778_v49  ;;  %v9844_v49 = vld [vmem:[#allocation11 + $0x390] ss:$28 sps:$4 sm:$0xff]  }
 0x46f   :  { %7751 = vmatprep.subr.bf16.mxu1 %v9786_v53  ;;  %v9851_v53 = vld [vmem:[#allocation11 + $0x3cc] ss:$28 sps:$4 sm:$0xff]  }
 0x470   :  { %7779 = vmatpush1.bf16.msra.mxu0 %v9781_v54  ;;  %v9852_v54 = vld [vmem:[#allocation11 + $0x398] ss:$28 sps:$4 sm:$0xff]  }
 0x471   :  { %7780 = vmatprep.subr.bf16.mxu0 %v9789_v52  ;;  %v9853_v52 = vld [vmem:[#allocation11 + $0x590] ss:$28 sps:$4 sm:$0xff]  }
 0x472   :  { %7752 = vmatpush1.bf16.msra.mxu1 %v9784_v55  ;;  %v9849_v55 = vld [vmem:[#allocation11 + $0x3c8] ss:$28 sps:$4 sm:$0xff]  }
 0x473   :  { %7753 = vmatprep.subr.bf16.mxu1 %v9792_v56  ;;  %v9856_v56 = vld [vmem:[#allocation11 + $0x404] ss:$28 sps:$4 sm:$0xff]  }
 0x474   :  { %7781 = vmatpush1.bf16.msra.mxu0 %v9787_v57  ;;  %v9857_v57 = vld [vmem:[#allocation11 + $0x3d0] ss:$28 sps:$4 sm:$0xff]  }
 0x475   :  { %7782 = vmatprep.subr.bf16.mxu0 %v9795_v59  ;;  %v9858_v59 = vld [vmem:[#allocation11 + $0x5c8] ss:$28 sps:$4 sm:$0xff]  }
 0x476   :  { %7754 = vmatpush1.bf16.msra.mxu1 %v9790_v60  ;;  %v9854_v60 = vld [vmem:[#allocation11 + $0x400] ss:$28 sps:$4 sm:$0xff]  }
 0x477   :  { %7755 = vmatprep.subr.bf16.mxu1 %v9798_v61  ;;  %v9861_v61 = vld [vmem:[#allocation11 + $0x43c] ss:$28 sps:$4 sm:$0xff]  }
 0x478   :  { %7783 = vmatpush1.bf16.msra.mxu0 %v9793_v63  ;;  %v9862_v63 = vld [vmem:[#allocation11 + $0x408] ss:$28 sps:$4 sm:$0xff]  }
 0x479   :  { %7784 = vmatprep.subr.bf16.mxu0 %v9801_v1  ;;  %v9863_v1 = vld [vmem:[#allocation11 + $0x600] ss:$28 sps:$4 sm:$0xff]  }
 0x47a   :  { %7756 = vmatpush1.bf16.msra.mxu1 %v9796_v2  ;;  %v9859_v2 = vld [vmem:[#allocation11 + $0x438] ss:$28 sps:$4 sm:$0xff]  }
 0x47b   :  { %7757 = vmatprep.subr.bf16.mxu1 %v9804_v3  ;;  %v9867_v3 = vld [vmem:[#allocation11 + $0x440] ss:$28 sps:$4 sm:$0xff]  }
 0x47c   :  { %7785 = vmatpush1.bf16.msra.mxu0 %v9799_v4  ;;  %v9868_v4 = vld [vmem:[#allocation11 + $0x638] ss:$28 sps:$4 sm:$0xff]  }
 0x47d   :  { %7786 = vmatprep.subr.bf16.mxu0 %v9807_v5  ;;  %v9871_v5 = vld [vmem:[#allocation11 + $0x4ac] ss:$28 sps:$4 sm:$0xff]  }
 0x47e   :  { %7758 = vmatpush1.bf16.msra.mxu1 %v9802_v6  ;;  %v9872_v6 = vld [vmem:[#allocation11 + $0x478] ss:$28 sps:$4 sm:$0xff]  }
 0x47f   :  { %9179 = vmatprep.subr.bf16.mxu1 %v9808_v7  ;;  %v9873_v7 = vld [vmem:[#allocation11 + $0x670] ss:$28 sps:$4 sm:$0xff]  }
 0x480   :  { %7787 = vmatpush1.bf16.msra.mxu0 %v9805_v51  ;;  %v9869_v51 = vld [vmem:[#allocation11 + $0x4a8] ss:$28 sps:$4 sm:$0xff]  }
 0x481   :  { %7760 = vmatmul.mubr.bf16.vlgmr.msra.gmra.mrb[20].mxu1 %v10563_v33  ;;  %7788 = vmatprep.subr.bf16.mxu0 %v9811_v15  ;;  %v9876_v15 = vld [vmem:[#allocation11 + $0x4e4] ss:$28 sps:$4 sm:$0xff]  }
 0x482   :  { %9180 = vmatpush3.bf16.msra.mxu1 %v9812_v8  ;;  %7974 = vmatprep.mubr.bf16.mxu1 %v10520_v62  ;;  %v9824_v62 = vld [vmem:[#allocation11 + $0x2b0] ss:$28 sps:$4 sm:$0xff]  }
 0x483   :  { %9181 = vmatprep.subr.bf16.mxu1 %v9813_v12  ;;  %v9877_v8 = vld [vmem:[#allocation11 + $0x4b0] ss:$28 sps:$4 sm:$0xff]   ;;  %v9878_v12 = vld [vmem:[#allocation11 + $0x6a8] ss:$28 sps:$4 sm:$0xff]  }
 0x484   :  { %7789 = vmatpush1.bf16.msra.mxu0 %v9809_v19  ;;  %v9874_v19 = vld [vmem:[#allocation11 + $0x4e0] ss:$28 sps:$4 sm:$0xff]  }
 0x485   :  { %7790 = vmatprep.subr.bf16.mxu0 %v9816_v20  ;;  %v9881_v20 = vld [vmem:[#allocation11 + $0x51c] ss:$28 sps:$4 sm:$0xff]  }
 0x486   :  { %9182 = vmatpush3.bf16.msra.mxu1 %v9817_v21  ;;  %v9882_v21 = vld [vmem:[#allocation11 + $0x4e8] ss:$28 sps:$4 sm:$0xff]  }
 0x487   :  { %9183 = vmatprep.subr.bf16.mxu1 %v9818_v22  ;;  %v9883_v22 = vld [vmem:[#allocation11 + $0x6e0] ss:$28 sps:$4 sm:$0xff]  }
 0x488   :  { %7791 = vmatpush1.bf16.msra.mxu0 %v9814_v24  ;;  %v9879_v24 = vld [vmem:[#allocation11 + $0x518] ss:$28 sps:$4 sm:$0xff]  }
 0x489   :  { %7792 = vmatprep.subr.bf16.mxu0 %v9821_v26  ;;  %v9886_v26 = vld [vmem:[#allocation11 + $0x554] ss:$28 sps:$4 sm:$0xff]  }
 0x48a   :  { %9184 = vmatpush3.bf16.msra.mxu1 %v9822_v28  ;;  %v9887_v28 = vld [vmem:[#allocation11 + $0x520] ss:$28 sps:$4 sm:$0xff]  }
 0x48b   :  { %9185 = vmatprep.subr.bf16.mxu1 %v9823_v32  ;;  %v9888_v32 = vld [vmem:[#allocation11 + $0x8d8] ss:$28 sps:$4 sm:$0xff]  }
 0x48c   :  { %7793 = vmatpush1.bf16.msra.mxu0 %v9819_v35  ;;  %v9884_v35 = vld [vmem:[#allocation11 + $0x550] ss:$28 sps:$4 sm:$0xff]  }
 0x48d   :  { %7794 = vmatprep.subr.bf16.mxu0 %v9826_v13  ;;  %v9891_v13 = vld [vmem:[#allocation11 + $0x58c] ss:$28 sps:$4 sm:$0xff]  }
 0x48e   :  { %9186 = vmatpush3.bf16.msra.mxu1 %v9827_v37  ;;  %v9892_v37 = vld [vmem:[#allocation11 + $0x718] ss:$28 sps:$4 sm:$0xff]  }
 0x48f   :  { %9187 = vmatprep.subr.bf16.mxu1 %v9828_v38  ;;  %v9893_v38 = vld [vmem:[#allocation11 + $0x910] ss:$28 sps:$4 sm:$0xff]  }
 0x490   :  { %7795 = vmatpush1.bf16.msra.mxu0 %v9824_v62  ;;  %v9889_v62 = vld [vmem:[#allocation11 + $0x588] ss:$28 sps:$4 sm:$0xff]  }
 0x491   :  { %7796 = vmatprep.subr.bf16.mxu0 %v9831_v48  ;;  %v9896_v48 = vld [vmem:[#allocation11 + $0x5c4] ss:$28 sps:$4 sm:$0xff]  }
 0x492   :  { %9188 = vmatpush3.bf16.msra.mxu1 %v9832_v36  ;;  %v9897_v36 = vld [vmem:[#allocation11 + $0x750] ss:$28 sps:$4 sm:$0xff]  }
 0x493   :  { %9189 = vmatprep.subr.bf16.mxu1 %v9833_v23  ;;  %v9898_v23 = vld [vmem:[#allocation11 + $0x948] ss:$28 sps:$4 sm:$0xff]  }
 0x494   :  { %7797 = vmatpush1.bf16.msra.mxu0 %v9829_v50  ;;  %v9894_v50 = vld [vmem:[#allocation11 + $0x5c0] ss:$28 sps:$4 sm:$0xff]  }
 0x495   :  { %7798 = vmatprep.subr.bf16.mxu0 %v9836_v43  ;;  %v9901_v43 = vld [vmem:[#allocation11 + $0x5fc] ss:$28 sps:$4 sm:$0xff]  }
 0x496   :  { %9190 = vmatpush3.bf16.msra.mxu1 %v9837_v40  ;;  %v9902_v40 = vld [vmem:[#allocation11 + $0x788] ss:$28 sps:$4 sm:$0xff]  }
 0x497   :  { %9191 = vmatprep.subr.bf16.mxu1 %v9838_v47  ;;  %v9903_v47 = vld [vmem:[#allocation11 + $0x980] ss:$28 sps:$4 sm:$0xff]  }
 0x498   :  { %7799 = vmatpush1.bf16.msra.mxu0 %v9834_v41  ;;  %v9899_v41 = vld [vmem:[#allocation11 + $0x5f8] ss:$28 sps:$4 sm:$0xff]  }
 0x499   :  { %7800 = vmatprep.subr.bf16.mxu0 %v9841_v42  ;;  %v9906_v42 = vld [vmem:[#allocation11 + $0x634] ss:$28 sps:$4 sm:$0xff]  }
 0x49a   :  { %9192 = vmatpush3.bf16.msra.mxu1 %v9842_v39  ;;  %v9907_v39 = vld [vmem:[#allocation11 + $0x7c0] ss:$28 sps:$4 sm:$0xff]  }
 0x49b   :  { %9193 = vmatprep.subr.bf16.mxu1 %v9843_v27  ;;  %v9908_v27 = vld [vmem:[#allocation11 + $0x9b8] ss:$28 sps:$4 sm:$0xff]  }
 0x49c   :  { %7801 = vmatpush1.bf16.msra.mxu0 %v9839_v44  ;;  %v9904_v44 = vld [vmem:[#allocation11 + $0x630] ss:$28 sps:$4 sm:$0xff]  }
 0x49d   :  { %7813 = vmatprep.subr.bf16.mxu0 %v9846_v45  ;;  %v9911_v45 = vld [vmem:[#allocation11 + $0x66c] ss:$28 sps:$4 sm:$0xff]  }
 0x49e   :  { %9194 = vmatpush3.bf16.msra.mxu1 %v9847_v46  ;;  %v9912_v46 = vld [vmem:[#allocation11 + $0x7f8] ss:$28 sps:$4 sm:$0xff]  }
 0x49f   :  { %7803 = vmatmul.mubr.bf16.vlgmr.msra.gmra.mrb[20].mxu0 %v10518_v58  ;;  %9201 = vmatprep.subr.bf16.mxu1 %v9848_v31  ;;  %v9913_v31 = vld [vmem:[#allocation11 + $0x9f0] ss:$28 sps:$4 sm:$0xff]  }
 0x4a0   :  { %7814 = vmatpush1.bf16.msra.mxu0 %v9844_v49  ;;  %7845 = vmatprep.mubr.bf16.mxu0 %v10535_v29  ;;  %v9909_v49 = vld [vmem:[#allocation11 + $0x668] ss:$28 sps:$4 sm:$0xff]  }
 0x4a1   :  { %7975 = vmatmul.mubr.bf16.vlgmr.msra.gmra.mrb[24].mxu1 %v10518_v58  ;;  %7815 = vmatprep.subr.bf16.mxu0 %v9851_v53  ;;  %v9866_v58 = vld [vmem:[#allocation11 + $0x474] ss:$28 sps:$4 sm:$0xff]   ;;  %v9916_v53 = vld [vmem:[#allocation11 + $0x6a4] ss:$28 sps:$4 sm:$0xff]  }
 0x4a2   :  { %9202 = vmatpush3.bf16.msra.mxu1 %v9852_v54  ;;  %8015 = vmatprep.mubr.bf16.mxu1 %v10535_v29  ;;  %v9864_v29 = vld [vmem:[#allocation11 + $0x470] ss:$28 sps:$4 sm:$0xff]  }
 0x4a3   :  { %9203 = vmatprep.subr.bf16.mxu1 %v9853_v52  ;;  %v9917_v54 = vld [vmem:[#allocation11 + $0x830] ss:$28 sps:$4 sm:$0xff]   ;;  %v9918_v52 = vld [vmem:[#allocation11 + $0xa28] ss:$28 sps:$4 sm:$0xff]  }
 0x4a4   :  { %7816 = vmatpush1.bf16.msra.mxu0 %v9849_v55  ;;  %v9914_v55 = vld [vmem:[#allocation11 + $0x6a0] ss:$28 sps:$4 sm:$0xff]  }
 0x4a5   :  { %7817 = vmatprep.subr.bf16.mxu0 %v9856_v56  ;;  %v9921_v56 = vld [vmem:[#allocation11 + $0x6dc] ss:$28 sps:$4 sm:$0xff]  }
 0x4a6   :  { %9204 = vmatpush3.bf16.msra.mxu1 %v9857_v57  ;;  %v9922_v57 = vld [vmem:[#allocation11 + $0x868] ss:$28 sps:$4 sm:$0xff]  }
 0x4a7   :  { %9205 = vmatprep.subr.bf16.mxu1 %v9858_v59  ;;  %v9923_v59 = vld [vmem:[#allocation11 + $0xa60] ss:$28 sps:$4 sm:$0xff]  }
 0x4a8   :  { %7818 = vmatpush1.bf16.msra.mxu0 %v9854_v60  ;;  %v9919_v60 = vld [vmem:[#allocation11 + $0x6d8] ss:$28 sps:$4 sm:$0xff]  }
 0x4a9   :  { %7819 = vmatprep.subr.bf16.mxu0 %v9861_v61  ;;  %v9926_v61 = vld [vmem:[#allocation11 + $0x714] ss:$28 sps:$4 sm:$0xff]  }
 0x4aa   :  { %9206 = vmatpush3.bf16.msra.mxu1 %v9862_v63  ;;  %v9927_v63 = vld [vmem:[#allocation11 + $0x8a0] ss:$28 sps:$4 sm:$0xff]  }
 0x4ab   :  { %9207 = vmatprep.subr.bf16.mxu1 %v9863_v1  ;;  %v9928_v1 = vld [vmem:[#allocation11 + $0xc58] ss:$28 sps:$4 sm:$0xff]  }
 0x4ac   :  { %7820 = vmatpush1.bf16.msra.mxu0 %v9859_v2  ;;  %v9924_v2 = vld [vmem:[#allocation11 + $0x710] ss:$28 sps:$4 sm:$0xff]  }
 0x4ad   :  { %7821 = vmatprep.subr.bf16.mxu0 %v9866_v58  ;;  %v9931_v58 = vld [vmem:[#allocation11 + $0x74c] ss:$28 sps:$4 sm:$0xff]  }
 0x4ae   :  { %9208 = vmatpush3.bf16.msra.mxu1 %v9867_v3  ;;  %v9932_v3 = vld [vmem:[#allocation11 + $0xa98] ss:$28 sps:$4 sm:$0xff]  }
 0x4af   :  { %9209 = vmatprep.subr.bf16.mxu1 %v9868_v4  ;;  %v9933_v4 = vld [vmem:[#allocation11 + $0xc90] ss:$28 sps:$4 sm:$0xff]  }
 0x4b0   :  { %7822 = vmatpush1.bf16.msra.mxu0 %v9864_v29  ;;  %v9929_v29 = vld [vmem:[#allocation11 + $0x748] ss:$28 sps:$4 sm:$0xff]  }
 0x4b1   :  { %7823 = vmatprep.subr.bf16.mxu0 %v9871_v5  ;;  %v9936_v5 = vld [vmem:[#allocation11 + $0x784] ss:$28 sps:$4 sm:$0xff]  }
 0x4b2   :  { %9210 = vmatpush3.bf16.msra.mxu1 %v9872_v6  ;;  %v9937_v6 = vld [vmem:[#allocation11 + $0xad0] ss:$28 sps:$4 sm:$0xff]  }
 0x4b3   :  { %9211 = vmatprep.subr.bf16.mxu1 %v9873_v7  ;;  %v9938_v7 = vld [vmem:[#allocation11 + $0xcc8] ss:$28 sps:$4 sm:$0xff]  }
 0x4b4   :  { %7824 = vmatpush1.bf16.msra.mxu0 %v9869_v51  ;;  %v9934_v51 = vld [vmem:[#allocation11 + $0x780] ss:$28 sps:$4 sm:$0xff]  }
 0x4b5   :  { %7825 = vmatprep.subr.bf16.mxu0 %v9876_v15  ;;  %v9942_v15 = vld [vmem:[#allocation11 + $0xb08] ss:$28 sps:$4 sm:$0xff]  }
 0x4b6   :  { %9212 = vmatpush3.bf16.msra.mxu1 %v9877_v8  ;;  %v9943_v8 = vld [vmem:[#allocation11 + $0xd00] ss:$28 sps:$4 sm:$0xff]  }
 0x4b7   :  { %9213 = vmatprep.subr.bf16.mxu1 %v9878_v12  ;;  %v9946_v12 = vld [vmem:[#allocation11 + $0x7f4] ss:$28 sps:$4 sm:$0xff]  }
 0x4b8   :  { %7826 = vmatpush1.bf16.msra.mxu0 %v9874_v19  ;;  %v9947_v19 = vld [vmem:[#allocation11 + $0xb40] ss:$28 sps:$4 sm:$0xff]  }
 0x4b9   :  { %7827 = vmatprep.subr.bf16.mxu0 %v9881_v20  ;;  %v9948_v20 = vld [vmem:[#allocation11 + $0xd38] ss:$28 sps:$4 sm:$0xff]  }
 0x4ba   :  { %9214 = vmatpush3.bf16.msra.mxu1 %v9882_v21  ;;  %v9944_v21 = vld [vmem:[#allocation11 + $0x7f0] ss:$28 sps:$4 sm:$0xff]  }
 0x4bb   :  { %9215 = vmatprep.subr.bf16.mxu1 %v9883_v22  ;;  %v9951_v22 = vld [vmem:[#allocation11 + $0x82c] ss:$28 sps:$4 sm:$0xff]  }
 0x4bc   :  { %7828 = vmatpush1.bf16.msra.mxu0 %v9879_v24  ;;  %v9952_v24 = vld [vmem:[#allocation11 + $0xb78] ss:$28 sps:$4 sm:$0xff]  }
 0x4bd   :  { %7829 = vmatprep.subr.bf16.mxu0 %v9886_v26  ;;  %v9953_v26 = vld [vmem:[#allocation11 + $0xd70] ss:$28 sps:$4 sm:$0xff]  }
 0x4be   :  { %9216 = vmatpush3.bf16.msra.mxu1 %v9887_v28  ;;  %v9949_v28 = vld [vmem:[#allocation11 + $0x828] ss:$28 sps:$4 sm:$0xff]  }
 0x4bf   :  { %9223 = vmatprep.subr.bf16.mxu1 %v9888_v32  ;;  %v9956_v32 = vld [vmem:[#allocation11 + $0x864] ss:$28 sps:$4 sm:$0xff]  }
 0x4c0   :  { %7830 = vmatpush1.bf16.msra.mxu0 %v9884_v35  ;;  %v9957_v35 = vld [vmem:[#allocation11 + $0xbb0] ss:$28 sps:$4 sm:$0xff]  }
 0x4c1   :  { %8016 = vmatmul.mubr.bf16.vlgmr.msra.gmra.mrb[28].mxu1 %v10533_v25  ;;  %7831 = vmatprep.subr.bf16.mxu0 %v9891_v13  ;;  %v9958_v13 = vld [vmem:[#allocation11 + $0xda8] ss:$28 sps:$4 sm:$0xff]  }
 0x4c2   :  { %9224 = vmatpush3.bf16.msra.mxu1 %v9892_v37  ;;  %8056 = vmatprep.mubr.bf16.mxu1 %v10551_v11  ;;  %v9954_v37 = vld [vmem:[#allocation11 + $0x860] ss:$28 sps:$4 sm:$0xff]  }
 0x4c3   :  { %9225 = vmatprep.subr.bf16.mxu1 %v9893_v38  ;;  %v9961_v38 = vld [vmem:[#allocation11 + $0x89c] ss:$28 sps:$4 sm:$0xff]  }
 0x4c4   :  { %7832 = vmatpush1.bf16.msra.mxu0 %v9889_v62  ;;  %v9962_v62 = vld [vmem:[#allocation11 + $0xbe8] ss:$28 sps:$4 sm:$0xff]  }
 0x4c5   :  { %7833 = vmatprep.subr.bf16.mxu0 %v9896_v48  ;;  %v9963_v48 = vld [vmem:[#allocation11 + $0xde0] ss:$28 sps:$4 sm:$0xff]  }
 0x4c6   :  { %9226 = vmatpush3.bf16.msra.mxu1 %v9897_v36  ;;  %v9959_v36 = vld [vmem:[#allocation11 + $0x898] ss:$28 sps:$4 sm:$0xff]  }
 0x4c7   :  { %9227 = vmatprep.subr.bf16.mxu1 %v9898_v23  ;;  %v9966_v23 = vld [vmem:[#allocation11 + $0x8d4] ss:$28 sps:$4 sm:$0xff]  }
 0x4c8   :  { %7834 = vmatpush1.bf16.msra.mxu0 %v9894_v50  ;;  %v9967_v50 = vld [vmem:[#allocation11 + $0xc20] ss:$28 sps:$4 sm:$0xff]  }
 0x4c9   :  { %7835 = vmatprep.subr.bf16.mxu0 %v9901_v43  ;;  %v9964_v43 = vld [vmem:[#allocation11 + $0x8d0] ss:$28 sps:$4 sm:$0xff]  }
 0x4ca   :  { %9228 = vmatpush3.bf16.msra.mxu1 %v9902_v40  ;;  %v9970_v40 = vld [vmem:[#allocation11 + $0x90c] ss:$28 sps:$4 sm:$0xff]  }
 0x4cb   :  { %9229 = vmatprep.subr.bf16.mxu1 %v9903_v47  ;;  %v9968_v47 = vld [vmem:[#allocation11 + $0x908] ss:$28 sps:$4 sm:$0xff]  }
 0x4cc   :  { %7836 = vmatpush1.bf16.msra.mxu0 %v9899_v41  ;;  %v9973_v41 = vld [vmem:[#allocation11 + $0x944] ss:$28 sps:$4 sm:$0xff]  }
 0x4cd   :  { %7837 = vmatprep.subr.bf16.mxu0 %v9906_v42  ;;  %v9971_v42 = vld [vmem:[#allocation11 + $0x940] ss:$28 sps:$4 sm:$0xff]  }
 0x4ce   :  { %9230 = vmatpush3.bf16.msra.mxu1 %v9907_v39  ;;  %v9976_v39 = vld [vmem:[#allocation11 + $0x97c] ss:$28 sps:$4 sm:$0xff]  }
 0x4cf   :  { %9231 = vmatprep.subr.bf16.mxu1 %v9908_v27  ;;  %v9974_v27 = vld [vmem:[#allocation11 + $0x978] ss:$28 sps:$4 sm:$0xff]  }
 0x4d0   :  { %7838 = vmatpush1.bf16.msra.mxu0 %v9904_v44  ;;  %v9979_v44 = vld [vmem:[#allocation11 + $0x9b4] ss:$28 sps:$4 sm:$0xff]  }
 0x4d1   :  { %7839 = vmatprep.subr.bf16.mxu0 %v9911_v45  ;;  %v9977_v45 = vld [vmem:[#allocation11 + $0x9b0] ss:$28 sps:$4 sm:$0xff]  }
 0x4d2   :  { %9232 = vmatpush3.bf16.msra.mxu1 %v9912_v46  ;;  %v9982_v46 = vld [vmem:[#allocation11 + $0x9ec] ss:$28 sps:$4 sm:$0xff]  }
 0x4d3   :  { %9233 = vmatprep.subr.bf16.mxu1 %v9913_v31  ;;  %v9980_v31 = vld [vmem:[#allocation11 + $0x9e8] ss:$28 sps:$4 sm:$0xff]  }
 0x4d4   :  { %7840 = vmatpush1.bf16.msra.mxu0 %v9909_v49  ;;  %v9985_v49 = vld [vmem:[#allocation11 + $0xa24] ss:$28 sps:$4 sm:$0xff]  }
 0x4d5   :  { %7841 = vmatprep.subr.bf16.mxu0 %v9916_v53  ;;  %v9983_v53 = vld [vmem:[#allocation11 + $0xa20] ss:$28 sps:$4 sm:$0xff]  }
 0x4d6   :  { %9234 = vmatpush3.bf16.msra.mxu1 %v9917_v54  ;;  %v9988_v54 = vld [vmem:[#allocation11 + $0xa5c] ss:$28 sps:$4 sm:$0xff]  }
 0x4d7   :  { %9235 = vmatprep.subr.bf16.mxu1 %v9918_v52  ;;  %v9986_v52 = vld [vmem:[#allocation11 + $0xa58] ss:$28 sps:$4 sm:$0xff]  }
 0x4d8   :  { %7842 = vmatpush1.bf16.msra.mxu0 %v9914_v55  ;;  %v9991_v55 = vld [vmem:[#allocation11 + $0xa94] ss:$28 sps:$4 sm:$0xff]  }
 0x4d9   :  { %7843 = vmatprep.subr.bf16.mxu0 %v9921_v56  ;;  %v9989_v56 = vld [vmem:[#allocation11 + $0xa90] ss:$28 sps:$4 sm:$0xff]  }
 0x4da   :  { %9236 = vmatpush3.bf16.msra.mxu1 %v9922_v57  ;;  %v9994_v57 = vld [vmem:[#allocation11 + $0xacc] ss:$28 sps:$4 sm:$0xff]  }
 0x4db   :  { %9237 = vmatprep.subr.bf16.mxu1 %v9923_v59  ;;  %v9992_v59 = vld [vmem:[#allocation11 + $0xac8] ss:$28 sps:$4 sm:$0xff]  }
 0x4dc   :  { %7844 = vmatpush1.bf16.msra.mxu0 %v9919_v60  ;;  %v9997_v60 = vld [vmem:[#allocation11 + $0xb04] ss:$28 sps:$4 sm:$0xff]  }
 0x4dd   :  { %7856 = vmatprep.subr.bf16.mxu0 %v9926_v61  ;;  %v9995_v61 = vld [vmem:[#allocation11 + $0xb00] ss:$28 sps:$4 sm:$0xff]  }
 0x4de   :  { %9238 = vmatpush3.bf16.msra.mxu1 %v9927_v63  ;;  %v10000_v63 = vld [vmem:[#allocation11 + $0xb3c] ss:$28 sps:$4 sm:$0xff]  }
 0x4df   :  { %7846 = vmatmul.mubr.bf16.vlgmr.msra.gmra.mrb[20].mxu0 %v10533_v25  ;;  %9245 = vmatprep.subr.bf16.mxu1 %v9928_v1  ;;  %v9941_v25 = vld [vmem:[#allocation11 + $0x7bc] ss:$28 sps:$4 sm:$0xff]  }
 0x4e0   :  { %7857 = vmatpush1.bf16.msra.mxu0 %v9924_v2  ;;  %7888 = vmatprep.mubr.bf16.mxu0 %v10551_v11  ;;  %v9939_v11 = vld [vmem:[#allocation11 + $0x7b8] ss:$28 sps:$4 sm:$0xff]  }
 0x4e1   :  { %8057 = vmatmul.mubr.bf16.vlgmr.msra.gmra.mrb[32].mxu1 %v10549_v9  ;;  %7858 = vmatprep.subr.bf16.mxu0 %v9931_v58  ;;  %v9998_v1 = vld [vmem:[#allocation11 + $0xb38] ss:$28 sps:$4 sm:$0xff]   ;;  %v10001_v58 = vld [vmem:[#allocation11 + $0xb70] ss:$28 sps:$4 sm:$0xff]  }
 0x4e2   :  { %9246 = vmatpush3.bf16.msra.mxu1 %v9932_v3  ;;  %8097 = vmatprep.mubr.bf16.mxu1 %v10565_v0  ;;  %v10003_v2 = vld [vmem:[#allocation11 + $0xb74] ss:$28 sps:$4 sm:$0xff]   ;;  %v10586_v3 = vld [vmem:[#allocation13] sm:$0xff] }
 0x4e3   :  { %9247 = vmatprep.subr.bf16.mxu1 %v9933_v4  ;;  %v10004_v4 = vld [vmem:[#allocation11 + $0xba8] ss:$28 sps:$4 sm:$0xff]  }
 0x4e4   :  { %7859 = vmatpush1.bf16.msra.mxu0 %v9929_v29  ;;  %v5094_v29 = vrot.slane %v10586_v3, %v10426_v17  ;;  %v10010_v17 = vld [vmem:[#allocation11 + $0xc18] ss:$28 sps:$4 sm:$0xff]  }
 0x4e5   :  { %7860 = vmatprep.subr.bf16.mxu0 %v9936_v5  ;;  %v10009_v5 = vld [vmem:[#allocation11 + $0xbe4] ss:$28 sps:$4 sm:$0xff]  }
 0x4e6   :  { %9248 = vmatpush3.bf16.msra.mxu1 %v9937_v6 }
 0x4e7   :  { %9249 = vmatprep.subr.bf16.mxu1 %v9938_v7 }
 0x4e8   :  { %7861 = vmatpush1.bf16.msra.mxu0 %v9934_v51 }
 0x4e9   :  { %7862 = vmatprep.subr.bf16.mxu0 %v9941_v25 }
 0x4ea   :  { %9250 = vmatpush3.bf16.msra.mxu1 %v9942_v15 }
 0x4eb   :  { %9251 = vmatprep.subr.bf16.mxu1 %v9943_v8  ;;  %v10007_v8 = vld [vmem:[#allocation11 + $0xbe0] ss:$28 sps:$4 sm:$0xff]  }
 0x4ec   :  { %7863 = vmatpush1.bf16.msra.mxu0 %v9939_v11 }
 0x4ed   :  { %7864 = vmatprep.subr.bf16.mxu0 %v9946_v12 }
 0x4ee   :  { %9252 = vmatpush3.bf16.msra.mxu1 %v9947_v19  ;;  %v10012_v19 = vld [vmem:[#allocation11 + $0xc1c] ss:$28 sps:$4 sm:$0xff]  }
 0x4ef   :  { %9253 = vmatprep.subr.bf16.mxu1 %v9948_v20  ;;  %v10015_v20 = vld [vmem:[#allocation11 + $0xc54] ss:$28 sps:$4 sm:$0xff]  }
 0x4f0   :  { %7865 = vmatpush1.bf16.msra.mxu0 %v9944_v21  ;;  %v10013_v21 = vld [vmem:[#allocation11 + $0xc50] ss:$28 sps:$4 sm:$0xff]  }
 0x4f1   :  { %7866 = vmatprep.subr.bf16.mxu0 %v9951_v22  ;;  %v10018_v22 = vld [vmem:[#allocation11 + $0xc8c] ss:$28 sps:$4 sm:$0xff]  }
 0x4f2   :  { %9254 = vmatpush3.bf16.msra.mxu1 %v9952_v24 }
 0x4f3   :  { %9255 = vmatprep.subr.bf16.mxu1 %v9953_v26 }
 0x4f4   :  { %7867 = vmatpush1.bf16.msra.mxu0 %v9949_v28  ;;  %v10016_v28 = vld [vmem:[#allocation11 + $0xc88] ss:$28 sps:$4 sm:$0xff]  }
 0x4f5   :  { %7868 = vmatprep.subr.bf16.mxu0 %v9956_v32 }
 0x4f6   :  { %9256 = vmatpush3.bf16.msra.mxu1 %v9957_v35  ;;  %v10021_v35 = vld [vmem:[#allocation11 + $0xcc4] ss:$28 sps:$4 sm:$0xff]  }
 0x4f7   :  { %9257 = vmatprep.subr.bf16.mxu1 %v9958_v13 }
 0x4f8   :  { %7869 = vmatpush1.bf16.msra.mxu0 %v9954_v37  ;;  %v10019_v37 = vld [vmem:[#allocation11 + $0xcc0] ss:$28 sps:$4 sm:$0xff]  }
 0x4f9   :  { %7870 = vmatprep.subr.bf16.mxu0 %v9961_v38  ;;  %v10024_v38 = vld [vmem:[#allocation11 + $0xcfc] ss:$28 sps:$4 sm:$0xff]  }
 0x4fa   :  { %9258 = vmatpush3.bf16.msra.mxu1 %v9962_v62  ;;  %v10022_v62 = vld [vmem:[#allocation11 + $0xcf8] ss:$28 sps:$4 sm:$0xff]  }
 0x4fb   :  { %9259 = vmatprep.subr.bf16.mxu1 %v9963_v48  ;;  %v10027_v48 = vld [vmem:[#allocation11 + $0xd34] ss:$28 sps:$4 sm:$0xff]  }
 0x4fc   :  { %7871 = vmatpush1.bf16.msra.mxu0 %v9959_v36  ;;  %v10025_v36 = vld [vmem:[#allocation11 + $0xd30] ss:$28 sps:$4 sm:$0xff]  }
 0x4fd   :  { %7872 = vmatprep.subr.bf16.mxu0 %v9966_v23  ;;  %v10030_v23 = vld [vmem:[#allocation11 + $0xd6c] ss:$28 sps:$4 sm:$0xff]  }
 0x4fe   :  { %9260 = vmatpush3.bf16.msra.mxu1 %v9967_v50  ;;  %v10028_v50 = vld [vmem:[#allocation11 + $0xd68] ss:$28 sps:$4 sm:$0xff]  }
 0x500   :  { %7873 = vmatpush1.bf16.msra.mxu0 %v9964_v43  ;;  %v5098_v43 = vrot.slane %v10586_v3, %v10423_v16  ;;  %v10034_v16 = vld [vmem:[#allocation11 + $0xdd8] ss:$28 sps:$4 sm:$0xff]  }
 0x501   :  { %8098 = vmatmul.mubr.bf16.vlgmr.msra.gmra.mrb[36].mxu1 %v10563_v33  ;;  %7874 = vmatprep.subr.bf16.mxu0 %v9970_v40  ;;  %v10033_v40 = vld [vmem:[#allocation11 + $0xda4] ss:$28 sps:$4 sm:$0xff]  }
 0x504   :  { %7875 = vmatpush1.bf16.msra.mxu0 %v9968_v47  ;;  %v5102_v47 = vrot.slane %v10586_v3, %v10429_v18 }
 0x505   :  { %7876 = vmatprep.subr.bf16.mxu0 %v9973_v41 }
 0x508   :  { %7877 = vmatpush1.bf16.msra.mxu0 %v9971_v42  ;;  %v10031_v42 = vld [vmem:[#allocation11 + $0xda0] ss:$28 sps:$4 sm:$0xff]  }
 0x509   :  { %7878 = vmatprep.subr.bf16.mxu0 %v9976_v39 }
 0x50c   :  { %7879 = vmatpush1.bf16.msra.mxu0 %v9974_v27 }
 0x50d   :  { %7880 = vmatprep.subr.bf16.mxu0 %v9979_v44  ;;  %v10036_v44 = vld [vmem:[#allocation11 + $0xddc] ss:$28 sps:$4 sm:$0xff]  }
 0x510   :  { %7881 = vmatpush1.bf16.msra.mxu0 %v9977_v45 }
 0x511   :  { %7882 = vmatprep.subr.bf16.mxu0 %v9982_v46 }
 0x514   :  { %7883 = vmatpush1.bf16.msra.mxu0 %v9980_v31 }
 0x515   :  { %7884 = vmatprep.subr.bf16.mxu0 %v9985_v49 }
 0x518   :  { %7885 = vmatpush1.bf16.msra.mxu0 %v9983_v53 }
 0x519   :  { %7886 = vmatprep.subr.bf16.mxu0 %v9988_v54 }
 0x51c   :  { %7887 = vmatpush1.bf16.msra.mxu0 %v9986_v52 }
 0x51d   :  { %7899 = vmatprep.subr.bf16.mxu0 %v9991_v55 }
 0x51f   :  { %7889 = vmatmul.mubr.bf16.vlgmr.msra.gmra.mrb[20].mxu0 %v10549_v9  ;;  %v10006_v9 = vld [vmem:[#allocation11 + $0xbac] ss:$28 sps:$4 sm:$0xff]  }
 0x520   :  { %7900 = vmatpush1.bf16.msra.mxu0 %v9989_v56  ;;  %7931 = vmatprep.mubr.bf16.mxu0 %v10565_v0  ;;  %v5090_v0 = vrot.slane %v10586_v3, %v10418_v14 }
 0x521   :  { %7901 = vmatprep.subr.bf16.mxu0 %v9994_v57 }
 0x524   :  { %7902 = vmatpush1.bf16.msra.mxu0 %v9992_v59 }
 0x525   :  { %7903 = vmatprep.subr.bf16.mxu0 %v9997_v60 }
 0x528   :  { %7904 = vmatpush1.bf16.msra.mxu0 %v9995_v61 }
 0x529   :  { %7905 = vmatprep.subr.bf16.mxu0 %v10000_v63 }
 0x52c   :  { %7906 = vmatpush1.bf16.msra.mxu0 %v9998_v1  ;;  %v5114_v1 = vrot.slane %v10586_v3, %v10459_v10 }
 0x52d   :  { %7907 = vmatprep.subr.bf16.mxu0 %v10003_v2 }
 0x530   :  { %7908 = vmatpush1.bf16.msra.mxu0 %v10001_v58 }
 0x531   :  { %7909 = vmatprep.subr.bf16.mxu0 %v10006_v9 }
 0x532   :  { %v7589_v6 = vpop.f32.mrb[16].mxu0 }
 0x533   :  { %v9287_v7 = vadd.f32 %v7589_v6, %v5090_v0  ;;  %v7591_v51 = vpop.f32.mrb[17].mxu0 }
 0x534   :  { %v9288_v25 = vadd.f32 %v7591_v51, %v5094_v29  ;;  %7910 = vmatpush1.bf16.msra.mxu0 %v10004_v4  ;;  %v7593_v15 = vpop.f32.mrb[18].mxu0 }
 0x535   :  { %10037 = vtanh.f32 %v9287_v7  ;;  %v9289_v11 = vadd.f32 %v7593_v15, %v5090_v0  ;;  %v7595_v12 = vpop.f32.mrb[19].mxu0  ;;  %7911 = vmatprep.subr.bf16.mxu0 %v10009_v5 }
 0x536   :  { %10039 = vtanh.f32 %v9288_v25  ;;  %v9290_v14 = vadd.f32 %v7595_v12, %v5094_v29 }
 0x537   :  { %10041 = vtanh.f32 %v9289_v11 }
 0x538   :  { %10043 = vtanh.f32 %v9290_v14  ;;  %7912 = vmatpush1.bf16.msra.mxu0 %v10007_v8 }
 0x539   :  { %7913 = vmatprep.subr.bf16.mxu0 %v10012_v19 }
 0x53c   :  { %7914 = vmatpush1.bf16.msra.mxu0 %v10010_v17 }
 0x53d   :  { %7915 = vmatprep.subr.bf16.mxu0 %v10015_v20 }
 0x53f   :  { %v10038_v24 = vpop.eup %10037 }
 0x540   :  { %v10040_v26 = vpop.eup %10039  ;;  %8120 = vst [vmem:[#allocation14] sm:$0xff] %v10038_v24  ;;  %7916 = vmatpush1.bf16.msra.mxu0 %v10013_v21 }
 0x541   :  { %v10042_v32 = vpop.eup %10041  ;;  %8121 = vst [vmem:[#allocation14 + $0x8] sm:$0xff] %v10040_v26  ;;  %7917 = vmatprep.subr.bf16.mxu0 %v10018_v22 }
 0x542   :  { %v10044_v13 = vpop.eup %10043  ;;  %8127 = vst [vmem:[#allocation14 + $0x38] sm:$0xff] %v10042_v32 }
 0x543   :  { %8128 = vst [vmem:[#allocation14 + $0x40] sm:$0xff] %v10044_v13  ;;  %v5106_v13 = vrot.slane %v10586_v3, %v10453_v30 }
 0x544   :  { %7918 = vmatpush1.bf16.msra.mxu0 %v10016_v28 }
 0x545   :  { %7919 = vmatprep.subr.bf16.mxu0 %v10021_v35 }
 0x548   :  { %7920 = vmatpush1.bf16.msra.mxu0 %v10019_v37  ;;  %v5110_v37 = vrot.slane %v10586_v3, %v10456_v34 }
 0x549   :  { %7921 = vmatprep.subr.bf16.mxu0 %v10024_v38 }
 0x54c   :  { %7922 = vmatpush1.bf16.msra.mxu0 %v10022_v62 }
 0x54d   :  { %7923 = vmatprep.subr.bf16.mxu0 %v10027_v48 }
 0x550   :  { %7924 = vmatpush1.bf16.msra.mxu0 %v10025_v36 }
 0x551   :  { %7925 = vmatprep.subr.bf16.mxu0 %v10030_v23 }
 0x554   :  { %7926 = vmatpush1.bf16.msra.mxu0 %v10028_v50  ;;  %v7761_v41 = vpop.f32.mrb[20].mxu1 }
 0x555   :  { %v9291_v39 = vadd.f32 %v7761_v41, %v5098_v43  ;;  %v7763_v27 = vpop.f32.mrb[21].mxu1  ;;  %7927 = vmatprep.subr.bf16.mxu0 %v10033_v40 }
 0x556   :  { %v9292_v45 = vadd.f32 %v7763_v27, %v5102_v47  ;;  %v7765_v46 = vpop.f32.mrb[22].mxu1 }
 0x557   :  { %10045 = vtanh.f32 %v9291_v39  ;;  %v9293_v31 = vadd.f32 %v7765_v46, %v5098_v43  ;;  %v7767_v49 = vpop.f32.mrb[23].mxu1 }
 0x558   :  { %10047 = vtanh.f32 %v9292_v45  ;;  %v9294_v53 = vadd.f32 %v7767_v49, %v5102_v47  ;;  %7928 = vmatpush1.bf16.msra.mxu0 %v10031_v42 }
 0x559   :  { %10049 = vtanh.f32 %v9293_v31  ;;  %7929 = vmatprep.subr.bf16.mxu0 %v10036_v44 }
 0x55a   :  { %10051 = vtanh.f32 %v9294_v53 }
 0x55c   :  { %7930 = vmatpush1.bf16.msra.mxu0 %v10034_v16 }
 0x55f   :  { %7932 = vmatmul.mubr.bf16.vlgmr.msra.gmra.mrb[20].mxu0 %v10563_v33 }
 0x561   :  { %v10046_v18 = vpop.eup %10045 }
 0x562   :  { %v10048_v54 = vpop.eup %10047  ;;  %8122 = vst [vmem:[#allocation14 + $0x10] sm:$0xff] %v10046_v18 }
 0x563   :  { %v10050_v52 = vpop.eup %10049  ;;  %8123 = vst [vmem:[#allocation14 + $0x18] sm:$0xff] %v10048_v54 }
 0x564   :  { %v10052_v55 = vpop.eup %10051  ;;  %8129 = vst [vmem:[#allocation14 + $0x48] sm:$0xff] %v10050_v52 }
 0x565   :  { %8130 = vst [vmem:[#allocation14 + $0x50] sm:$0xff] %v10052_v55 }
 0x574   :  { %v9195_v56 = vpop.f32.mrb[24].mxu1 }
 0x575   :  { %v9196_v57 = vpop.f32.mrb[25].mxu1 }
 0x576   :  { %v9197_v59 = vadd.f32 %v9196_v57, %v9195_v56  ;;  %v9198_v60 = vpop.f32.mrb[26].mxu1 }
 0x577   :  { %v9199_v61 = vpop.f32.mrb[27].mxu1 }
 0x578   :  { %v9200_v63 = vadd.f32 %v9199_v61, %v9198_v60  ;;  %v7977_v33 = vadd.f32 %v9197_v59, %v5114_v1 }
 0x57a   :  { %v7980_v29 = vadd.f32 %v9200_v63, %v5114_v1 }
 0x594   :  { %v9217_v2 = vpop.f32.mrb[28].mxu1 }
 0x595   :  { %v9218_v58 = vpop.f32.mrb[29].mxu1 }
 0x596   :  { %v9219_v9 = vadd.f32 %v9218_v58, %v9217_v2  ;;  %v9220_v0 = vpop.f32.mrb[30].mxu1 }
 0x597   :  { %v9221_v4 = vpop.f32.mrb[31].mxu1 }
 0x598   :  { %v8018_v5 = vadd.f32 %v9219_v9, %v7977_v33  ;;  %v9222_v6 = vadd.f32 %v9221_v4, %v9220_v0 }
 0x59a   :  { %v8021_v7 = vadd.f32 %v9222_v6, %v7980_v29 }
 0x5b4   :  { %v9239_v51 = vpop.f32.mrb[32].mxu1 }
 0x5b5   :  { %v9240_v25 = vpop.f32.mrb[33].mxu1 }
 0x5b6   :  { %v9241_v15 = vadd.f32 %v9240_v25, %v9239_v51  ;;  %v9242_v8 = vpop.f32.mrb[34].mxu1 }
 0x5b7   :  { %v9243_v11 = vpop.f32.mrb[35].mxu1 }
 0x5b8   :  { %v8059_v12 = vadd.f32 %v9241_v15, %v8018_v5  ;;  %v9244_v19 = vadd.f32 %v9243_v11, %v9242_v8 }
 0x5ba   :  { %v8062_v14 = vadd.f32 %v9244_v19, %v8021_v7 }
 0x5d4   :  { %v9261_v17 = vpop.f32.mrb[36].mxu1 }
 0x5d5   :  { %v9262_v10 = vpop.f32.mrb[37].mxu1 }
 0x5d6   :  { %v9263_v20 = vadd.f32 %v9262_v10, %v9261_v17  ;;  %v9264_v21 = vpop.f32.mrb[38].mxu1 }
 0x5d7   :  { %v9265_v22 = vpop.f32.mrb[39].mxu1 }
 0x5d8   :  { %v8100_v24 = vadd.f32 %v9263_v20, %v8059_v12  ;;  %v9266_v26 = vadd.f32 %v9265_v22, %v9264_v21 }
 0x5da   :  { %10053 = vtanh.f32 %v8100_v24  ;;  %v8103_v28 = vadd.f32 %v9266_v26, %v8062_v14 }
 0x5dc   :  { %10055 = vtanh.f32 %v8103_v28 }
 0x5e4   :  { %v10054_v32 = vpop.eup %10053 }
 0x5e5   :  { %8126 = vst [vmem:[#allocation14 + $0x30] sm:$0xff] %v10054_v32 }
 0x5e6   :  { %v10056_v35 = vpop.eup %10055 }
 0x5e7   :  { %8133 = vst [vmem:[#allocation14 + $0x68] sm:$0xff] %v10056_v35 }
 0x632   :  { %v7933_v38 = vpop.f32.mrb[20].mxu0 }
 0x633   :  { %v9295_v62 = vadd.f32 %v7933_v38, %v5106_v13  ;;  %v7935_v48 = vpop.f32.mrb[21].mxu0 }
 0x634   :  { %v9296_v36 = vadd.f32 %v7935_v48, %v5110_v37  ;;  %v7937_v23 = vpop.f32.mrb[22].mxu0 }
 0x635   :  { %10057 = vtanh.f32 %v9295_v62  ;;  %v9297_v50 = vadd.f32 %v7937_v23, %v5106_v13  ;;  %v7939_v43 = vpop.f32.mrb[23].mxu0 }
 0x636   :  { %10059 = vtanh.f32 %v9296_v36  ;;  %v9298_v40 = vadd.f32 %v7939_v43, %v5110_v37 }
 0x637   :  { %10061 = vtanh.f32 %v9297_v50 }
 0x638   :  { %10063 = vtanh.f32 %v9298_v40 }
 0x63f   :  { %v10058_v47 = vpop.eup %10057 }
 0x640   :  { %v10060_v41 = vpop.eup %10059  ;;  %8124 = vst [vmem:[#allocation14 + $0x20] sm:$0xff] %v10058_v47 }
 0x641   :  { %v10062_v30 = vpop.eup %10061  ;;  %8125 = vst [vmem:[#allocation14 + $0x28] sm:$0xff] %v10060_v41 }
 0x642   :  { %v10064_v34 = vpop.eup %10063  ;;  %8131 = vst [vmem:[#allocation14 + $0x58] sm:$0xff] %v10062_v30 }
 0x643   :  { %8132 = vst [vmem:[#allocation14 + $0x60] sm:$0xff] %v10064_v34 }
 0x644   :  { %10231 = shalt.err (!%p10228_p4)
}
 0x645   :  { %s10232_s15 = scalar_lea.hbm %s10622_s7, 1792 }
 0x646   :  { %p10233_p5 = scmp.ne.s32.totalorder %s10622_s7, %s10232_s15  ;;  %p10236_p6 = scmp.lt.u32.totalorder %s10232_s15, %s10622_s7 }
 0x648   :  { %p10238_p7 = pnand %p10236_p6, %p10233_p5 }
 0x64a   :  { %10241 = shalt.err (!%p10238_p7)
}
 0x64b   :  { %s10267_s21 = smov 896   ;;  %s10268_s22 = smov 56  }
 0x64c   :  { %8145 = dma.vmem_to_hbm [thread:$0]  %s8140_s3, 1792, %s10622_s7, [#allocation4], %s10267_s21, %s10267_s21, %s10268_s22  }
 0x64d   :  { %10250 = dma.done.wait [#allocation4], 1792  }
 0x64e   :  { %10251 = vsyncadd [#allocation4], 4294965504 }
 0x64f   :  { %8149 = vsyncpa [#allocation3], 1 }
 0x650   :  { %8150 = vsyncpa [#allocation6], 1 }
 0x651   :  { %8151 = vsyncpa [#allocation9], 1 }
 0x652   :  { %8152 = vsyncpa [#allocation12], 1 }
 0x653   :  { %8153 = vsyncpa [#allocation4], 1 }

</bundles_post_ra>
